<compile_context>
chip_gen: v6e
topology: v6e:2x2x1
jax: 0.10.0
libtpu: 0.0.40
codegen_flags: <defaults>
</compile_context>

<pallas_src>
import jax
import jax.numpy as jnp
from jax.experimental import pallas as pl
from jax.experimental.pallas import tpu as pltpu  # noqa: F401  (TPU backend)

# ----------------------------- model dims -----------------------------------
B = 8          # batch (support == query batch for this demo)
S = 8          # sequence length
H = 32         # hidden size
NH = 2         # attention heads
HD = H // NH   # head dim
FF = 64        # FFN hidden size
ENC = 32       # encoding dim produced by SeqTransformer
C = 2          # number of classes (from labels in the support batch)
VOCAB = 50
LN_EPS = 1e-5

_ENC_PARAM_NAMES = ("wqkv", "bqkv", "wo", "bo", "g1", "be1",
                    "w1", "b1", "w2", "b2", "g2", "be2", "wp", "bp")


# --------------------------- kernel-side math --------------------------------
def _layernorm(x, g, b):
    mu = jnp.mean(x, axis=-1, keepdims=True)
    var = jnp.mean((x - mu) ** 2, axis=-1, keepdims=True)
    return (x - mu) * jax.lax.rsqrt(var + LN_EPS) * g + b


def _encoder(x, wqkv, bqkv, wo, bo, g1, be1, w1, b1, w2, b2, g2, be2, wp, bp):
    """Shared SeqTransformer body. x: (B, S, H) -> encodings (B, ENC), all f32."""
    b, s, h = x.shape
    hd = h // NH

    x2 = x.reshape(b * s, h).astype(jnp.float32)                 # (B*S, H)

    # ---- fused QKV projection: one (B*S,H) x (H,3H) matmul ----
    qkv = jnp.dot(x2, wqkv, preferred_element_type=jnp.float32) + bqkv   # (B*S, 3H)
    q = qkv[:, 0:h].reshape(b, s, h)
    k = qkv[:, h:2 * h].reshape(b, s, h)
    v = qkv[:, 2 * h:3 * h].reshape(b, s, h)

    # ---- multi-head self attention, batched over sequences ----
    scale = jnp.float32(1.0 / (hd ** 0.5))
    attn = jnp.zeros((b * s, h), jnp.float32)
    for hh in range(NH):                                         # static head loop
        lo, hi = hh * hd, (hh + 1) * hd
        qs, ks, vs = q[:, :, lo:hi], k[:, :, lo:hi], v[:, :, lo:hi]      # (B, S, HD)
        sc = jnp.einsum("bqd,bkd->bqk", qs, ks,
                        preferred_element_type=jnp.float32) * scale      # (B, S, S)
        sc = sc - jnp.max(sc, axis=-1, keepdims=True)
        p = jnp.exp(sc)
        p = p * pl.reciprocal(jnp.sum(p, axis=-1, keepdims=True), approx=True)
        oh = jnp.einsum("bqk,bkd->bqd", p, vs,
                        preferred_element_type=jnp.float32)              # (B, S, HD)
        # per-head slice of the output projection avoids concatenating heads
        attn = attn + jnp.dot(oh.reshape(b * s, hd), wo[lo:hi, :],
                              preferred_element_type=jnp.float32)        # (B*S, H)
    attn = attn + bo

    x1 = _layernorm(x2 + attn, g1, be1)                                  # (B*S, H)

    # ---- feed-forward (ReLU, post-LN) ----
    h1 = jnp.maximum(jnp.dot(x1, w1, preferred_element_type=jnp.float32) + b1, 0.0)
    h2 = jnp.dot(h1, w2, preferred_element_type=jnp.float32) + b2
    x3 = _layernorm(x1 + h2, g2, be2)                                    # (B*S, H)

    # ---- mean pool over sequence + encoding projection ----
    pooled = jnp.mean(x3.reshape(b, s, h), axis=1)                       # (B, H)
    enc = jnp.dot(pooled, wp, preferred_element_type=jnp.float32) + bp   # (B, ENC)
    return enc


# ------------------------------ kernels --------------------------------------
def encode_kernel(x_ref, wqkv_ref, bqkv_ref, wo_ref, bo_ref, g1_ref, be1_ref,
                  w1_ref, b1_ref, w2_ref, b2_ref, g2_ref, be2_ref, wp_ref, bp_ref,
                  enc_ref):
    enc_ref[...] = _encoder(
        x_ref[...], wqkv_ref[...], bqkv_ref[...], wo_ref[...], bo_ref[...],
        g1_ref[...], be1_ref[...], w1_ref[...], b1_ref[...], w2_ref[...],
        b2_ref[...], g2_ref[...], be2_ref[...], wp_ref[...], bp_ref[...])


def forward_kernel(x_ref, wqkv_ref, bqkv_ref, wo_ref, bo_ref, g1_ref, be1_ref,
                   w1_ref, b1_ref, w2_ref, b2_ref, g2_ref, be2_ref, wp_ref, bp_ref,
                   wt_ref, bt_ref, logits_ref):
    enc = _encoder(
        x_ref[...], wqkv_ref[...], bqkv_ref[...], wo_ref[...], bo_ref[...],
        g1_ref[...], be1_ref[...], w1_ref[...], b1_ref[...], w2_ref[...],
        b2_ref[...], g2_ref[...], be2_ref[...], wp_ref[...], bp_ref[...])
    # classifier epilogue: F.linear(enc, W_task, b_task) with W_task pre-transposed
    logits_ref[...] = (
        jnp.dot(enc, wt_ref[...], preferred_element_type=jnp.float32) + bt_ref[...]
    )


# ------------------------------ wrappers --------------------------------------
def seq_transformer_encode(x, params):
    """x: (B, S, H) f32 -> encodings (B, ENC) f32.  Single un-gridded program."""
    return pl.pallas_call(
        encode_kernel,
        out_shape=jax.ShapeDtypeStruct((x.shape[0], ENC), jnp.float32),
    )(x, *[params[n] for n in _ENC_PARAM_NAMES])


def protomaml_forward(x, params, w_task, b_task):
    """forward(): logits = F.linear(SeqTransformer(x), W_task, b_task), fused."""
    wt_t = w_task.T                 # (ENC, C) pre-transposed: no in-kernel .T
    bt = b_task.reshape(1, -1)      # (1, C)
    return pl.pallas_call(
        forward_kernel,
        out_shape=jax.ShapeDtypeStruct((x.shape[0], w_task.shape[0]), jnp.float32),
    )(x, *[params[n] for n in _ENC_PARAM_NAMES], wt_t, bt)


def generate_clf_weights(labels, encodings, num_classes):
    """ProtoMAML classifier init: W = 2 * prototypes, b = -||prototypes||."""
    onehot = jax.nn.one_hot(labels, num_classes, dtype=jnp.float32)       # (B, C)
    counts = jnp.sum(onehot, axis=0, keepdims=True).T                     # (C, 1)
    counts = jnp.maximum(counts, 1.0)                # guard empty classes (NaN/Inf)
    prototypes = (onehot.T @ encodings) / counts                          # (C, ENC)
    w_init = 2.0 * prototypes
    b_init = -jnp.sqrt(jnp.sum(prototypes * prototypes, axis=1))
    return w_init, b_init


@jax.jit
def protomaml_episode(tokens, labels, params):
    # Embedding gather + positional add stay fused with the rest by XLA inside
    # this single jit (no extra pallas launch for an 8 KB gather).
    x = jnp.take(params["emb"], tokens, axis=0) + params["pos"][None, :, :]  # (B,S,H)

    # model_shared encoder -> support encodings -> ProtoMAML classifier init.
    enc = seq_transformer_encode(x, params)
    # TODO(synk): the inner-loop MAML adaptation (autograd gradient steps in
    # adapt()) is host-side training logic, not part of the forward kernel.
    w_task, b_task = generate_clf_weights(labels, enc, C)

    # forward(): model_task encoder + F.linear fused into one kernel.
    logits = protomaml_forward(x, params, w_task, b_task)
    return logits, enc


# ------------------------- deterministic params ------------------------------
def init_params(key):
    ks = jax.random.split(key, 8)
    scale = 0.1
    return {
        "emb":  scale * jax.random.normal(ks[0], (VOCAB, H), jnp.float32),
        "pos":  scale * jax.random.normal(ks[1], (S, H), jnp.float32),
        "wqkv": scale * jax.random.normal(ks[2], (H, 3 * H), jnp.float32),  # fused QKV
        "bqkv": jnp.zeros((1, 3 * H), jnp.float32),
        "wo":   scale * jax.random.normal(ks[3], (H, H), jnp.float32),
        "bo":   jnp.zeros((1, H), jnp.float32),
        "g1":   jnp.ones((1, H), jnp.float32),
        "be1":  jnp.zeros((1, H), jnp.float32),
        "w1":   scale * jax.random.normal(ks[4], (H, FF), jnp.float32),
        "b1":   jnp.zeros((1, FF), jnp.float32),
        "w2":   scale * jax.random.normal(ks[5], (FF, H), jnp.float32),
        "b2":   jnp.zeros((1, H), jnp.float32),
        "g2":   jnp.ones((1, H), jnp.float32),
        "be2":  jnp.zeros((1, H), jnp.float32),
        "wp":   scale * jax.random.normal(ks[6], (H, ENC), jnp.float32),
        "bp":   jnp.zeros((1, ENC), jnp.float32),
    }


# --------------------------------- main ---------------------------------------
if __name__ == "__main__":
    key = jax.random.PRNGKey(0)
    k_param, k_tok = jax.random.split(key)

    params = init_params(k_param)

    # synthetic "model_input": token ids (B, S) and support labels
    tokens = jax.random.randint(k_tok, (B, S), 0, VOCAB)
    labels = jnp.array([0, 0, 0, 0, 1, 1, 1, 1], dtype=jnp.int32)

    logits, encodings = protomaml_episode(tokens, labels, params)
    logits = jax.block_until_ready(logits)

    assert logits.shape == (B, C)
    assert encodings.shape == (B, ENC)
    assert bool(jnp.all(jnp.isfinite(logits)))
    print("KERNEL_OK")
</pallas_src>

<mosaic_0001>
module attributes {stable_mosaic.version = 11 : i64} {
  func.func @encode_kernel(%arg0: memref<8x8x32xf32, #tpu.memory_space<vmem>>, %arg1: memref<32x96xf32, #tpu.memory_space<vmem>>, %arg2: memref<1x96xf32, #tpu.memory_space<vmem>>, %arg3: memref<32x32xf32, #tpu.memory_space<vmem>>, %arg4: memref<1x32xf32, #tpu.memory_space<vmem>>, %arg5: memref<1x32xf32, #tpu.memory_space<vmem>>, %arg6: memref<1x32xf32, #tpu.memory_space<vmem>>, %arg7: memref<32x64xf32, #tpu.memory_space<vmem>>, %arg8: memref<1x64xf32, #tpu.memory_space<vmem>>, %arg9: memref<64x32xf32, #tpu.memory_space<vmem>>, %arg10: memref<1x32xf32, #tpu.memory_space<vmem>>, %arg11: memref<1x32xf32, #tpu.memory_space<vmem>>, %arg12: memref<1x32xf32, #tpu.memory_space<vmem>>, %arg13: memref<32x32xf32, #tpu.memory_space<vmem>>, %arg14: memref<1x32xf32, #tpu.memory_space<vmem>>, %arg15: memref<8x32xf32, #tpu.memory_space<vmem>>) attributes {dimension_semantics = [], scalar_prefetch = 0 : i64, scratch_operands = 0 : i64, tpu.core_type = #tpu.core_type<tc>} {
    %c0 = arith.constant 0 : index
    %c0_0 = arith.constant 0 : index
    %c0_1 = arith.constant 0 : index
    %0 = vector.load %arg0[%c0, %c0_0, %c0_1] : memref<8x8x32xf32, #tpu.memory_space<vmem>>, vector<8x8x32xf32>
    %c0_2 = arith.constant 0 : index
    %c0_3 = arith.constant 0 : index
    %1 = vector.load %arg1[%c0_2, %c0_3] : memref<32x96xf32, #tpu.memory_space<vmem>>, vector<32x96xf32>
    %c0_4 = arith.constant 0 : index
    %c0_5 = arith.constant 0 : index
    %2 = vector.load %arg2[%c0_4, %c0_5] : memref<1x96xf32, #tpu.memory_space<vmem>>, vector<1x96xf32>
    %c0_6 = arith.constant 0 : index
    %c0_7 = arith.constant 0 : index
    %3 = vector.load %arg3[%c0_6, %c0_7] : memref<32x32xf32, #tpu.memory_space<vmem>>, vector<32x32xf32>
    %c0_8 = arith.constant 0 : index
    %c0_9 = arith.constant 0 : index
    %4 = vector.load %arg4[%c0_8, %c0_9] : memref<1x32xf32, #tpu.memory_space<vmem>>, vector<1x32xf32>
    %c0_10 = arith.constant 0 : index
    %c0_11 = arith.constant 0 : index
    %5 = vector.load %arg5[%c0_10, %c0_11] : memref<1x32xf32, #tpu.memory_space<vmem>>, vector<1x32xf32>
    %c0_12 = arith.constant 0 : index
    %c0_13 = arith.constant 0 : index
    %6 = vector.load %arg6[%c0_12, %c0_13] : memref<1x32xf32, #tpu.memory_space<vmem>>, vector<1x32xf32>
    %c0_14 = arith.constant 0 : index
    %c0_15 = arith.constant 0 : index
    %7 = vector.load %arg7[%c0_14, %c0_15] : memref<32x64xf32, #tpu.memory_space<vmem>>, vector<32x64xf32>
    %c0_16 = arith.constant 0 : index
    %c0_17 = arith.constant 0 : index
    %8 = vector.load %arg8[%c0_16, %c0_17] : memref<1x64xf32, #tpu.memory_space<vmem>>, vector<1x64xf32>
    %c0_18 = arith.constant 0 : index
    %c0_19 = arith.constant 0 : index
    %9 = vector.load %arg9[%c0_18, %c0_19] : memref<64x32xf32, #tpu.memory_space<vmem>>, vector<64x32xf32>
    %c0_20 = arith.constant 0 : index
    %c0_21 = arith.constant 0 : index
    %10 = vector.load %arg10[%c0_20, %c0_21] : memref<1x32xf32, #tpu.memory_space<vmem>>, vector<1x32xf32>
    %c0_22 = arith.constant 0 : index
    %c0_23 = arith.constant 0 : index
    %11 = vector.load %arg11[%c0_22, %c0_23] : memref<1x32xf32, #tpu.memory_space<vmem>>, vector<1x32xf32>
    %c0_24 = arith.constant 0 : index
    %c0_25 = arith.constant 0 : index
    %12 = vector.load %arg12[%c0_24, %c0_25] : memref<1x32xf32, #tpu.memory_space<vmem>>, vector<1x32xf32>
    %c0_26 = arith.constant 0 : index
    %c0_27 = arith.constant 0 : index
    %13 = vector.load %arg13[%c0_26, %c0_27] : memref<32x32xf32, #tpu.memory_space<vmem>>, vector<32x32xf32>
    %c0_28 = arith.constant 0 : index
    %c0_29 = arith.constant 0 : index
    %14 = vector.load %arg14[%c0_28, %c0_29] : memref<1x32xf32, #tpu.memory_space<vmem>>, vector<1x32xf32>
    %15 = vector.shape_cast %0 : vector<8x8x32xf32> to vector<64x32xf32>
    %cst = arith.constant dense<0.000000e+00> : vector<64x96xf32>
    %16 = tpu.matmul %15, %1, %cst {dimension_numbers = #tpu.dot_dimension_numbers<[1], [0], [0], [1], [0, 0, 1, 1], [], []>} : vector<64x32xf32>, vector<32x96xf32>, vector<64x96xf32> -> vector<64x96xf32>
    %17 = vector.broadcast %2 : vector<1x96xf32> to vector<64x96xf32>
    %18 = arith.addf %16, %17 : vector<64x96xf32>
    %19 = vector.extract_strided_slice %18 {offsets = [0, 0], sizes = [64, 32], strides = [1, 1]} : vector<64x96xf32> to vector<64x32xf32>
    %20 = vector.shape_cast %19 : vector<64x32xf32> to vector<8x8x32xf32>
    %21 = vector.extract_strided_slice %18 {offsets = [0, 32], sizes = [64, 32], strides = [1, 1]} : vector<64x96xf32> to vector<64x32xf32>
    %22 = vector.shape_cast %21 : vector<64x32xf32> to vector<8x8x32xf32>
    %23 = vector.extract_strided_slice %18 {offsets = [0, 64], sizes = [64, 32], strides = [1, 1]} : vector<64x96xf32> to vector<64x32xf32>
    %24 = vector.shape_cast %23 : vector<64x32xf32> to vector<8x8x32xf32>
    %cst_30 = arith.constant 0.000000e+00 : f32
    %25 = vector.broadcast %cst_30 : f32 to vector<64x32xf32>
    %26 = vector.extract_strided_slice %20 {offsets = [0, 0, 0], sizes = [8, 8, 16], strides = [1, 1, 1]} : vector<8x8x32xf32> to vector<8x8x16xf32>
    %27 = vector.extract_strided_slice %22 {offsets = [0, 0, 0], sizes = [8, 8, 16], strides = [1, 1, 1]} : vector<8x8x32xf32> to vector<8x8x16xf32>
    %28 = vector.extract_strided_slice %24 {offsets = [0, 0, 0], sizes = [8, 8, 16], strides = [1, 1, 1]} : vector<8x8x32xf32> to vector<8x8x16xf32>
    "tpu.trace_start"() <{level = 10 : i32, message = "bqd,bkd->bqk"}> : () -> ()
    %cst_31 = arith.constant dense<0.000000e+00> : vector<8x8x8xf32>
    %29 = tpu.matmul %26, %27, %cst_31 {dimension_numbers = #tpu.dot_dimension_numbers<[2], [2], [1], [1], [0, 0, 0, 1, 1, 1], [0], [0]>} : vector<8x8x16xf32>, vector<8x8x16xf32>, vector<8x8x8xf32> -> vector<8x8x8xf32>
    "tpu.trace_stop"() : () -> ()
    %cst_32 = arith.constant 2.500000e-01 : f32
    %30 = vector.broadcast %cst_32 : f32 to vector<8x8x8xf32>
    %31 = arith.mulf %29, %30 : vector<8x8x8xf32>
    %cst_33 = arith.constant dense<0xFF800000> : vector<8x8xf32>
    %32 = vector.multi_reduction <maximumf>, %31, %cst_33 [2] : vector<8x8x8xf32> to vector<8x8xf32>
    %33 = vector.shape_cast %32 : vector<8x8xf32> to vector<8x8x1xf32>
    %34 = vector.broadcast %33 : vector<8x8x1xf32> to vector<8x8x8xf32>
    %35 = arith.subf %31, %34 : vector<8x8x8xf32>
    %36 = math.exp %35 : vector<8x8x8xf32>
    %cst_34 = arith.constant dense<0.000000e+00> : vector<8x8xf32>
    %37 = vector.multi_reduction <add>, %36, %cst_34 [2] : vector<8x8x8xf32> to vector<8x8xf32>
    %38 = vector.shape_cast %37 : vector<8x8xf32> to vector<8x8x1xf32>
    %39 = tpu.reciprocal %38 {approx = true} : vector<8x8x1xf32> -> vector<8x8x1xf32>
    %40 = vector.broadcast %39 : vector<8x8x1xf32> to vector<8x8x8xf32>
    %41 = arith.mulf %36, %40 : vector<8x8x8xf32>
    "tpu.trace_start"() <{level = 10 : i32, message = "bqk,bkd->bqd"}> : () -> ()
    %cst_35 = arith.constant dense<0.000000e+00> : vector<8x8x16xf32>
    %42 = tpu.matmul %41, %28, %cst_35 {dimension_numbers = #tpu.dot_dimension_numbers<[2], [1], [1], [2], [0, 0, 0, 1, 1, 2], [0], [0]>} : vector<8x8x8xf32>, vector<8x8x16xf32>, vector<8x8x16xf32> -> vector<8x8x16xf32>
    "tpu.trace_stop"() : () -> ()
    %43 = vector.shape_cast %42 : vector<8x8x16xf32> to vector<64x16xf32>
    %44 = vector.extract_strided_slice %3 {offsets = [0, 0], sizes = [16, 32], strides = [1, 1]} : vector<32x32xf32> to vector<16x32xf32>
    %cst_36 = arith.constant dense<0.000000e+00> : vector<64x32xf32>
    %45 = tpu.matmul %43, %44, %cst_36 {dimension_numbers = #tpu.dot_dimension_numbers<[1], [0], [0], [1], [0, 0, 1, 1], [], []>} : vector<64x16xf32>, vector<16x32xf32>, vector<64x32xf32> -> vector<64x32xf32>
    %46 = arith.addf %25, %45 : vector<64x32xf32>
    %47 = vector.extract_strided_slice %20 {offsets = [0, 0, 16], sizes = [8, 8, 16], strides = [1, 1, 1]} : vector<8x8x32xf32> to vector<8x8x16xf32>
    %48 = vector.extract_strided_slice %22 {offsets = [0, 0, 16], sizes = [8, 8, 16], strides = [1, 1, 1]} : vector<8x8x32xf32> to vector<8x8x16xf32>
    %49 = vector.extract_strided_slice %24 {offsets = [0, 0, 16], sizes = [8, 8, 16], strides = [1, 1, 1]} : vector<8x8x32xf32> to vector<8x8x16xf32>
    "tpu.trace_start"() <{level = 10 : i32, message = "bqd,bkd->bqk"}> : () -> ()
    %cst_37 = arith.constant dense<0.000000e+00> : vector<8x8x8xf32>
    %50 = tpu.matmul %47, %48, %cst_37 {dimension_numbers = #tpu.dot_dimension_numbers<[2], [2], [1], [1], [0, 0, 0, 1, 1, 1], [0], [0]>} : vector<8x8x16xf32>, vector<8x8x16xf32>, vector<8x8x8xf32> -> vector<8x8x8xf32>
    "tpu.trace_stop"() : () -> ()
    %cst_38 = arith.constant 2.500000e-01 : f32
    %51 = vector.broadcast %cst_38 : f32 to vector<8x8x8xf32>
    %52 = arith.mulf %50, %51 : vector<8x8x8xf32>
    %cst_39 = arith.constant dense<0xFF800000> : vector<8x8xf32>
    %53 = vector.multi_reduction <maximumf>, %52, %cst_39 [2] : vector<8x8x8xf32> to vector<8x8xf32>
    %54 = vector.shape_cast %53 : vector<8x8xf32> to vector<8x8x1xf32>
    %55 = vector.broadcast %54 : vector<8x8x1xf32> to vector<8x8x8xf32>
    %56 = arith.subf %52, %55 : vector<8x8x8xf32>
    %57 = math.exp %56 : vector<8x8x8xf32>
    %cst_40 = arith.constant dense<0.000000e+00> : vector<8x8xf32>
    %58 = vector.multi_reduction <add>, %57, %cst_40 [2] : vector<8x8x8xf32> to vector<8x8xf32>
    %59 = vector.shape_cast %58 : vector<8x8xf32> to vector<8x8x1xf32>
    %60 = tpu.reciprocal %59 {approx = true} : vector<8x8x1xf32> -> vector<8x8x1xf32>
    %61 = vector.broadcast %60 : vector<8x8x1xf32> to vector<8x8x8xf32>
    %62 = arith.mulf %57, %61 : vector<8x8x8xf32>
    "tpu.trace_start"() <{level = 10 : i32, message = "bqk,bkd->bqd"}> : () -> ()
    %cst_41 = arith.constant dense<0.000000e+00> : vector<8x8x16xf32>
    %63 = tpu.matmul %62, %49, %cst_41 {dimension_numbers = #tpu.dot_dimension_numbers<[2], [1], [1], [2], [0, 0, 0, 1, 1, 2], [0], [0]>} : vector<8x8x8xf32>, vector<8x8x16xf32>, vector<8x8x16xf32> -> vector<8x8x16xf32>
    "tpu.trace_stop"() : () -> ()
    %64 = vector.shape_cast %63 : vector<8x8x16xf32> to vector<64x16xf32>
    %65 = vector.extract_strided_slice %3 {offsets = [16, 0], sizes = [16, 32], strides = [1, 1]} : vector<32x32xf32> to vector<16x32xf32>
    %cst_42 = arith.constant dense<0.000000e+00> : vector<64x32xf32>
    %66 = tpu.matmul %64, %65, %cst_42 {dimension_numbers = #tpu.dot_dimension_numbers<[1], [0], [0], [1], [0, 0, 1, 1], [], []>} : vector<64x16xf32>, vector<16x32xf32>, vector<64x32xf32> -> vector<64x32xf32>
    %67 = arith.addf %46, %66 : vector<64x32xf32>
    %68 = vector.broadcast %4 : vector<1x32xf32> to vector<64x32xf32>
    %69 = arith.addf %67, %68 : vector<64x32xf32>
    %70 = arith.addf %15, %69 : vector<64x32xf32>
    %cst_43 = arith.constant dense<0.000000e+00> : vector<64xf32>
    %71 = vector.multi_reduction <add>, %70, %cst_43 [1] : vector<64x32xf32> to vector<64xf32>
    %72 = vector.shape_cast %71 : vector<64xf32> to vector<64x1xf32>
    %cst_44 = arith.constant 3.200000e+01 : f32
    %73 = vector.broadcast %cst_44 : f32 to vector<64x1xf32>
    %74 = arith.divf %72, %73 : vector<64x1xf32>
    %75 = vector.broadcast %74 : vector<64x1xf32> to vector<64x32xf32>
    %76 = arith.subf %70, %75 : vector<64x32xf32>
    %77 = arith.mulf %76, %76 : vector<64x32xf32>
    %cst_45 = arith.constant dense<0.000000e+00> : vector<64xf32>
    %78 = vector.multi_reduction <add>, %77, %cst_45 [1] : vector<64x32xf32> to vector<64xf32>
    %79 = vector.shape_cast %78 : vector<64xf32> to vector<64x1xf32>
    %cst_46 = arith.constant 3.200000e+01 : f32
    %80 = vector.broadcast %cst_46 : f32 to vector<64x1xf32>
    %81 = arith.divf %79, %80 : vector<64x1xf32>
    %82 = vector.broadcast %74 : vector<64x1xf32> to vector<64x32xf32>
    %83 = arith.subf %70, %82 : vector<64x32xf32>
    %cst_47 = arith.constant 9.99999974E-6 : f32
    %84 = vector.broadcast %cst_47 : f32 to vector<64x1xf32>
    %85 = arith.addf %81, %84 : vector<64x1xf32>
    %86 = math.rsqrt %85 : vector<64x1xf32>
    %87 = vector.broadcast %86 : vector<64x1xf32> to vector<64x32xf32>
    %88 = arith.mulf %83, %87 : vector<64x32xf32>
    %89 = vector.broadcast %5 : vector<1x32xf32> to vector<64x32xf32>
    %90 = arith.mulf %88, %89 : vector<64x32xf32>
    %91 = vector.broadcast %6 : vector<1x32xf32> to vector<64x32xf32>
    %92 = arith.addf %90, %91 : vector<64x32xf32>
    %cst_48 = arith.constant dense<0.000000e+00> : vector<64x64xf32>
    %93 = tpu.matmul %92, %7, %cst_48 {dimension_numbers = #tpu.dot_dimension_numbers<[1], [0], [0], [1], [0, 0, 1, 1], [], []>} : vector<64x32xf32>, vector<32x64xf32>, vector<64x64xf32> -> vector<64x64xf32>
    %94 = vector.broadcast %8 : vector<1x64xf32> to vector<64x64xf32>
    %95 = arith.addf %93, %94 : vector<64x64xf32>
    %cst_49 = arith.constant 0.000000e+00 : f32
    %96 = vector.broadcast %cst_49 : f32 to vector<64x64xf32>
    %97 = arith.maximumf %95, %96 : vector<64x64xf32>
    %cst_50 = arith.constant dense<0.000000e+00> : vector<64x32xf32>
    %98 = tpu.matmul %97, %9, %cst_50 {dimension_numbers = #tpu.dot_dimension_numbers<[1], [0], [0], [1], [0, 0, 1, 1], [], []>} : vector<64x64xf32>, vector<64x32xf32>, vector<64x32xf32> -> vector<64x32xf32>
    %99 = vector.broadcast %10 : vector<1x32xf32> to vector<64x32xf32>
    %100 = arith.addf %98, %99 : vector<64x32xf32>
    %101 = arith.addf %92, %100 : vector<64x32xf32>
    %cst_51 = arith.constant dense<0.000000e+00> : vector<64xf32>
    %102 = vector.multi_reduction <add>, %101, %cst_51 [1] : vector<64x32xf32> to vector<64xf32>
    %103 = vector.shape_cast %102 : vector<64xf32> to vector<64x1xf32>
    %cst_52 = arith.constant 3.200000e+01 : f32
    %104 = vector.broadcast %cst_52 : f32 to vector<64x1xf32>
    %105 = arith.divf %103, %104 : vector<64x1xf32>
    %106 = vector.broadcast %105 : vector<64x1xf32> to vector<64x32xf32>
    %107 = arith.subf %101, %106 : vector<64x32xf32>
    %108 = arith.mulf %107, %107 : vector<64x32xf32>
    %cst_53 = arith.constant dense<0.000000e+00> : vector<64xf32>
    %109 = vector.multi_reduction <add>, %108, %cst_53 [1] : vector<64x32xf32> to vector<64xf32>
    %110 = vector.shape_cast %109 : vector<64xf32> to vector<64x1xf32>
    %cst_54 = arith.constant 3.200000e+01 : f32
    %111 = vector.broadcast %cst_54 : f32 to vector<64x1xf32>
    %112 = arith.divf %110, %111 : vector<64x1xf32>
    %113 = vector.broadcast %105 : vector<64x1xf32> to vector<64x32xf32>
    %114 = arith.subf %101, %113 : vector<64x32xf32>
    %cst_55 = arith.constant 9.99999974E-6 : f32
    %115 = vector.broadcast %cst_55 : f32 to vector<64x1xf32>
    %116 = arith.addf %112, %115 : vector<64x1xf32>
    %117 = math.rsqrt %116 : vector<64x1xf32>
    %118 = vector.broadcast %117 : vector<64x1xf32> to vector<64x32xf32>
    %119 = arith.mulf %114, %118 : vector<64x32xf32>
    %120 = vector.broadcast %11 : vector<1x32xf32> to vector<64x32xf32>
    %121 = arith.mulf %119, %120 : vector<64x32xf32>
    %122 = vector.broadcast %12 : vector<1x32xf32> to vector<64x32xf32>
    %123 = arith.addf %121, %122 : vector<64x32xf32>
    %124 = vector.shape_cast %123 : vector<64x32xf32> to vector<8x8x32xf32>
    %cst_56 = arith.constant dense<0.000000e+00> : vector<8x32xf32>
    %125 = vector.multi_reduction <add>, %124, %cst_56 [1] : vector<8x8x32xf32> to vector<8x32xf32>
    %cst_57 = arith.constant 8.000000e+00 : f32
    %126 = vector.broadcast %cst_57 : f32 to vector<8x32xf32>
    %127 = arith.divf %125, %126 : vector<8x32xf32>
    %cst_58 = arith.constant dense<0.000000e+00> : vector<8x32xf32>
    %128 = tpu.matmul %127, %13, %cst_58 {dimension_numbers = #tpu.dot_dimension_numbers<[1], [0], [0], [1], [0, 0, 1, 1], [], []>} : vector<8x32xf32>, vector<32x32xf32>, vector<8x32xf32> -> vector<8x32xf32>
    %129 = vector.broadcast %14 : vector<1x32xf32> to vector<8x32xf32>
    %130 = arith.addf %128, %129 : vector<8x32xf32>
    %c0_59 = arith.constant 0 : index
    %c0_60 = arith.constant 0 : index
    %131 = vector.load %arg15[%c0_59, %c0_60] : memref<8x32xf32, #tpu.memory_space<vmem>>, vector<8x32xf32>
    tpu.vector_store %arg15[%c0_59, %c0_60], %130 {strides = array<i32>} : memref<8x32xf32, #tpu.memory_space<vmem>>, vector<8x32xf32>,
    return
  }
}

module attributes {stable_mosaic.version = 11 : i64} {
  func.func @forward_kernel(%arg0: memref<8x8x32xf32, #tpu.memory_space<vmem>>, %arg1: memref<32x96xf32, #tpu.memory_space<vmem>>, %arg2: memref<1x96xf32, #tpu.memory_space<vmem>>, %arg3: memref<32x32xf32, #tpu.memory_space<vmem>>, %arg4: memref<1x32xf32, #tpu.memory_space<vmem>>, %arg5: memref<1x32xf32, #tpu.memory_space<vmem>>, %arg6: memref<1x32xf32, #tpu.memory_space<vmem>>, %arg7: memref<32x64xf32, #tpu.memory_space<vmem>>, %arg8: memref<1x64xf32, #tpu.memory_space<vmem>>, %arg9: memref<64x32xf32, #tpu.memory_space<vmem>>, %arg10: memref<1x32xf32, #tpu.memory_space<vmem>>, %arg11: memref<1x32xf32, #tpu.memory_space<vmem>>, %arg12: memref<1x32xf32, #tpu.memory_space<vmem>>, %arg13: memref<32x32xf32, #tpu.memory_space<vmem>>, %arg14: memref<1x32xf32, #tpu.memory_space<vmem>>, %arg15: memref<32x2xf32, #tpu.memory_space<vmem>>, %arg16: memref<1x2xf32, #tpu.memory_space<vmem>>, %arg17: memref<8x2xf32, #tpu.memory_space<vmem>>) attributes {dimension_semantics = [], scalar_prefetch = 0 : i64, scratch_operands = 0 : i64, tpu.core_type = #tpu.core_type<tc>} {
    %c0 = arith.constant 0 : index
    %c0_0 = arith.constant 0 : index
    %c0_1 = arith.constant 0 : index
    %0 = vector.load %arg0[%c0, %c0_0, %c0_1] : memref<8x8x32xf32, #tpu.memory_space<vmem>>, vector<8x8x32xf32>
    %c0_2 = arith.constant 0 : index
    %c0_3 = arith.constant 0 : index
    %1 = vector.load %arg1[%c0_2, %c0_3] : memref<32x96xf32, #tpu.memory_space<vmem>>, vector<32x96xf32>
    %c0_4 = arith.constant 0 : index
    %c0_5 = arith.constant 0 : index
    %2 = vector.load %arg2[%c0_4, %c0_5] : memref<1x96xf32, #tpu.memory_space<vmem>>, vector<1x96xf32>
    %c0_6 = arith.constant 0 : index
    %c0_7 = arith.constant 0 : index
    %3 = vector.load %arg3[%c0_6, %c0_7] : memref<32x32xf32, #tpu.memory_space<vmem>>, vector<32x32xf32>
    %c0_8 = arith.constant 0 : index
    %c0_9 = arith.constant 0 : index
    %4 = vector.load %arg4[%c0_8, %c0_9] : memref<1x32xf32, #tpu.memory_space<vmem>>, vector<1x32xf32>
    %c0_10 = arith.constant 0 : index
    %c0_11 = arith.constant 0 : index
    %5 = vector.load %arg5[%c0_10, %c0_11] : memref<1x32xf32, #tpu.memory_space<vmem>>, vector<1x32xf32>
    %c0_12 = arith.constant 0 : index
    %c0_13 = arith.constant 0 : index
    %6 = vector.load %arg6[%c0_12, %c0_13] : memref<1x32xf32, #tpu.memory_space<vmem>>, vector<1x32xf32>
    %c0_14 = arith.constant 0 : index
    %c0_15 = arith.constant 0 : index
    %7 = vector.load %arg7[%c0_14, %c0_15] : memref<32x64xf32, #tpu.memory_space<vmem>>, vector<32x64xf32>
    %c0_16 = arith.constant 0 : index
    %c0_17 = arith.constant 0 : index
    %8 = vector.load %arg8[%c0_16, %c0_17] : memref<1x64xf32, #tpu.memory_space<vmem>>, vector<1x64xf32>
    %c0_18 = arith.constant 0 : index
    %c0_19 = arith.constant 0 : index
    %9 = vector.load %arg9[%c0_18, %c0_19] : memref<64x32xf32, #tpu.memory_space<vmem>>, vector<64x32xf32>
    %c0_20 = arith.constant 0 : index
    %c0_21 = arith.constant 0 : index
    %10 = vector.load %arg10[%c0_20, %c0_21] : memref<1x32xf32, #tpu.memory_space<vmem>>, vector<1x32xf32>
    %c0_22 = arith.constant 0 : index
    %c0_23 = arith.constant 0 : index
    %11 = vector.load %arg11[%c0_22, %c0_23] : memref<1x32xf32, #tpu.memory_space<vmem>>, vector<1x32xf32>
    %c0_24 = arith.constant 0 : index
    %c0_25 = arith.constant 0 : index
    %12 = vector.load %arg12[%c0_24, %c0_25] : memref<1x32xf32, #tpu.memory_space<vmem>>, vector<1x32xf32>
    %c0_26 = arith.constant 0 : index
    %c0_27 = arith.constant 0 : index
    %13 = vector.load %arg13[%c0_26, %c0_27] : memref<32x32xf32, #tpu.memory_space<vmem>>, vector<32x32xf32>
    %c0_28 = arith.constant 0 : index
    %c0_29 = arith.constant 0 : index
    %14 = vector.load %arg14[%c0_28, %c0_29] : memref<1x32xf32, #tpu.memory_space<vmem>>, vector<1x32xf32>
    %15 = vector.shape_cast %0 : vector<8x8x32xf32> to vector<64x32xf32>
    %cst = arith.constant dense<0.000000e+00> : vector<64x96xf32>
    %16 = tpu.matmul %15, %1, %cst {dimension_numbers = #tpu.dot_dimension_numbers<[1], [0], [0], [1], [0, 0, 1, 1], [], []>} : vector<64x32xf32>, vector<32x96xf32>, vector<64x96xf32> -> vector<64x96xf32>
    %17 = vector.broadcast %2 : vector<1x96xf32> to vector<64x96xf32>
    %18 = arith.addf %16, %17 : vector<64x96xf32>
    %19 = vector.extract_strided_slice %18 {offsets = [0, 0], sizes = [64, 32], strides = [1, 1]} : vector<64x96xf32> to vector<64x32xf32>
    %20 = vector.shape_cast %19 : vector<64x32xf32> to vector<8x8x32xf32>
    %21 = vector.extract_strided_slice %18 {offsets = [0, 32], sizes = [64, 32], strides = [1, 1]} : vector<64x96xf32> to vector<64x32xf32>
    %22 = vector.shape_cast %21 : vector<64x32xf32> to vector<8x8x32xf32>
    %23 = vector.extract_strided_slice %18 {offsets = [0, 64], sizes = [64, 32], strides = [1, 1]} : vector<64x96xf32> to vector<64x32xf32>
    %24 = vector.shape_cast %23 : vector<64x32xf32> to vector<8x8x32xf32>
    %cst_30 = arith.constant 0.000000e+00 : f32
    %25 = vector.broadcast %cst_30 : f32 to vector<64x32xf32>
    %26 = vector.extract_strided_slice %20 {offsets = [0, 0, 0], sizes = [8, 8, 16], strides = [1, 1, 1]} : vector<8x8x32xf32> to vector<8x8x16xf32>
    %27 = vector.extract_strided_slice %22 {offsets = [0, 0, 0], sizes = [8, 8, 16], strides = [1, 1, 1]} : vector<8x8x32xf32> to vector<8x8x16xf32>
    %28 = vector.extract_strided_slice %24 {offsets = [0, 0, 0], sizes = [8, 8, 16], strides = [1, 1, 1]} : vector<8x8x32xf32> to vector<8x8x16xf32>
    "tpu.trace_start"() <{level = 10 : i32, message = "bqd,bkd->bqk"}> : () -> ()
    %cst_31 = arith.constant dense<0.000000e+00> : vector<8x8x8xf32>
    %29 = tpu.matmul %26, %27, %cst_31 {dimension_numbers = #tpu.dot_dimension_numbers<[2], [2], [1], [1], [0, 0, 0, 1, 1, 1], [0], [0]>} : vector<8x8x16xf32>, vector<8x8x16xf32>, vector<8x8x8xf32> -> vector<8x8x8xf32>
    "tpu.trace_stop"() : () -> ()
    %cst_32 = arith.constant 2.500000e-01 : f32
    %30 = vector.broadcast %cst_32 : f32 to vector<8x8x8xf32>
    %31 = arith.mulf %29, %30 : vector<8x8x8xf32>
    %cst_33 = arith.constant dense<0xFF800000> : vector<8x8xf32>
    %32 = vector.multi_reduction <maximumf>, %31, %cst_33 [2] : vector<8x8x8xf32> to vector<8x8xf32>
    %33 = vector.shape_cast %32 : vector<8x8xf32> to vector<8x8x1xf32>
    %34 = vector.broadcast %33 : vector<8x8x1xf32> to vector<8x8x8xf32>
    %35 = arith.subf %31, %34 : vector<8x8x8xf32>
    %36 = math.exp %35 : vector<8x8x8xf32>
    %cst_34 = arith.constant dense<0.000000e+00> : vector<8x8xf32>
    %37 = vector.multi_reduction <add>, %36, %cst_34 [2] : vector<8x8x8xf32> to vector<8x8xf32>
    %38 = vector.shape_cast %37 : vector<8x8xf32> to vector<8x8x1xf32>
    %39 = tpu.reciprocal %38 {approx = true} : vector<8x8x1xf32> -> vector<8x8x1xf32>
    %40 = vector.broadcast %39 : vector<8x8x1xf32> to vector<8x8x8xf32>
    %41 = arith.mulf %36, %40 : vector<8x8x8xf32>
    "tpu.trace_start"() <{level = 10 : i32, message = "bqk,bkd->bqd"}> : () -> ()
    %cst_35 = arith.constant dense<0.000000e+00> : vector<8x8x16xf32>
    %42 = tpu.matmul %41, %28, %cst_35 {dimension_numbers = #tpu.dot_dimension_numbers<[2], [1], [1], [2], [0, 0, 0, 1, 1, 2], [0], [0]>} : vector<8x8x8xf32>, vector<8x8x16xf32>, vector<8x8x16xf32> -> vector<8x8x16xf32>
    "tpu.trace_stop"() : () -> ()
    %43 = vector.shape_cast %42 : vector<8x8x16xf32> to vector<64x16xf32>
    %44 = vector.extract_strided_slice %3 {offsets = [0, 0], sizes = [16, 32], strides = [1, 1]} : vector<32x32xf32> to vector<16x32xf32>
    %cst_36 = arith.constant dense<0.000000e+00> : vector<64x32xf32>
    %45 = tpu.matmul %43, %44, %cst_36 {dimension_numbers = #tpu.dot_dimension_numbers<[1], [0], [0], [1], [0, 0, 1, 1], [], []>} : vector<64x16xf32>, vector<16x32xf32>, vector<64x32xf32> -> vector<64x32xf32>
    %46 = arith.addf %25, %45 : vector<64x32xf32>
    %47 = vector.extract_strided_slice %20 {offsets = [0, 0, 16], sizes = [8, 8, 16], strides = [1, 1, 1]} : vector<8x8x32xf32> to vector<8x8x16xf32>
    %48 = vector.extract_strided_slice %22 {offsets = [0, 0, 16], sizes = [8, 8, 16], strides = [1, 1, 1]} : vector<8x8x32xf32> to vector<8x8x16xf32>
    %49 = vector.extract_strided_slice %24 {offsets = [0, 0, 16], sizes = [8, 8, 16], strides = [1, 1, 1]} : vector<8x8x32xf32> to vector<8x8x16xf32>
    "tpu.trace_start"() <{level = 10 : i32, message = "bqd,bkd->bqk"}> : () -> ()
    %cst_37 = arith.constant dense<0.000000e+00> : vector<8x8x8xf32>
    %50 = tpu.matmul %47, %48, %cst_37 {dimension_numbers = #tpu.dot_dimension_numbers<[2], [2], [1], [1], [0, 0, 0, 1, 1, 1], [0], [0]>} : vector<8x8x16xf32>, vector<8x8x16xf32>, vector<8x8x8xf32> -> vector<8x8x8xf32>
    "tpu.trace_stop"() : () -> ()
    %cst_38 = arith.constant 2.500000e-01 : f32
    %51 = vector.broadcast %cst_38 : f32 to vector<8x8x8xf32>
    %52 = arith.mulf %50, %51 : vector<8x8x8xf32>
    %cst_39 = arith.constant dense<0xFF800000> : vector<8x8xf32>
    %53 = vector.multi_reduction <maximumf>, %52, %cst_39 [2] : vector<8x8x8xf32> to vector<8x8xf32>
    %54 = vector.shape_cast %53 : vector<8x8xf32> to vector<8x8x1xf32>
    %55 = vector.broadcast %54 : vector<8x8x1xf32> to vector<8x8x8xf32>
    %56 = arith.subf %52, %55 : vector<8x8x8xf32>
    %57 = math.exp %56 : vector<8x8x8xf32>
    %cst_40 = arith.constant dense<0.000000e+00> : vector<8x8xf32>
    %58 = vector.multi_reduction <add>, %57, %cst_40 [2] : vector<8x8x8xf32> to vector<8x8xf32>
    %59 = vector.shape_cast %58 : vector<8x8xf32> to vector<8x8x1xf32>
    %60 = tpu.reciprocal %59 {approx = true} : vector<8x8x1xf32> -> vector<8x8x1xf32>
    %61 = vector.broadcast %60 : vector<8x8x1xf32> to vector<8x8x8xf32>
    %62 = arith.mulf %57, %61 : vector<8x8x8xf32>
    "tpu.trace_start"() <{level = 10 : i32, message = "bqk,bkd->bqd"}> : () -> ()
    %cst_41 = arith.constant dense<0.000000e+00> : vector<8x8x16xf32>
    %63 = tpu.matmul %62, %49, %cst_41 {dimension_numbers = #tpu.dot_dimension_numbers<[2], [1], [1], [2], [0, 0, 0, 1, 1, 2], [0], [0]>} : vector<8x8x8xf32>, vector<8x8x16xf32>, vector<8x8x16xf32> -> vector<8x8x16xf32>
    "tpu.trace_stop"() : () -> ()
    %64 = vector.shape_cast %63 : vector<8x8x16xf32> to vector<64x16xf32>
    %65 = vector.extract_strided_slice %3 {offsets = [16, 0], sizes = [16, 32], strides = [1, 1]} : vector<32x32xf32> to vector<16x32xf32>
    %cst_42 = arith.constant dense<0.000000e+00> : vector<64x32xf32>
    %66 = tpu.matmul %64, %65, %cst_42 {dimension_numbers = #tpu.dot_dimension_numbers<[1], [0], [0], [1], [0, 0, 1, 1], [], []>} : vector<64x16xf32>, vector<16x32xf32>, vector<64x32xf32> -> vector<64x32xf32>
    %67 = arith.addf %46, %66 : vector<64x32xf32>
    %68 = vector.broadcast %4 : vector<1x32xf32> to vector<64x32xf32>
    %69 = arith.addf %67, %68 : vector<64x32xf32>
    %70 = arith.addf %15, %69 : vector<64x32xf32>
    %cst_43 = arith.constant dense<0.000000e+00> : vector<64xf32>
    %71 = vector.multi_reduction <add>, %70, %cst_43 [1] : vector<64x32xf32> to vector<64xf32>
    %72 = vector.shape_cast %71 : vector<64xf32> to vector<64x1xf32>
    %cst_44 = arith.constant 3.200000e+01 : f32
    %73 = vector.broadcast %cst_44 : f32 to vector<64x1xf32>
    %74 = arith.divf %72, %73 : vector<64x1xf32>
    %75 = vector.broadcast %74 : vector<64x1xf32> to vector<64x32xf32>
    %76 = arith.subf %70, %75 : vector<64x32xf32>
    %77 = arith.mulf %76, %76 : vector<64x32xf32>
    %cst_45 = arith.constant dense<0.000000e+00> : vector<64xf32>
    %78 = vector.multi_reduction <add>, %77, %cst_45 [1] : vector<64x32xf32> to vector<64xf32>
    %79 = vector.shape_cast %78 : vector<64xf32> to vector<64x1xf32>
    %cst_46 = arith.constant 3.200000e+01 : f32
    %80 = vector.broadcast %cst_46 : f32 to vector<64x1xf32>
    %81 = arith.divf %79, %80 : vector<64x1xf32>
    %82 = vector.broadcast %74 : vector<64x1xf32> to vector<64x32xf32>
    %83 = arith.subf %70, %82 : vector<64x32xf32>
    %cst_47 = arith.constant 9.99999974E-6 : f32
    %84 = vector.broadcast %cst_47 : f32 to vector<64x1xf32>
    %85 = arith.addf %81, %84 : vector<64x1xf32>
    %86 = math.rsqrt %85 : vector<64x1xf32>
    %87 = vector.broadcast %86 : vector<64x1xf32> to vector<64x32xf32>
    %88 = arith.mulf %83, %87 : vector<64x32xf32>
    %89 = vector.broadcast %5 : vector<1x32xf32> to vector<64x32xf32>
    %90 = arith.mulf %88, %89 : vector<64x32xf32>
    %91 = vector.broadcast %6 : vector<1x32xf32> to vector<64x32xf32>
    %92 = arith.addf %90, %91 : vector<64x32xf32>
    %cst_48 = arith.constant dense<0.000000e+00> : vector<64x64xf32>
    %93 = tpu.matmul %92, %7, %cst_48 {dimension_numbers = #tpu.dot_dimension_numbers<[1], [0], [0], [1], [0, 0, 1, 1], [], []>} : vector<64x32xf32>, vector<32x64xf32>, vector<64x64xf32> -> vector<64x64xf32>
    %94 = vector.broadcast %8 : vector<1x64xf32> to vector<64x64xf32>
    %95 = arith.addf %93, %94 : vector<64x64xf32>
    %cst_49 = arith.constant 0.000000e+00 : f32
    %96 = vector.broadcast %cst_49 : f32 to vector<64x64xf32>
    %97 = arith.maximumf %95, %96 : vector<64x64xf32>
    %cst_50 = arith.constant dense<0.000000e+00> : vector<64x32xf32>
    %98 = tpu.matmul %97, %9, %cst_50 {dimension_numbers = #tpu.dot_dimension_numbers<[1], [0], [0], [1], [0, 0, 1, 1], [], []>} : vector<64x64xf32>, vector<64x32xf32>, vector<64x32xf32> -> vector<64x32xf32>
    %99 = vector.broadcast %10 : vector<1x32xf32> to vector<64x32xf32>
    %100 = arith.addf %98, %99 : vector<64x32xf32>
    %101 = arith.addf %92, %100 : vector<64x32xf32>
    %cst_51 = arith.constant dense<0.000000e+00> : vector<64xf32>
    %102 = vector.multi_reduction <add>, %101, %cst_51 [1] : vector<64x32xf32> to vector<64xf32>
    %103 = vector.shape_cast %102 : vector<64xf32> to vector<64x1xf32>
    %cst_52 = arith.constant 3.200000e+01 : f32
    %104 = vector.broadcast %cst_52 : f32 to vector<64x1xf32>
    %105 = arith.divf %103, %104 : vector<64x1xf32>
    %106 = vector.broadcast %105 : vector<64x1xf32> to vector<64x32xf32>
    %107 = arith.subf %101, %106 : vector<64x32xf32>
    %108 = arith.mulf %107, %107 : vector<64x32xf32>
    %cst_53 = arith.constant dense<0.000000e+00> : vector<64xf32>
    %109 = vector.multi_reduction <add>, %108, %cst_53 [1] : vector<64x32xf32> to vector<64xf32>
    %110 = vector.shape_cast %109 : vector<64xf32> to vector<64x1xf32>
    %cst_54 = arith.constant 3.200000e+01 : f32
    %111 = vector.broadcast %cst_54 : f32 to vector<64x1xf32>
    %112 = arith.divf %110, %111 : vector<64x1xf32>
    %113 = vector.broadcast %105 : vector<64x1xf32> to vector<64x32xf32>
    %114 = arith.subf %101, %113 : vector<64x32xf32>
    %cst_55 = arith.constant 9.99999974E-6 : f32
    %115 = vector.broadcast %cst_55 : f32 to vector<64x1xf32>
    %116 = arith.addf %112, %115 : vector<64x1xf32>
    %117 = math.rsqrt %116 : vector<64x1xf32>
    %118 = vector.broadcast %117 : vector<64x1xf32> to vector<64x32xf32>
    %119 = arith.mulf %114, %118 : vector<64x32xf32>
    %120 = vector.broadcast %11 : vector<1x32xf32> to vector<64x32xf32>
    %121 = arith.mulf %119, %120 : vector<64x32xf32>
    %122 = vector.broadcast %12 : vector<1x32xf32> to vector<64x32xf32>
    %123 = arith.addf %121, %122 : vector<64x32xf32>
    %124 = vector.shape_cast %123 : vector<64x32xf32> to vector<8x8x32xf32>
    %cst_56 = arith.constant dense<0.000000e+00> : vector<8x32xf32>
    %125 = vector.multi_reduction <add>, %124, %cst_56 [1] : vector<8x8x32xf32> to vector<8x32xf32>
    %cst_57 = arith.constant 8.000000e+00 : f32
    %126 = vector.broadcast %cst_57 : f32 to vector<8x32xf32>
    %127 = arith.divf %125, %126 : vector<8x32xf32>
    %cst_58 = arith.constant dense<0.000000e+00> : vector<8x32xf32>
    %128 = tpu.matmul %127, %13, %cst_58 {dimension_numbers = #tpu.dot_dimension_numbers<[1], [0], [0], [1], [0, 0, 1, 1], [], []>} : vector<8x32xf32>, vector<32x32xf32>, vector<8x32xf32> -> vector<8x32xf32>
    %129 = vector.broadcast %14 : vector<1x32xf32> to vector<8x32xf32>
    %130 = arith.addf %128, %129 : vector<8x32xf32>
    %c0_59 = arith.constant 0 : index
    %c0_60 = arith.constant 0 : index
    %131 = vector.load %arg15[%c0_59, %c0_60] : memref<32x2xf32, #tpu.memory_space<vmem>>, vector<32x2xf32>
    %cst_61 = arith.constant dense<0.000000e+00> : vector<8x2xf32>
    %132 = tpu.matmul %130, %131, %cst_61 {dimension_numbers = #tpu.dot_dimension_numbers<[1], [0], [0], [1], [0, 0, 1, 1], [], []>} : vector<8x32xf32>, vector<32x2xf32>, vector<8x2xf32> -> vector<8x2xf32>
    %c0_62 = arith.constant 0 : index
    %c0_63 = arith.constant 0 : index
    %133 = vector.load %arg16[%c0_62, %c0_63] : memref<1x2xf32, #tpu.memory_space<vmem>>, vector<1x2xf32>
    %134 = vector.broadcast %133 : vector<1x2xf32> to vector<8x2xf32>
    %135 = arith.addf %132, %134 : vector<8x2xf32>
    %c0_64 = arith.constant 0 : index
    %c0_65 = arith.constant 0 : index
    %136 = vector.load %arg17[%c0_64, %c0_65] : memref<8x2xf32, #tpu.memory_space<vmem>>, vector<8x2xf32>
    tpu.vector_store %arg17[%c0_64, %c0_65], %135 {strides = array<i32>} : memref<8x2xf32, #tpu.memory_space<vmem>>, vector<8x2xf32>,
    return
  }
}

</mosaic_0001>

<bundles_post_ra>
// kernel: protomaml_episode.2
= control target key start
LH: loop header
LB: loop body
LE: loop exit
PB: predicated region body
PF: predicated region fallthrough
CT: control target
= control target key end

     0   :  { %vm97_vm0 = vcmask 261120   ;;  %v4488_v12 = vmov 0.0   ;;  %vm4489_vm1 = vmmov 0   ;;  %s4490_s28 = smov 96   ;;  %vm230_vm2 = vcmask 130048   ;;  %s4492_s29 = smov 80   ;;  %s5308_s1 = inlined_call_operand.vmem [shape: f32[32,96], index: 1, kind: input, shape index: {}]   ;;  %s5309_s0 = inlined_call_operand.vmem [shape: f32[8,8,32], index: 0, kind: input, shape index: {}]   ;;  %s5310_s2 = inlined_call_operand.vmem [shape: f32[1,96], index: 2, kind: input, shape index: {}]   ;;  %s5311_s3 = inlined_call_operand.vmem [shape: f32[32,32], index: 3, kind: input, shape index: {}]   ;;  %s5312_s4 = inlined_call_operand.vmem [shape: f32[1,32], index: 4, kind: input, shape index: {}]   ;;  %s5313_s7 = inlined_call_operand.vmem [shape: f32[32,64], index: 7, kind: input, shape index: {}]   ;;  %s5314_s9 = inlined_call_operand.vmem [shape: f32[64,32], index: 9, kind: input, shape index: {}]   ;;  %s5315_s5 = inlined_call_operand.vmem [shape: f32[1,32], index: 5, kind: input, shape index: {}]   ;;  %s5316_s6 = inlined_call_operand.vmem [shape: f32[1,32], index: 6, kind: input, shape index: {}]   ;;  %s5317_s8 = inlined_call_operand.vmem [shape: f32[1,64], index: 8, kind: input, shape index: {}]   ;;  %s5318_s10 = inlined_call_operand.vmem [shape: f32[1,32], index: 10, kind: input, shape index: {}]   ;;  %s5319_s13 = inlined_call_operand.vmem [shape: f32[32,32], index: 13, kind: input, shape index: {}]   ;;  %s5320_s11 = inlined_call_operand.vmem [shape: f32[1,32], index: 11, kind: input, shape index: {}]   ;;  %s5321_s12 = inlined_call_operand.vmem [shape: f32[1,32], index: 12, kind: input, shape index: {}]   ;;  %s5322_s14 = inlined_call_operand.vmem [shape: f32[1,32], index: 14, kind: input, shape index: {}]   ;;  %s5323_s15 = inlined_call_operand.vmem [shape: f32[8,32], index: 15, kind: output, shape index: {}]  }
   0x1   :  { %v61_v0 = vld [vmem:[%s5308_s1 + $0x18] sm:$0xff]  ;;  %v60_v1 = vld [vmem:[%s5308_s1 + $0x10] sm:$0xff]  ;;  %v50_v2 = vld [vmem:[%s5309_s0] sm:$0xff]  ;;  %4126 = vmatprep.subr.mxu1 %v4488_v12  ;;  %4128 = vmatprep.mubr.msk.f32.mxu1 %vm4489_vm1, %v4488_v12  ;;  %vm852_vm3 = vcmask 64512   ;;  %s4493_s30 = smov 112   ;;  %s4494_s16 = smov 48  }
   0x2   :  { %4106 = vmatprep.subr.mxu0 %v61_v0  ;;  %v59_v3 = vld [vmem:[%s5308_s1 + $0x8] sm:$0xff]  ;;  %4114 = vmatprep.mubr.msk.f32.mxu0 %vm97_vm0, %v50_v2  ;;  %v58_v4 = vld [vmem:[%s5308_s1] sm:$0xff]  ;;  %v52_v6 = vld [vmem:[%s5309_s0 + $0x10] sm:$0xff]  ;;  %vm3439_vm4 = vcmask 523264   ;;  %vm3788_vm5 = vcmask 1041409   ;;  %vm3790_vm6 = vcmask 1042434  }
   0x3   :  { %4107 = vmatpush3.msra.mxu0 %v61_v0  ;;  %v51_v5 = vld [vmem:[%s5309_s0 + $0x8] sm:$0xff]  ;;  %v53_v7 = vld [vmem:[%s5309_s0 + $0x18] sm:$0xff]  ;;  %v54_v8 = vld [vmem:[%s5309_s0 + $0x20] sm:$0xff]  ;;  %vm3792_vm7 = vcmask 1043459   ;;  %vm3794_vm8 = vcmask 1044484   ;;  %vm3796_vm9 = vcmask 1045509  }
   0x4   :  { %4108 = vmatprep.subr.mxu0 %v60_v1  ;;  %v55_v9 = vld [vmem:[%s5309_s0 + $0x28] sm:$0xff]  ;;  %v56_v10 = vld [vmem:[%s5309_s0 + $0x30] sm:$0xff]  ;;  %v57_v11 = vld [vmem:[%s5309_s0 + $0x38] sm:$0xff]  ;;  %vm3798_vm10 = vcmask 1046534   ;;  %vm3800_vm11 = vcmask 1047559  }
   0x5   :  { %4109 = vmatpush3.msra.mxu0 %v60_v1  ;;  %v3879_v14 = vld [vmem:[%s5310_s2] ss:$0 sm:$0xff]  ;;  %s4491_s2 = smov 64  }
   0x6   :  { %4110 = vmatprep.subr.mxu0 %v59_v3 }
   0x7   :  { %4111 = vmatpush3.msra.mxu0 %v59_v3 }
   0x8   :  { %4112 = vmatprep.subr.mxu0 %v58_v4 }
   0x9   :  { %4113 = vmatpush3.msra.mxu0 %v58_v4 }
   0xa   :  { %4115 = vmatmul.mubr.msk.f32.vlgmr.msra.gmra.mxu0 %vm97_vm0, %v51_v5  ;;  %4151 = vmatprep.subr.mxu0 %v4488_v12 }
   0xb   :  { %4117 = vmatprep.mubr.msk.f32.mxu0 %vm97_vm0, %v52_v6 }
   0xe   :  { %4118 = vmatmul.mubr.msk.f32.gmra.mxu0 %vm97_vm0, %v53_v7 }
   0xf   :  { %4120 = vmatprep.mubr.msk.f32.mxu0 %vm97_vm0, %v54_v8 }
  0x12   :  { %4121 = vmatmul.mubr.msk.f32.gmra.mxu0 %vm97_vm0, %v55_v9 }
  0x13   :  { %4123 = vmatprep.mubr.msk.f32.mxu0 %vm97_vm0, %v56_v10 }
  0x16   :  { %4124 = vmatmul.mubr.msk.f32.gmra.mxu0 %vm97_vm0, %v57_v11 }
  0x17   :  { %4153 = vmatprep.mubr.msk.f32.mxu0 %vm4489_vm1, %v4488_v12 }
  0xca   :  { %v4116_v13 = vpop.f32.mrf.mxu0 }
  0xcb   :  { %v4631_v19 = vadd.f32 %v4116_v13, %v3879_v14 }
  0xcc   :  { %v188_v15 = vpop.f32.mrf.mxu0 }
  0xcd   :  { %v4628_v16 = vadd.f32 %v3879_v14, %v188_v15 }
  0xce   :  { %v4119_v17 = vpop.f32.mrf.mxu0 }
  0xcf   :  { %228 = vrot.lane.b32.xlu0 %v4628_v16, %s4490_s28  ;;  %v4635_v22 = vadd.f32 %v4119_v17, %v3879_v14 }
  0xd0   :  { %v198_v18 = vpop.f32.mrf.mxu0 }
  0xd1   :  { %v4633_v20 = vadd.f32 %v3879_v14, %v198_v18 }
  0xd2   :  { %v4122_v21 = vpop.f32.mrf.mxu0 }
  0xd3   :  { %383 = vrot.lane.b32.xlu1 %v4633_v20, %s4490_s28  ;;  %306 = vrot.lane.b32.xlu0 %v4631_v19, %s4490_s28  ;;  %v4642_v26 = vadd.f32 %v4122_v21, %v3879_v14 }
  0xd4   :  { %v208_v23 = vpop.f32.mrf.mxu0 }
  0xd5   :  { %v4639_v24 = vadd.f32 %v3879_v14, %v208_v23 }
  0xd6   :  { %v4125_v25 = vpop.f32.mrf.mxu0 }
  0xd7   :  { %460 = vrot.lane.b32.xlu1 %v4635_v22, %s4490_s28  ;;  %537 = vrot.lane.b32.xlu0 %v4639_v24, %s4490_s28  ;;  %v4648_v29 = vadd.f32 %v4125_v25, %v3879_v14 }
  0xd8   :  { %v218_v27 = vpop.f32.mrf.mxu0 }
  0xd9   :  { %v4645_v28 = vadd.f32 %v3879_v14, %v218_v27 }
  0xdb   :  { %614 = vrot.lane.b32.xlu1 %v4642_v26, %s4490_s28  ;;  %691 = vrot.lane.b32.xlu0 %v4645_v28, %s4490_s28 }
  0xdf   :  { %768 = vrot.lane.b32.xlu1 %v4648_v29, %s4490_s28 }
 0x141   :  { %v229_v30 = vpop.permute.xlu0 %228 }
 0x142   :  { %4127 = vmatpush3.xpose.msk.msra.mxu1 %vm230_vm2, %v229_v30 }
 0x143   :  { %4131 = vmatprep.subr.mxu1 %v4488_v12 }
 0x145   :  { %v384_v31 = vpop.permute.xlu1 %383  ;;  %4129 = vmatmul.mubr.msk.f32.vlgmr.msra.gmra.mxu1 %vm230_vm2, %v4628_v16  ;;  %v307_v32 = vpop.permute.xlu0 %306 }
 0x146   :  { %4132 = vmatpush3.xpose.msk.msra.mxu1 %vm230_vm2, %v307_v32  ;;  %4133 = vmatprep.mubr.msk.f32.mxu1 %vm4489_vm1, %v4488_v12 }
 0x147   :  { %4136 = vmatprep.subr.mxu1 %v4488_v12 }
 0x149   :  { %v461_v33 = vpop.permute.xlu1 %460  ;;  %4134 = vmatmul.mubr.msk.f32.vlgmr.msra.gmra.mxu1 %vm230_vm2, %v4631_v19  ;;  %v538_v35 = vpop.permute.xlu0 %537 }
 0x14a   :  { %4137 = vmatpush3.xpose.msk.msra.mxu1 %vm230_vm2, %v384_v31  ;;  %4138 = vmatprep.mubr.msk.f32.mxu1 %vm4489_vm1, %v4488_v12 }
 0x14b   :  { %4141 = vmatprep.subr.mxu1 %v4488_v12 }
 0x14d   :  { %v615_v34 = vpop.permute.xlu1 %614  ;;  %4139 = vmatmul.mubr.msk.f32.vlgmr.msra.gmra.mxu1 %vm230_vm2, %v4633_v20  ;;  %v692_v37 = vpop.permute.xlu0 %691 }
 0x14e   :  { %4142 = vmatpush3.xpose.msk.msra.mxu1 %vm230_vm2, %v461_v33  ;;  %4152 = vmatpush3.xpose.msk.msra.mxu0 %vm230_vm2, %v615_v34 }
 0x14f   :  { %4143 = vmatprep.mubr.msk.f32.mxu1 %vm4489_vm1, %v4488_v12  ;;  %4161 = vmatprep.subr.mxu0 %v4488_v12 }
 0x150   :  { %4146 = vmatprep.subr.mxu1 %v4488_v12 }
 0x151   :  { %4154 = vmatmul.mubr.msk.f32.vlgmr.msra.gmra.mxu0 %vm230_vm2, %v4642_v26  ;;  %v769_v36 = vpop.permute.xlu1 %768  ;;  %4144 = vmatmul.mubr.msk.f32.vlgmr.msra.gmra.mxu1 %vm230_vm2, %v4635_v22 }
 0x152   :  { %4147 = vmatpush3.xpose.msk.msra.mxu1 %vm230_vm2, %v538_v35  ;;  %4162 = vmatpush3.xpose.msk.msra.mxu0 %vm230_vm2, %v769_v36 }
 0x153   :  { %4148 = vmatprep.mubr.msk.f32.mxu1 %vm4489_vm1, %v4488_v12  ;;  %4163 = vmatprep.mubr.msk.f32.mxu0 %vm4489_vm1, %v4488_v12 }
 0x154   :  { %4156 = vmatprep.subr.mxu1 %v4488_v12  ;;  %4171 = vmatprep.subr.mxu0 %v4488_v12 }
 0x155   :  { %4149 = vmatmul.mubr.msk.f32.vlgmr.msra.gmra.mxu1 %vm230_vm2, %v4639_v24  ;;  %4164 = vmatmul.mubr.msk.f32.vlgmr.msra.gmra.mxu0 %vm230_vm2, %v4648_v29 }
 0x156   :  { %4157 = vmatpush3.xpose.msk.msra.mxu1 %vm230_vm2, %v692_v37  ;;  %4158 = vmatprep.mubr.msk.f32.mxu1 %vm4489_vm1, %v4488_v12 }
 0x157   :  { %4166 = vmatprep.subr.mxu1 %v4488_v12  ;;  %4173 = vmatprep.mubr.msk.f32.mxu0 %vm4489_vm1, %v4488_v12 }
 0x159   :  { %4159 = vmatmul.mubr.msk.f32.vlgmr.msra.gmra.mxu1 %vm230_vm2, %v4645_v28 }
 0x15a   :  { %4168 = vmatprep.mubr.msk.f32.mxu1 %vm4489_vm1, %v4488_v12 }
 0x205   :  { %v301_v38 = vpop.f32.mrf.mxu1 }
 0x206   :  { %v844_v39 = vmul.f32 0.25, %v301_v38 }
 0x207   :  { %v4130_v40 = vpop.f32.mrf.mxu1 }
 0x208   :  { %v853_v41 = vsel %vm852_vm3, %v844_v39, -inf }
 0x209   :  { %854 = vmax.xlane.f32.xlu0 %v853_v41  ;;  %v378_v42 = vpop.f32.mrf.mxu1 }
 0x20a   :  { %v845_v43 = vmul.f32 0.25, %v378_v42 }
 0x20b   :  { %v4135_v44 = vpop.f32.mrf.mxu1 }
 0x20c   :  { %v856_v45 = vsel %vm852_vm3, %v845_v43, -inf }
 0x20d   :  { %857 = vmax.xlane.f32.xlu1 %v856_v45  ;;  %v455_v46 = vpop.f32.mrf.mxu1 }
 0x20e   :  { %v846_v47 = vmul.f32 0.25, %v455_v46 }
 0x20f   :  { %v4140_v48 = vpop.f32.mrf.mxu1 }
 0x210   :  { %v859_v49 = vsel %vm852_vm3, %v846_v47, -inf }
 0x211   :  { %v686_v50 = vpop.f32.mrf.mxu0  ;;  %860 = vmax.xlane.f32.xlu0 %v859_v49  ;;  %v532_v51 = vpop.f32.mrf.mxu1 }
 0x212   :  { %v4703_v52 = vmul.f32 0.25, %v532_v51  ;;  %v849_v55 = vmul.f32 0.25, %v686_v50 }
 0x213   :  { %v4145_v53 = vpop.f32.mrf.mxu1  ;;  %v4155_v54 = vpop.f32.mrf.mxu0 }
 0x214   :  { %v862_v56 = vsel %vm852_vm3, %v4703_v52, -inf  ;;  %v868_v62 = vsel %vm852_vm3, %v849_v55, -inf }
 0x215   :  { %v840_v57 = vpop.f32.mrf.mxu0  ;;  %863 = vmax.xlane.f32.xlu0 %v862_v56  ;;  %v609_v58 = vpop.f32.mrf.mxu1 }
 0x216   :  { %v851_v61 = vmul.f32 0.25, %v840_v57  ;;  %v4723_v2 = vmul.f32 0.25, %v609_v58 }
 0x217   :  { %v4150_v59 = vpop.f32.mrf.mxu1  ;;  %v4165_v60 = vpop.f32.mrf.mxu0 }
 0x218   :  { %v874_v1 = vsel %vm852_vm3, %v851_v61, -inf  ;;  %v865_v4 = vsel %vm852_vm3, %v4723_v2, -inf }
 0x219   :  { %869 = vmax.xlane.f32.xlu0 %v868_v62  ;;  %v763_v63 = vpop.f32.mrf.mxu1 }
 0x21a   :  { %v4725_v3 = vmul.f32 0.25, %v763_v63 }
 0x21b   :  { %v4160_v0 = vpop.f32.mrf.mxu1 }
 0x21c   :  { %v871_v5 = vsel %vm852_vm3, %v4725_v3, -inf }
 0x21d   :  { %875 = vmax.xlane.f32.xlu0 %v874_v1 }
 0x21e   :  { %941 = vrot.lane.b32.xlu1 %v4628_v16, %s4491_s2 }
 0x222   :  { %1093 = vrot.lane.b32.xlu1 %v4633_v20, %s4491_s2 }
 0x226   :  { %1169 = vrot.lane.b32.xlu1 %v4635_v22, %s4491_s2 }
 0x22a   :  { %1321 = vrot.lane.b32.xlu1 %v4642_v26, %s4491_s2 }
 0x22e   :  { %1473 = vrot.lane.b32.xlu1 %v4648_v29, %s4491_s2 }
 0x232   :  { %1629 = vrot.lane.b32.xlu1 %v4631_v19, %s4492_s29 }
 0x233   :  { %1017 = vrot.lane.b32.xlu0 %v4631_v19, %s4491_s2 }
 0x237   :  { %1245 = vrot.lane.b32.xlu0 %v4639_v24, %s4491_s2 }
 0x23b   :  { %1397 = vrot.lane.b32.xlu0 %v4645_v28, %s4491_s2 }
 0x23f   :  { %1551 = vrot.lane.b32.xlu0 %v4628_v16, %s4492_s29 }
 0x243   :  { %1549 = vrot.lane.b32.xlu0 %v4628_v16, %s4493_s30 }
 0x256   :  { %866 = vmax.xlane.f32.xlu1 %v865_v4 }
 0x25a   :  { %872 = vmax.xlane.f32.xlu1 %v871_v5 }
 0x26b   :  { %1627 = vrot.lane.b32.xlu1 %v4631_v19, %s4493_s30 }
 0x292   :  { %v855_v6 = vpop.xlane.xlu0 %854 }
 0x293   :  { %v877_v7 = vsub.f32 %v844_v39, %v855_v6 }
 0x295   :  { %v885_v8 = vmul.f32 1.442695, %v877_v7 }
 0x296   :  { %v858_v9 = vpop.xlane.xlu1 %857 }
 0x297   :  { %4384 = vpow2.f32 %v885_v8  ;;  %v878_v10 = vsub.f32 %v845_v43, %v858_v9 }
 0x299   :  { %v887_v11 = vmul.f32 1.442695, %v878_v10 }
 0x29a   :  { %v942_v13 = vpop.permute.xlu1 %941  ;;  %v861_v14 = vpop.xlane.xlu0 %860 }
 0x29b   :  { %4386 = vpow2.f32 %v887_v11  ;;  %v879_v15 = vsub.f32 %v846_v47, %v861_v14  ;;  %4167 = vmatpush3.msra.mxu1 %v942_v13 }
 0x29c   :  { %4176 = vmatprep.subr.mxu1 %v4488_v12 }
 0x29d   :  { %v889_v17 = vmul.f32 1.442695, %v879_v15 }
 0x29e   :  { %v864_v18 = vpop.xlane.xlu0 %863  ;;  %v1094_v47 = vpop.permute.xlu1 %1093 }
 0x29f   :  { %4388 = vpow2.f32 %v889_v17  ;;  %v880_v27 = vsub.f32 %v4703_v52, %v864_v18 }
 0x2a1   :  { %v891_v35 = vmul.f32 1.442695, %v880_v27 }
 0x2a2   :  { %v870_v21 = vpop.xlane.xlu0 %869  ;;  %v1170_v48 = vpop.permute.xlu1 %1169 }
 0x2a3   :  { %v882_v23 = vsub.f32 %v849_v55, %v870_v21 }
 0x2a4   :  { %v4734_v25 = vpop.eup %4384 }
 0x2a5   :  { %v895_v30 = vmul.f32 1.442695, %v882_v23  ;;  %v901_v31 = vsel %vm852_vm3, %v4734_v25, 0.0 }
 0x2a6   :  { %902 = vadd.xlane.f32.xlu1 %v901_v31  ;;  %v876_v32 = vpop.xlane.xlu0 %875  ;;  %v4764_v49 = vpop.permute.xlu1 %1321 }
 0x2a7   :  { %4390 = vpow2.f32 %v895_v30  ;;  %v884_v33 = vsub.f32 %v851_v61, %v876_v32 }
 0x2a8   :  { %v4739_v34 = vpop.eup %4386 }
 0x2a9   :  { %v899_v36 = vmul.f32 1.442695, %v884_v33  ;;  %v904_v37 = vsel %vm852_vm3, %v4739_v34, 0.0 }
 0x2aa   :  { %905 = vadd.xlane.f32.xlu0 %v904_v37  ;;  %v1018_v38 = vpop.permute.xlu0 %1017  ;;  %v4768_v50 = vpop.permute.xlu1 %1473 }
 0x2ab   :  { %4392 = vpow2.f32 %v899_v36  ;;  %4172 = vmatpush3.msra.mxu0 %v1018_v38 }
 0x2ac   :  { %v4743_v39 = vpop.eup %4388  ;;  %4181 = vmatprep.subr.mxu0 %v4488_v12  ;;  %4394 = vpow2.f32 %v891_v35 }
 0x2ad   :  { %v907_v40 = vsel %vm852_vm3, %v4743_v39, 0.0 }
 0x2ae   :  { %908 = vadd.xlane.f32.xlu1 %v907_v40  ;;  %v4772_v51 = vpop.permute.xlu1 %1629  ;;  %v1246_v62 = vpop.permute.xlu0 %1245 }
 0x2b2   :  { %v4800_v63 = vpop.permute.xlu0 %1397 }
 0x2b4   :  { %v4748_v41 = vpop.eup %4390 }
 0x2b5   :  { %v916_v42 = vsel %vm852_vm3, %v4748_v41, 0.0 }
 0x2b6   :  { %917 = vadd.xlane.f32.xlu0 %v916_v42  ;;  %v4802_v0 = vpop.permute.xlu0 %1551 }
 0x2b8   :  { %v4752_v43 = vpop.eup %4392 }
 0x2b9   :  { %v922_v44 = vsel %vm852_vm3, %v4752_v43, 0.0  ;;  %v4756_v45 = vpop.eup %4394 }
 0x2ba   :  { %923 = vadd.xlane.f32.xlu0 %v922_v44  ;;  %v910_v46 = vsel %vm852_vm3, %v4756_v45, 0.0 }
 0x2be   :  { %911 = vadd.xlane.f32.xlu0 %v910_v46 }
 0x2bf   :  { %1785 = vrot.lane.b32.xlu1 %v4635_v22, %s4492_s29 }
 0x2c3   :  { %1783 = vrot.lane.b32.xlu1 %v4635_v22, %s4493_s30 }
 0x2d4   :  { %1707 = vrot.lane.b32.xlu0 %v4633_v20, %s4492_s29 }
 0x2d8   :  { %1705 = vrot.lane.b32.xlu0 %v4633_v20, %s4493_s30 }
 0x2dc   :  { %1863 = vrot.lane.b32.xlu0 %v4639_v24, %s4492_s29 }
 0x2df   :  { %v867_v52 = vpop.xlane.xlu1 %866 }
 0x2e0   :  { %v881_v53 = vsub.f32 %v4723_v2, %v867_v52  ;;  %1861 = vrot.lane.b32.xlu0 %v4639_v24, %s4493_s30  ;;  %v4804_v2 = vpop.permute.xlu0 %1549 }
 0x2e2   :  { %v893_v54 = vmul.f32 1.442695, %v881_v53 }
 0x2e3   :  { %v873_v55 = vpop.xlane.xlu1 %872 }
 0x2e4   :  { %4396 = vpow2.f32 %v893_v54  ;;  %v883_v56 = vsub.f32 %v4725_v3, %v873_v55  ;;  %2019 = vrot.lane.b32.xlu0 %v4645_v28, %s4492_s29 }
 0x2e6   :  { %v897_v57 = vmul.f32 1.442695, %v883_v56 }
 0x2e7   :  { %v1628_v1 = vpop.permute.xlu1 %1627 }
 0x2e8   :  { %4398 = vpow2.f32 %v897_v57  ;;  %2017 = vrot.lane.b32.xlu0 %v4645_v28, %s4493_s30 }
 0x2f1   :  { %v4784_v58 = vpop.eup %4396 }
 0x2f2   :  { %v913_v59 = vsel %vm852_vm3, %v4784_v58, 0.0 }
 0x2f3   :  { %914 = vadd.xlane.f32.xlu1 %v913_v59 }
 0x2f5   :  { %v4788_v60 = vpop.eup %4398 }
 0x2f6   :  { %v919_v61 = vsel %vm852_vm3, %v4788_v60, 0.0 }
 0x2f7   :  { %920 = vadd.xlane.f32.xlu1 %v919_v61 }
 0x308   :  { %1941 = vrot.lane.b32.xlu1 %v4642_v26, %s4492_s29 }
 0x30c   :  { %1939 = vrot.lane.b32.xlu1 %v4642_v26, %s4493_s30 }
 0x310   :  { %2097 = vrot.lane.b32.xlu1 %v4648_v29, %s4492_s29 }
 0x314   :  { %2095 = vrot.lane.b32.xlu1 %v4648_v29, %s4493_s30 }
 0x32f   :  { %v903_v3 = vpop.xlane.xlu1 %902 }
 0x330   :  { %4400 = vrcp.f32 %v903_v3 }
 0x333   :  { %v906_v4 = vpop.xlane.xlu0 %905 }
 0x334   :  { %4402 = vrcp.f32 %v906_v4 }
 0x337   :  { %v909_v5 = vpop.xlane.xlu1 %908 }
 0x338   :  { %4404 = vrcp.f32 %v909_v5 }
 0x33b   :  { %v1786_v30 = vpop.permute.xlu1 %1785 }
 0x33d   :  { %v4401_v6 = vpop.eup %4400 }
 0x33e   :  { %v933_v7 = vmul.f32 %v4401_v6, %v4734_v25 }
 0x33f   :  { %v918_v8 = vpop.xlane.xlu0 %917  ;;  %v1784_v31 = vpop.permute.xlu1 %1783 }
 0x340   :  { %4169 = vmatmul.mubr.msk.f32.vlgmr.msra.gmra.mxu1 %vm852_vm3, %v933_v7 }
 0x341   :  { %v4403_v9 = vpop.eup %4402  ;;  %4177 = vmatpush3.msra.mxu1 %v1094_v47  ;;  %4178 = vmatprep.mubr.msk.f32.mxu1 %vm4489_vm1, %v4488_v12 }
 0x342   :  { %v934_v10 = vmul.f32 %v4403_v9, %v4739_v34  ;;  %4186 = vmatprep.subr.mxu1 %v4488_v12 }
 0x343   :  { %v924_v11 = vpop.xlane.xlu0 %923 }
 0x344   :  { %4174 = vmatmul.mubr.msk.f32.vlgmr.msra.gmra.mxu0 %vm852_vm3, %v934_v10 }
 0x345   :  { %v4405_v13 = vpop.eup %4404  ;;  %4182 = vmatpush3.msra.mxu0 %v1170_v48  ;;  %4183 = vmatprep.mubr.msk.f32.mxu0 %vm4489_vm1, %v4488_v12 }
 0x346   :  { %v935_v14 = vmul.f32 %v4405_v13, %v4743_v39  ;;  %4191 = vmatprep.subr.mxu0 %v4488_v12 }
 0x347   :  { %v912_v15 = vpop.xlane.xlu0 %911 }
 0x348   :  { %4406 = vrcp.f32 %v912_v15  ;;  %4179 = vmatmul.mubr.msk.f32.vlgmr.msra.gmra.mxu1 %vm852_vm3, %v935_v14 }
 0x349   :  { %4187 = vmatpush3.msra.mxu1 %v1246_v62  ;;  %4188 = vmatprep.mubr.msk.f32.mxu1 %vm4489_vm1, %v4488_v12  ;;  %4408 = vrcp.f32 %v918_v8 }
 0x34a   :  { %4196 = vmatprep.subr.mxu1 %v4488_v12  ;;  %4410 = vrcp.f32 %v924_v11 }
 0x34b   :  { %v1708_v34 = vpop.permute.xlu0 %1707 }
 0x34f   :  { %v1706_v36 = vpop.permute.xlu0 %1705 }
 0x353   :  { %v1864_v42 = vpop.permute.xlu0 %1863 }
 0x355   :  { %v4407_v17 = vpop.eup %4406 }
 0x356   :  { %v936_v18 = vmul.f32 %v4407_v17, %v4756_v45  ;;  %v4409_v21 = vpop.eup %4408 }
 0x357   :  { %v938_v23 = vmul.f32 %v4409_v21, %v4748_v41  ;;  %v4411_v25 = vpop.eup %4410  ;;  %v1862_v45 = vpop.permute.xlu0 %1861 }
 0x358   :  { %4184 = vmatmul.mubr.msk.f32.vlgmr.msra.gmra.mxu0 %vm852_vm3, %v936_v18  ;;  %v940_v27 = vmul.f32 %v4411_v25, %v4752_v43 }
 0x359   :  { %4192 = vmatpush3.msra.mxu0 %v4764_v49  ;;  %4193 = vmatprep.mubr.msk.f32.mxu0 %vm4489_vm1, %v4488_v12 }
 0x35a   :  { %4201 = vmatprep.subr.mxu0 %v4488_v12 }
 0x35b   :  { %v2020_v46 = vpop.permute.xlu0 %2019 }
 0x35c   :  { %4194 = vmatmul.mubr.msk.f32.vlgmr.msra.gmra.mxu0 %vm852_vm3, %v938_v23 }
 0x35d   :  { %4202 = vmatpush3.msra.mxu0 %v4768_v50  ;;  %4203 = vmatprep.mubr.msk.f32.mxu0 %vm4489_vm1, %v4488_v12 }
 0x35e   :  { %4211 = vmatprep.subr.mxu0 %v4488_v12 }
 0x35f   :  { %v2018_v47 = vpop.permute.xlu0 %2017 }
 0x360   :  { %4204 = vmatmul.mubr.msk.f32.vlgmr.msra.gmra.mxu0 %vm852_vm3, %v940_v27 }
 0x361   :  { %4212 = vmatpush3.xpose.msk.msra.mxu0 %vm230_vm2, %v4772_v51  ;;  %4213 = vmatprep.mubr.msk.f32.mxu0 %vm4489_vm1, %v4488_v12 }
 0x362   :  { %4221 = vmatprep.subr.mxu0 %v4488_v12 }
 0x364   :  { %4214 = vmatmul.mubr.msk.f32.vlgmr.msra.gmra.mxu0 %vm230_vm2, %v1628_v1 }
 0x365   :  { %4222 = vmatpush3.xpose.msk.msra.mxu0 %vm230_vm2, %v1786_v30  ;;  %4223 = vmatprep.mubr.msk.f32.mxu0 %vm4489_vm1, %v4488_v12 }
 0x366   :  { %4231 = vmatprep.subr.mxu0 %v4488_v12 }
 0x368   :  { %4224 = vmatmul.mubr.msk.f32.vlgmr.msra.gmra.mxu0 %vm230_vm2, %v1784_v31 }
 0x369   :  { %4233 = vmatprep.mubr.msk.f32.mxu0 %vm4489_vm1, %v4488_v12 }
 0x37c   :  { %v915_v32 = vpop.xlane.xlu1 %914 }
 0x37d   :  { %4412 = vrcp.f32 %v915_v32 }
 0x380   :  { %v921_v33 = vpop.xlane.xlu1 %920 }
 0x381   :  { %4414 = vrcp.f32 %v921_v33 }
 0x384   :  { %v1942_v35 = vpop.permute.xlu1 %1941 }
 0x385   :  { %4232 = vmatpush3.xpose.msk.msra.mxu0 %vm230_vm2, %v1942_v35 }
 0x386   :  { %4241 = vmatprep.subr.mxu0 %v4488_v12 }
 0x388   :  { %v1940_v37 = vpop.permute.xlu1 %1939 }
 0x389   :  { %4234 = vmatmul.mubr.msk.f32.vlgmr.msra.gmra.mxu0 %vm230_vm2, %v1940_v37 }
 0x38a   :  { %v4413_v38 = vpop.eup %4412  ;;  %4243 = vmatprep.mubr.msk.f32.mxu0 %vm4489_vm1, %v4488_v12 }
 0x38b   :  { %v937_v39 = vmul.f32 %v4413_v38, %v4784_v58 }
 0x38c   :  { %v2098_v40 = vpop.permute.xlu1 %2097 }
 0x38d   :  { %4189 = vmatmul.mubr.msk.f32.vlgmr.msra.gmra.mxu1 %vm852_vm3, %v937_v39  ;;  %4242 = vmatpush3.xpose.msk.msra.mxu0 %vm230_vm2, %v2098_v40 }
 0x38e   :  { %v4415_v41 = vpop.eup %4414  ;;  %4197 = vmatpush3.msra.mxu1 %v4800_v63  ;;  %4198 = vmatprep.mubr.msk.f32.mxu1 %vm4489_vm1, %v4488_v12 }
 0x38f   :  { %4206 = vmatprep.subr.mxu1 %v4488_v12  ;;  %v939_v43 = vmul.f32 %v4415_v41, %v4788_v60  ;;  %4251 = vmatprep.subr.mxu0 %v4488_v12 }
 0x390   :  { %v2096_v44 = vpop.permute.xlu1 %2095 }
 0x391   :  { %4199 = vmatmul.mubr.msk.f32.vlgmr.msra.gmra.mxu1 %vm852_vm3, %v939_v43  ;;  %4244 = vmatmul.mubr.msk.f32.vlgmr.msra.gmra.mxu0 %vm230_vm2, %v2096_v44 }
 0x392   :  { %4207 = vmatpush3.xpose.msk.msra.mxu1 %vm230_vm2, %v4802_v0  ;;  %4208 = vmatprep.mubr.msk.f32.mxu1 %vm4489_vm1, %v4488_v12 }
 0x393   :  { %4216 = vmatprep.subr.mxu1 %v4488_v12  ;;  %4253 = vmatprep.mubr.msk.f32.mxu0 %vm4489_vm1, %v4488_v12 }
 0x395   :  { %4209 = vmatmul.mubr.msk.f32.vlgmr.msra.gmra.mxu1 %vm230_vm2, %v4804_v2 }
 0x396   :  { %4217 = vmatpush3.xpose.msk.msra.mxu1 %vm230_vm2, %v1708_v34  ;;  %4218 = vmatprep.mubr.msk.f32.mxu1 %vm4489_vm1, %v4488_v12 }
 0x397   :  { %4226 = vmatprep.subr.mxu1 %v4488_v12 }
 0x399   :  { %4219 = vmatmul.mubr.msk.f32.vlgmr.msra.gmra.mxu1 %vm230_vm2, %v1706_v36 }
 0x39a   :  { %4227 = vmatpush3.xpose.msk.msra.mxu1 %vm230_vm2, %v1864_v42  ;;  %4228 = vmatprep.mubr.msk.f32.mxu1 %vm4489_vm1, %v4488_v12 }
 0x39b   :  { %4236 = vmatprep.subr.mxu1 %v4488_v12 }
 0x39d   :  { %4229 = vmatmul.mubr.msk.f32.vlgmr.msra.gmra.mxu1 %vm230_vm2, %v1862_v45 }
 0x39e   :  { %4237 = vmatpush3.xpose.msk.msra.mxu1 %vm230_vm2, %v2020_v46  ;;  %4238 = vmatprep.mubr.msk.f32.mxu1 %vm4489_vm1, %v4488_v12 }
 0x39f   :  { %4246 = vmatprep.subr.mxu1 %v4488_v12 }
 0x3a1   :  { %4239 = vmatmul.mubr.msk.f32.vlgmr.msra.gmra.mxu1 %vm230_vm2, %v2018_v47 }
 0x3a2   :  { %4248 = vmatprep.mubr.msk.f32.mxu1 %vm4489_vm1, %v4488_v12 }
 0x400   :  { %v4890_v48 = vpop.f32.mrf.mxu1 }
 0x402   :  { %v4170_v49 = vpop.f32.mrf.mxu1 }
 0x404   :  { %v4892_v50 = vpop.f32.mrf.mxu0 }
 0x406   :  { %v4175_v51 = vpop.f32.mrf.mxu0 }
 0x408   :  { %v4894_v52 = vpop.f32.mrf.mxu1 }
 0x40a   :  { %v4180_v53 = vpop.f32.mrf.mxu1 }
 0x418   :  { %v4896_v54 = vpop.f32.mrf.mxu0 }
 0x41a   :  { %v4185_v55 = vpop.f32.mrf.mxu0 }
 0x41c   :  { %v4898_v56 = vpop.f32.mrf.mxu0 }
 0x41e   :  { %v4195_v57 = vpop.f32.mrf.mxu0 }
 0x420   :  { %v4900_v58 = vpop.f32.mrf.mxu0 }
 0x422   :  { %v4205_v59 = vpop.f32.mrf.mxu0 }
 0x424   :  { %v1701_v60 = vpop.f32.mrf.mxu0 }
 0x425   :  { %v2174_v61 = vmul.f32 0.25, %v1701_v60 }
 0x426   :  { %v4215_v62 = vpop.f32.mrf.mxu0 }
 0x427   :  { %v2184_v63 = vsel %vm852_vm3, %v2174_v61, -inf }
 0x428   :  { %2185 = vmax.xlane.f32.xlu1 %v2184_v63  ;;  %v1857_v0 = vpop.f32.mrf.mxu0 }
 0x429   :  { %v2176_v21 = vmul.f32 0.25, %v1857_v0 }
 0x42a   :  { %v4225_v1 = vpop.f32.mrf.mxu0 }
 0x42b   :  { %v2190_v32 = vsel %vm852_vm3, %v2176_v21, -inf }
 0x449   :  { %v2013_v2 = vpop.f32.mrf.mxu0 }
 0x44a   :  { %v2178_v31 = vmul.f32 0.25, %v2013_v2 }
 0x44b   :  { %v4235_v3 = vpop.f32.mrf.mxu0 }
 0x44c   :  { %v2196_v38 = vsel %vm852_vm3, %v2178_v31, -inf }
 0x44d   :  { %v4903_v4 = vpop.f32.mrf.mxu1 }
 0x44f   :  { %v4190_v5 = vpop.f32.mrf.mxu1 }
 0x451   :  { %v4905_v6 = vpop.f32.mrf.mxu1  ;;  %v2169_v7 = vpop.f32.mrf.mxu0 }
 0x452   :  { %v2180_v37 = vmul.f32 0.25, %v2169_v7 }
 0x453   :  { %v4200_v8 = vpop.f32.mrf.mxu1  ;;  %v4245_v9 = vpop.f32.mrf.mxu0 }
 0x454   :  { %v2202_v40 = vsel %vm852_vm3, %v2180_v37, -inf }
 0x455   :  { %v1623_v10 = vpop.f32.mrf.mxu1 }
 0x456   :  { %v2173_v11 = vmul.f32 0.25, %v1623_v10 }
 0x457   :  { %v4210_v13 = vpop.f32.mrf.mxu1 }
 0x458   :  { %v2181_v14 = vsel %vm852_vm3, %v2173_v11, -inf }
 0x459   :  { %2182 = vmax.xlane.f32.xlu0 %v2181_v14  ;;  %v1779_v15 = vpop.f32.mrf.mxu1 }
 0x45a   :  { %v2175_v17 = vmul.f32 0.25, %v1779_v15 }
 0x45b   :  { %v4220_v18 = vpop.f32.mrf.mxu1 }
 0x45c   :  { %v2187_v23 = vsel %vm852_vm3, %v2175_v17, -inf }
 0x45d   :  { %2188 = vmax.xlane.f32.xlu0 %v2187_v23  ;;  %v1935_v25 = vpop.f32.mrf.mxu1 }
 0x45e   :  { %v2177_v27 = vmul.f32 0.25, %v1935_v25 }
 0x45f   :  { %v4230_v30 = vpop.f32.mrf.mxu1 }
 0x460   :  { %v2193_v33 = vsel %vm852_vm3, %v2177_v27, -inf }
 0x461   :  { %2191 = vmax.xlane.f32.xlu0 %v2190_v32  ;;  %2194 = vmax.xlane.f32.xlu1 %v2193_v33  ;;  %v2091_v34 = vpop.f32.mrf.mxu1 }
 0x462   :  { %v2179_v35 = vmul.f32 0.25, %v2091_v34 }
 0x463   :  { %v4240_v36 = vpop.f32.mrf.mxu1 }
 0x464   :  { %v2199_v39 = vsel %vm852_vm3, %v2179_v35, -inf }
 0x465   :  { %2197 = vmax.xlane.f32.xlu0 %v2196_v38  ;;  %2200 = vmax.xlane.f32.xlu1 %v2199_v39 }
 0x469   :  { %2203 = vmax.xlane.f32.xlu0 %v2202_v40 }
 0x476   :  { %2269 = vrot.lane.b32.xlu1 %v4628_v16, %s4494_s16 }
 0x47a   :  { %2421 = vrot.lane.b32.xlu1 %v4633_v20, %s4494_s16 }
 0x47e   :  { %2497 = vrot.lane.b32.xlu1 %v4635_v22, %s4494_s16 }
 0x47f   :  { %2345 = vrot.lane.b32.xlu0 %v4631_v19, %s4494_s16 }
 0x482   :  { %2649 = vrot.lane.b32.xlu1 %v4642_v26, %s4494_s16 }
 0x483   :  { %2573 = vrot.lane.b32.xlu0 %v4639_v24, %s4494_s16 }
 0x4b1   :  { %v2186_v41 = vpop.xlane.xlu1 %2185 }
 0x4b2   :  { %v2206_v42 = vsub.f32 %v2174_v61, %v2186_v41 }
 0x4b4   :  { %v2215_v43 = vmul.f32 1.442695, %v2206_v42 }
 0x4b6   :  { %4416 = vpow2.f32 %v2215_v43 }
 0x4c3   :  { %v4926_v16 = vpop.eup %4416 }
 0x4c4   :  { %v2232_v20 = vsel %vm852_vm3, %v4926_v16, 0.0 }
 0x4c5   :  { %2233 = vadd.xlane.f32.xlu0 %v2232_v20 }
 0x4e2   :  { %v2183_v22 = vpop.xlane.xlu0 %2182 }
 0x4e3   :  { %v2205_v44 = vsub.f32 %v2173_v11, %v2183_v22 }
 0x4e5   :  { %v2213_v45 = vmul.f32 1.442695, %v2205_v44 }
 0x4e6   :  { %v2189_v19 = vpop.xlane.xlu0 %2188 }
 0x4e7   :  { %4418 = vpow2.f32 %v2213_v45  ;;  %v2207_v46 = vsub.f32 %v2175_v17, %v2189_v19 }
 0x4e9   :  { %v2217_v26 = vmul.f32 1.442695, %v2207_v46 }
 0x4ea   :  { %v2195_v47 = vpop.xlane.xlu1 %2194  ;;  %v2192_v49 = vpop.xlane.xlu0 %2191 }
 0x4eb   :  { %4420 = vpow2.f32 %v2217_v26  ;;  %v2209_v24 = vsub.f32 %v2177_v27, %v2195_v47  ;;  %v2208_v51 = vsub.f32 %v2176_v21, %v2192_v49 }
 0x4ed   :  { %v2221_v53 = vmul.f32 1.442695, %v2209_v24  ;;  %v2219_v55 = vmul.f32 1.442695, %v2208_v51  ;;  %v64_v51 = vld [vmem:[%s5311_s3 + $0x8] sm:$0xff] }
 0x4ee   :  { %v2201_v57 = vpop.xlane.xlu1 %2200  ;;  %v2198_v59 = vpop.xlane.xlu0 %2197 }
 0x4ef   :  { %4422 = vpow2.f32 %v2221_v53  ;;  %v2211_v60 = vsub.f32 %v2179_v35, %v2201_v57  ;;  %v2210_v61 = vsub.f32 %v2178_v31, %v2198_v59  ;;  %v63_v59 = vld [vmem:[%s5311_s3] sm:$0xff] }
 0x4f0   :  { %4424 = vpow2.f32 %v2219_v55 }
 0x4f1   :  { %v2225_v62 = vmul.f32 1.442695, %v2211_v60  ;;  %v2223_v63 = vmul.f32 1.442695, %v2210_v61  ;;  %v66_v60 = vld [vmem:[%s5311_s3 + $0x18] sm:$0xff] }
 0x4f2   :  { %v2270_v0 = vpop.permute.xlu1 %2269  ;;  %v2204_v1 = vpop.xlane.xlu0 %2203 }
 0x4f3   :  { %4426 = vpow2.f32 %v2225_v62  ;;  %v2212_v2 = vsub.f32 %v2180_v37, %v2204_v1  ;;  %4247 = vmatpush3.msra.mxu1 %v2270_v0 }
 0x4f4   :  { %v4419_v3 = vpop.eup %4418  ;;  %4428 = vpow2.f32 %v2223_v63  ;;  %4256 = vmatprep.subr.mxu1 %v4488_v12 }
 0x4f5   :  { %v2227_v5 = vmul.f32 1.442695, %v2212_v2  ;;  %v2229_v7 = vsel %vm852_vm3, %v4419_v3, 0.0 }
 0x4f6   :  { %2230 = vadd.xlane.f32.xlu1 %v2229_v7  ;;  %v2346_v8 = vpop.permute.xlu0 %2345  ;;  %v2422_v32 = vpop.permute.xlu1 %2421 }
 0x4f7   :  { %4430 = vpow2.f32 %v2227_v5  ;;  %4252 = vmatpush3.msra.mxu0 %v2346_v8 }
 0x4f8   :  { %v4421_v9 = vpop.eup %4420  ;;  %4261 = vmatprep.subr.mxu0 %v4488_v12 }
 0x4f9   :  { %v2235_v10 = vsel %vm852_vm3, %v4421_v9, 0.0 }
 0x4fa   :  { %2236 = vadd.xlane.f32.xlu1 %v2235_v10  ;;  %v2574_v30 = vpop.permute.xlu0 %2573  ;;  %v2498_v35 = vpop.permute.xlu1 %2497 }
 0x4fc   :  { %v4423_v11 = vpop.eup %4422 }
 0x4fd   :  { %v4425_v13 = vpop.eup %4424  ;;  %v2241_v14 = vsel %vm852_vm3, %v4423_v11, 0.0 }
 0x4fe   :  { %2242 = vadd.xlane.f32.xlu1 %v2241_v14  ;;  %v2238_v15 = vsel %vm852_vm3, %v4425_v13, 0.0 }
 0x4ff   :  { %2239 = vadd.xlane.f32.xlu0 %v2238_v15 }
 0x500   :  { %v4427_v17 = vpop.eup %4426 }
 0x501   :  { %v4936_v18 = vpop.eup %4428  ;;  %v2247_v21 = vsel %vm852_vm3, %v4427_v17, 0.0 }
 0x502   :  { %2248 = vadd.xlane.f32.xlu1 %v2247_v21  ;;  %v2244_v23 = vsel %vm852_vm3, %v4936_v18, 0.0 }
 0x503   :  { %2245 = vadd.xlane.f32.xlu0 %v2244_v23 }
 0x504   :  { %v4941_v25 = vpop.eup %4430 }
 0x505   :  { %v2250_v27 = vsel %vm852_vm3, %v4941_v25, 0.0 }
 0x507   :  { %2251 = vadd.xlane.f32.xlu0 %v2250_v27 }
 0x513   :  { %2801 = vrot.lane.b32.xlu1 %v4648_v29, %s4494_s16  ;;  %v2650_v29 = vpop.permute.xlu1 %2649 }
 0x51d   :  { %2725 = vrot.lane.b32.xlu0 %v4645_v28, %s4494_s16 }
 0x54e   :  { %v2234_v31 = vpop.xlane.xlu0 %2233 }
 0x54f   :  { %4432 = vrcp.f32 %v2234_v31 }
 0x55c   :  { %v4433_v33 = vpop.eup %4432 }
 0x55d   :  { %v2262_v34 = vmul.f32 %v4433_v33, %v4926_v16 }
 0x55f   :  { %4254 = vmatmul.mubr.msk.f32.vlgmr.msra.gmra.mxu0 %vm852_vm3, %v2262_v34 }
 0x560   :  { %4262 = vmatpush3.msra.mxu0 %v2498_v35  ;;  %4263 = vmatprep.mubr.msk.f32.mxu0 %vm4489_vm1, %v4488_v12 }
 0x561   :  { %4271 = vmatprep.subr.mxu0 %v4488_v12 }
 0x57f   :  { %v2231_v36 = vpop.xlane.xlu1 %2230 }
 0x580   :  { %4434 = vrcp.f32 %v2231_v36 }
 0x583   :  { %v2237_v28 = vpop.xlane.xlu1 %2236 }
 0x584   :  { %4436 = vrcp.f32 %v2237_v28 }
 0x587   :  { %v2243_v37 = vpop.xlane.xlu1 %2242 }
 0x588   :  { %4438 = vrcp.f32 %v2243_v37  ;;  %v2240_v38 = vpop.xlane.xlu0 %2239 }
 0x589   :  { %4440 = vrcp.f32 %v2240_v38 }
 0x58b   :  { %v2249_v39 = vpop.xlane.xlu1 %2248 }
 0x58c   :  { %4442 = vrcp.f32 %v2249_v39  ;;  %v2246_v40 = vpop.xlane.xlu0 %2245 }
 0x58d   :  { %v4435_v41 = vpop.eup %4434  ;;  %4444 = vrcp.f32 %v2246_v40 }
 0x58e   :  { %v2261_v42 = vmul.f32 %v4435_v41, %v4419_v3 }
 0x58f   :  { %v2802_v53 = vpop.permute.xlu1 %2801 }
 0x590   :  { %v2252_v43 = vpop.xlane.xlu0 %2251  ;;  %4249 = vmatmul.mubr.msk.f32.vlgmr.msra.gmra.mxu1 %vm852_vm3, %v2261_v42 }
 0x591   :  { %v4437_v16 = vpop.eup %4436  ;;  %4446 = vrcp.f32 %v2252_v43  ;;  %4257 = vmatpush3.msra.mxu1 %v2422_v32  ;;  %4258 = vmatprep.mubr.msk.f32.mxu1 %vm4489_vm1, %v4488_v12  ;;  %v4481_v32 = vld [vmem:[%s5309_s0] sm:$0xff] }
 0x592   :  { %4266 = vmatprep.subr.mxu1 %v4488_v12  ;;  %v2263_v20 = vmul.f32 %v4437_v16, %v4421_v9 }
 0x594   :  { %4259 = vmatmul.mubr.msk.f32.vlgmr.msra.gmra.mxu1 %vm852_vm3, %v2263_v20  ;;  %v2726_v46 = vpop.permute.xlu0 %2725  ;;  %v4482_v20 = vld [vmem:[%s5309_s0 + $0x10] sm:$0xff] }
 0x595   :  { %v4439_v22 = vpop.eup %4438  ;;  %4267 = vmatpush3.msra.mxu1 %v2574_v30  ;;  %4268 = vmatprep.mubr.msk.f32.mxu1 %vm4489_vm1, %v4488_v12 }
 0x596   :  { %v4441_v44 = vpop.eup %4440  ;;  %4276 = vmatprep.subr.mxu1 %v4488_v12  ;;  %v2265_v45 = vmul.f32 %v4439_v22, %v4423_v11  ;;  %v3952_v11 = vld [vmem:[%s5312_s4] ss:$0 sm:$0xff] }
 0x597   :  { %v2264_v19 = vmul.f32 %v4441_v44, %v4425_v13 }
 0x598   :  { %4269 = vmatmul.mubr.msk.f32.vlgmr.msra.gmra.mxu1 %vm852_vm3, %v2265_v45  ;;  %v4483_v45 = vld [vmem:[%s5309_s0 + $0x18] sm:$0xff] }
 0x599   :  { %v4443_v26 = vpop.eup %4442  ;;  %4264 = vmatmul.mubr.msk.f32.vlgmr.msra.gmra.mxu0 %vm852_vm3, %v2264_v19  ;;  %4277 = vmatpush3.msra.mxu1 %v2726_v46 }
 0x59a   :  { %v4445_v47 = vpop.eup %4444  ;;  %4272 = vmatpush3.msra.mxu0 %v2650_v29  ;;  %4273 = vmatprep.mubr.msk.f32.mxu0 %vm4489_vm1, %v4488_v12  ;;  %v2267_v49 = vmul.f32 %v4443_v26, %v4427_v17 }
 0x59b   :  { %4278 = vmatprep.mubr.msk.f32.mxu1 %vm4489_vm1, %v4488_v12  ;;  %4281 = vmatprep.subr.mxu0 %v4488_v12  ;;  %v2266_v24 = vmul.f32 %v4445_v47, %v4936_v18 }
 0x59c   :  { %4279 = vmatmul.mubr.msk.f32.vlgmr.msra.gmra.mxu1 %vm852_vm3, %v2267_v49  ;;  %4286 = vmatprep.subr.mxu1 %v66_v60 }
 0x59d   :  { %4274 = vmatmul.mubr.msk.f32.vlgmr.msra.gmra.mxu0 %vm852_vm3, %v2266_v24  ;;  %4287 = vmatpush3.msra.mxu1 %v66_v60 }
 0x59e   :  { %v4447_v55 = vpop.eup %4446  ;;  %4282 = vmatpush3.msra.mxu0 %v2802_v53  ;;  %4283 = vmatprep.mubr.msk.f32.mxu0 %vm4489_vm1, %v4488_v12 }
 0x59f   :  { %v2268_v57 = vmul.f32 %v4447_v55, %v4941_v25  ;;  %4302 = vmatprep.subr.mxu0 %v64_v51  ;;  %v4480_v25 = vld [vmem:[%s5309_s0 + $0x8] sm:$0xff]  ;;  %v4484_v55 = vld [vmem:[%s5309_s0 + $0x20] sm:$0xff] }
 0x5a1   :  { %4284 = vmatmul.mubr.msk.f32.vlgmr.msra.gmra.mxu0 %vm852_vm3, %v2268_v57 }
 0x5a2   :  { %4303 = vmatpush3.msra.mxu0 %v64_v51  ;;  %4306 = vmatprep.mubr.msk.f32.mxu0 %vm230_vm2, %v4890_v48  ;;  %v65_v48 = vld [vmem:[%s5311_s3 + $0x10] sm:$0xff] }
 0x5a3   :  { %4304 = vmatprep.subr.mxu0 %v63_v59  ;;  %4288 = vmatprep.subr.mxu1 %v65_v48 }
 0x5a4   :  { %4305 = vmatpush3.msra.mxu0 %v63_v59  ;;  %4289 = vmatpush3.msra.mxu1 %v65_v48 }
 0x5a5   :  { %4307 = vmatmul.mubr.msk.f32.vlgmr.msra.gmra.mxu0 %vm230_vm2, %v4892_v50 }
 0x5a6   :  { %4309 = vmatprep.mubr.msk.f32.mxu0 %vm230_vm2, %v4894_v52 }
 0x5a9   :  { %4310 = vmatmul.mubr.msk.f32.gmra.mxu0 %vm230_vm2, %v4896_v54 }
 0x5aa   :  { %4312 = vmatprep.mubr.msk.f32.mxu0 %vm230_vm2, %v4903_v4 }
 0x5ad   :  { %4313 = vmatmul.mubr.msk.f32.gmra.mxu0 %vm230_vm2, %v4898_v56 }
 0x5ae   :  { %4315 = vmatprep.mubr.msk.f32.mxu0 %vm230_vm2, %v4905_v6 }
 0x5b1   :  { %4316 = vmatmul.mubr.msk.f32.gmra.mxu0 %vm230_vm2, %v4900_v58 }
 0x61f   :  { %v2417_v50 = vpop.f32.mrf.mxu0 }
 0x621   :  { %v4255_v52 = vpop.f32.mrf.mxu0 }
 0x622   :  { %v4485_v52 = vld [vmem:[%s5309_s0 + $0x28] sm:$0xff] }
 0x650   :  { %v2341_v54 = vpop.f32.mrf.mxu1 }
 0x651   :  { %4290 = vmatprep.mubr.msk.f32.mxu1 %vm230_vm2, %v2341_v54 }
 0x652   :  { %v4250_v4 = vpop.f32.mrf.mxu1  ;;  %4291 = vmatmul.mubr.msk.f32.vlgmr.msra.gmra.mxu1 %vm230_vm2, %v2417_v50 }
 0x653   :  { %v4486_v4 = vld [vmem:[%s5309_s0 + $0x30] sm:$0xff] }
 0x654   :  { %v2493_v56 = vpop.f32.mrf.mxu1 }
 0x655   :  { %4293 = vmatprep.mubr.msk.f32.mxu1 %vm230_vm2, %v2493_v56 }
 0x656   :  { %v4260_v6 = vpop.f32.mrf.mxu1 }
 0x658   :  { %v2645_v61 = vpop.f32.mrf.mxu1 }
 0x659   :  { %v2569_v58 = vpop.f32.mrf.mxu0 }
 0x65a   :  { %4294 = vmatmul.mubr.msk.f32.gmra.mxu1 %vm230_vm2, %v2569_v58  ;;  %v4270_v62 = vpop.f32.mrf.mxu1  ;;  %v4487_v58 = vld [vmem:[%s5309_s0 + $0x38] sm:$0xff] }
 0x65b   :  { %v4265_v63 = vpop.f32.mrf.mxu0  ;;  %4296 = vmatprep.mubr.msk.f32.mxu1 %vm230_vm2, %v2645_v61 }
 0x65c   :  { %v2797_v0 = vpop.f32.mrf.mxu1 }
 0x65d   :  { %v2721_v1 = vpop.f32.mrf.mxu0 }
 0x65e   :  { %4297 = vmatmul.mubr.msk.f32.gmra.mxu1 %vm230_vm2, %v2721_v1  ;;  %v4280_v2 = vpop.f32.mrf.mxu1 }
 0x65f   :  { %v4275_v3 = vpop.f32.mrf.mxu0  ;;  %4299 = vmatprep.mubr.msk.f32.mxu1 %vm230_vm2, %v2797_v0 }
 0x661   :  { %v2873_v5 = vpop.f32.mrf.mxu0 }
 0x662   :  { %4300 = vmatmul.mubr.msk.f32.gmra.mxu1 %vm230_vm2, %v2873_v5 }
 0x663   :  { %v4285_v7 = vpop.f32.mrf.mxu0 }
 0x665   :  { %v4308_v8 = vpop.f32.mrf.mxu0 }
 0x667   :  { %v3096_v9 = vpop.f32.mrf.mxu0 }
 0x669   :  { %v4311_v10 = vpop.f32.mrf.mxu0 }
 0x66b   :  { %v3106_v15 = vpop.f32.mrf.mxu0 }
 0x66d   :  { %v4314_v30 = vpop.f32.mrf.mxu0 }
 0x66f   :  { %v3116_v36 = vpop.f32.mrf.mxu0 }
 0x671   :  { %v4317_v42 = vpop.f32.mrf.mxu0 }
 0x673   :  { %v3126_v24 = vpop.f32.mrf.mxu0 }
 0x712   :  { %v4292_v13 = vpop.f32.mrf.mxu1 }
 0x713   :  { %v3102_v14 = vadd.f32 %v4308_v8, %v4292_v13 }
 0x714   :  { %v2967_v17 = vpop.f32.mrf.mxu1 }
 0x715   :  { %v3142_v18 = vadd.f32 %v3952_v11, %v3102_v14  ;;  %v3097_v21 = vadd.f32 %v3096_v9, %v2967_v17 }
 0x717   :  { %v3141_v23 = vadd.f32 %v3952_v11, %v3097_v21  ;;  %v3150_v27 = vadd.f32 %v4480_v25, %v3142_v18 }
 0x719   :  { %v3160_v31 = vsel %vm97_vm0, %v3150_v27, 0.0  ;;  %v3149_v33 = vadd.f32 %v4481_v32, %v3141_v23 }
 0x71a   :  { %v4295_v34 = vpop.f32.mrf.mxu1  ;;  %3161 = vadd.xlane.f32.xlu1 %v3160_v31 }
 0x71b   :  { %v3112_v35 = vadd.f32 %v4311_v10, %v4295_v34  ;;  %v3157_v29 = vsel %vm97_vm0, %v3149_v33, 0.0 }
 0x71c   :  { %v2977_v28 = vpop.f32.mrf.mxu1  ;;  %3158 = vadd.xlane.f32.xlu0 %v3157_v29 }
 0x71d   :  { %v3107_v37 = vadd.f32 %v3106_v15, %v2977_v28  ;;  %v3144_v38 = vadd.f32 %v3952_v11, %v3112_v35 }
 0x71e   :  { %v4298_v39 = vpop.f32.mrf.mxu1 }
 0x71f   :  { %v3143_v40 = vadd.f32 %v3952_v11, %v3107_v37  ;;  %v3122_v41 = vadd.f32 %v4314_v30, %v4298_v39  ;;  %v3152_v19 = vadd.f32 %v4483_v45, %v3144_v38 }
 0x720   :  { %v2987_v43 = vpop.f32.mrf.mxu1 }
 0x721   :  { %v3117_v16 = vadd.f32 %v3116_v36, %v2987_v43  ;;  %v3151_v22 = vadd.f32 %v4482_v20, %v3143_v40  ;;  %v3146_v46 = vadd.f32 %v3952_v11, %v3122_v41  ;;  %v3166_v59 = vsel %vm97_vm0, %v3152_v19, 0.0 }
 0x722   :  { %v4301_v44 = vpop.f32.mrf.mxu1 }
 0x723   :  { %v3145_v26 = vadd.f32 %v3952_v11, %v3117_v16  ;;  %v3132_v47 = vadd.f32 %v4317_v42, %v4301_v44  ;;  %v3163_v49 = vsel %vm97_vm0, %v3151_v22, 0.0  ;;  %v3154_v54 = vadd.f32 %v4485_v52, %v3146_v46  ;;  %v72_v46 = vld [vmem:[%s5313_s7 + $0x10] sm:$0xff] }
 0x724   :  { %3164 = vadd.xlane.f32.xlu0 %v3163_v49  ;;  %v2997_v51 = vpop.f32.mrf.mxu1  ;;  %v82_v49 = vld [vmem:[%s5314_s9 + $0x38] sm:$0xff] }
 0x725   :  { %v3127_v53 = vadd.f32 %v3126_v24, %v2997_v51  ;;  %v3153_v57 = vadd.f32 %v4484_v55, %v3145_v26  ;;  %v3148_v60 = vadd.f32 %v3952_v11, %v3132_v47  ;;  %v3172_v6 = vsel %vm97_vm0, %v3154_v54, 0.0  ;;  %v71_v26 = vld [vmem:[%s5313_s7 + $0x8] sm:$0xff]  ;;  %v70_v47 = vld [vmem:[%s5313_s7] sm:$0xff]  ;;  %v81_v24 = vld [vmem:[%s5314_s9 + $0x30] sm:$0xff]  ;;  %4338 = vmatprep.subr.mxu0 %v82_v49 }
 0x726   :  { %4339 = vmatpush3.msra.mxu0 %v82_v49  ;;  %v80_v51 = vld [vmem:[%s5314_s9 + $0x28] sm:$0xff]  ;;  %v77_v49 = vld [vmem:[%s5314_s9 + $0x10] sm:$0xff] }
 0x727   :  { %v3147_v48 = vadd.f32 %v3952_v11, %v3127_v53  ;;  %v3169_v50 = vsel %vm97_vm0, %v3153_v57, 0.0  ;;  %v3156_v62 = vadd.f32 %v4487_v58, %v3148_v60  ;;  %4340 = vmatprep.subr.mxu0 %v81_v24  ;;  %v79_v53 = vld [vmem:[%s5314_s9 + $0x20] sm:$0xff] }
 0x728   :  { %3167 = vadd.xlane.f32.xlu0 %v3166_v59  ;;  %3170 = vadd.xlane.f32.xlu1 %v3169_v50 }
 0x729   :  { %v3155_v56 = vadd.f32 %v4486_v4, %v3147_v48  ;;  %v3178_v63 = vsel %vm97_vm0, %v3156_v62, 0.0  ;;  %4341 = vmatpush3.msra.mxu0 %v81_v24  ;;  %v76_v24 = vld [vmem:[%s5314_s9 + $0x8] sm:$0xff] }
 0x72a   :  { %4342 = vmatprep.subr.mxu0 %v80_v51 }
 0x72b   :  { %v3175_v61 = vsel %vm97_vm0, %v3155_v56, 0.0  ;;  %4343 = vmatpush3.msra.mxu0 %v80_v51  ;;  %v75_v51 = vld [vmem:[%s5314_s9] sm:$0xff] }
 0x72c   :  { %3173 = vadd.xlane.f32.xlu0 %v3172_v6  ;;  %3176 = vadd.xlane.f32.xlu1 %v3175_v61 }
 0x72d   :  { %4344 = vmatprep.subr.mxu0 %v79_v53 }
 0x72e   :  { %4345 = vmatpush3.msra.mxu0 %v79_v53  ;;  %v3955_v53 = vld [vmem:[%s5317_s8] ss:$0 sm:$0xff] }
 0x730   :  { %3179 = vadd.xlane.f32.xlu0 %v3178_v63 }
 0x7a3   :  { %v3162_v0 = vpop.xlane.xlu1 %3161 }
 0x7a4   :  { %v3183_v1 = vmul.f32 0.03125, %v3162_v0 }
 0x7a5   :  { %v3159_v2 = vpop.xlane.xlu0 %3158 }
 0x7a6   :  { %v5047_v3 = vsub.f32 %v3150_v27, %v3183_v1  ;;  %v3182_v5 = vmul.f32 0.03125, %v3159_v2 }
 0x7a8   :  { %v5049_v7 = vsub.f32 %v3149_v33, %v3182_v5  ;;  %v3199_v8 = vmul.f32 %v5047_v3, %v5047_v3  ;;  %v3953_v5 = vld [vmem:[%s5315_s5] ss:$0 sm:$0xff] }
 0x7aa   :  { %v3209_v9 = vsel %vm97_vm0, %v3199_v8, 0.0  ;;  %v3198_v10 = vmul.f32 %v5049_v7, %v5049_v7 }
 0x7ab   :  { %3210 = vadd.xlane.f32.xlu0 %v3209_v9 }
 0x7ac   :  { %v3206_v11 = vsel %vm97_vm0, %v3198_v10, 0.0 }
 0x7ad   :  { %v3165_v13 = vpop.xlane.xlu0 %3164  ;;  %3207 = vadd.xlane.f32.xlu1 %v3206_v11 }
 0x7ae   :  { %v3184_v14 = vmul.f32 0.03125, %v3165_v13 }
 0x7b0   :  { %v5057_v15 = vsub.f32 %v3151_v22, %v3184_v14 }
 0x7b1   :  { %v3168_v17 = vpop.xlane.xlu0 %3167  ;;  %v3171_v18 = vpop.xlane.xlu1 %3170 }
 0x7b2   :  { %v3185_v21 = vmul.f32 0.03125, %v3168_v17  ;;  %v3186_v23 = vmul.f32 0.03125, %v3171_v18  ;;  %v3200_v25 = vmul.f32 %v5057_v15, %v5057_v15 }
 0x7b4   :  { %v5061_v27 = vsub.f32 %v3152_v19, %v3185_v21  ;;  %v5063_v30 = vsub.f32 %v3153_v57, %v3186_v23  ;;  %v3212_v31 = vsel %vm97_vm0, %v3200_v25, 0.0  ;;  %v73_v19 = vld [vmem:[%s5313_s7 + $0x18] sm:$0xff]  ;;  %v3954_v25 = vld [vmem:[%s5316_s6] ss:$0 sm:$0xff] }
 0x7b5   :  { %v3174_v32 = vpop.xlane.xlu0 %3173  ;;  %3213 = vadd.xlane.f32.xlu1 %v3212_v31  ;;  %v3177_v33 = vpop.xlane.xlu1 %3176  ;;  %4318 = vmatprep.subr.mxu1 %v73_v19 }
 0x7b6   :  { %v3187_v34 = vmul.f32 0.03125, %v3174_v32  ;;  %v3188_v35 = vmul.f32 0.03125, %v3177_v33  ;;  %v3201_v29 = vmul.f32 %v5061_v27, %v5061_v27  ;;  %v3202_v36 = vmul.f32 %v5063_v30, %v5063_v30  ;;  %4319 = vmatpush3.msra.mxu1 %v73_v19 }
 0x7b7   :  { %4320 = vmatprep.subr.mxu1 %v72_v46 }
 0x7b8   :  { %v5070_v28 = vsub.f32 %v3154_v54, %v3187_v34  ;;  %v5072_v37 = vsub.f32 %v3155_v56, %v3188_v35  ;;  %v3215_v38 = vsel %vm97_vm0, %v3201_v29, 0.0  ;;  %v3218_v39 = vsel %vm97_vm0, %v3202_v36, 0.0  ;;  %4321 = vmatpush3.msra.mxu1 %v72_v46 }
 0x7b9   :  { %3216 = vadd.xlane.f32.xlu0 %v3215_v38  ;;  %v3180_v40 = vpop.xlane.xlu0 %3179  ;;  %3219 = vadd.xlane.f32.xlu1 %v3218_v39 }
 0x7ba   :  { %v3189_v41 = vmul.f32 0.03125, %v3180_v40  ;;  %v3203_v42 = vmul.f32 %v5070_v28, %v5070_v28  ;;  %v3204_v43 = vmul.f32 %v5072_v37, %v5072_v37  ;;  %4322 = vmatprep.subr.mxu1 %v71_v26 }
 0x7bb   :  { %4323 = vmatpush3.msra.mxu1 %v71_v26 }
 0x7bc   :  { %v5080_v16 = vsub.f32 %v3156_v62, %v3189_v41  ;;  %v3221_v20 = vsel %vm97_vm0, %v3203_v42, 0.0  ;;  %v3224_v22 = vsel %vm97_vm0, %v3204_v43, 0.0  ;;  %4324 = vmatprep.subr.mxu1 %v70_v47 }
 0x7bd   :  { %3222 = vadd.xlane.f32.xlu0 %v3221_v20  ;;  %3225 = vadd.xlane.f32.xlu1 %v3224_v22 }
 0x7be   :  { %v3205_v44 = vmul.f32 %v5080_v16, %v5080_v16  ;;  %4325 = vmatpush3.msra.mxu1 %v70_v47 }
 0x7bf   :  { %4366 = vmatprep.subr.mxu1 %v4488_v12 }
 0x7c0   :  { %v3227_v45 = vsel %vm97_vm0, %v3205_v44, 0.0 }
 0x7c1   :  { %3228 = vadd.xlane.f32.xlu0 %v3227_v45 }
 0x834   :  { %v3211_v55 = vpop.xlane.xlu0 %3210 }
 0x835   :  { %v3231_v57 = vmul.f32 0.03125, %v3211_v55 }
 0x836   :  { %v3208_v59 = vpop.xlane.xlu1 %3207 }
 0x837   :  { %v3239_v60 = vadd.f32 1e-05, %v3231_v57  ;;  %v3230_v48 = vmul.f32 0.03125, %v3208_v59 }
 0x839   :  { %4448 = vrsqrt.f32 %v3239_v60  ;;  %v3238_v50 = vadd.f32 1e-05, %v3230_v48 }
 0x83b   :  { %4450 = vrsqrt.f32 %v3238_v50 }
 0x83e   :  { %v3214_v52 = vpop.xlane.xlu1 %3213 }
 0x83f   :  { %v3232_v54 = vmul.f32 0.03125, %v3214_v52 }
 0x841   :  { %v3240_v4 = vadd.f32 1e-05, %v3232_v54 }
 0x842   :  { %v3217_v56 = vpop.xlane.xlu0 %3216  ;;  %v3220_v6 = vpop.xlane.xlu1 %3219 }
 0x843   :  { %4452 = vrsqrt.f32 %v3240_v4  ;;  %v3233_v61 = vmul.f32 0.03125, %v3217_v56  ;;  %v3234_v58 = vmul.f32 0.03125, %v3220_v6 }
 0x845   :  { %v3241_v62 = vadd.f32 1e-05, %v3233_v61  ;;  %v3242_v63 = vadd.f32 1e-05, %v3234_v58 }
 0x846   :  { %v4449_v0 = vpop.eup %4448  ;;  %v3223_v1 = vpop.xlane.xlu0 %3222 }
 0x847   :  { %v3226_v2 = vpop.xlane.xlu1 %3225  ;;  %v3255_v8 = vmul.f32 %v4449_v0, %v5047_v3  ;;  %4454 = vrsqrt.f32 %v3241_v62  ;;  %v3235_v9 = vmul.f32 0.03125, %v3223_v1 }
 0x848   :  { %v3236_v10 = vmul.f32 0.03125, %v3226_v2  ;;  %v4451_v11 = vpop.eup %4450  ;;  %4456 = vrsqrt.f32 %v3242_v63 }
 0x849   :  { %v3243_v13 = vadd.f32 1e-05, %v3235_v9  ;;  %v3254_v17 = vmul.f32 %v4451_v11, %v5049_v7  ;;  %v3269_v18 = vmul.f32 %v3953_v5, %v3255_v8 }
 0x84a   :  { %v3244_v14 = vadd.f32 1e-05, %v3236_v10  ;;  %v3229_v21 = vpop.xlane.xlu0 %3228 }
 0x84b   :  { %4458 = vrsqrt.f32 %v3243_v13  ;;  %v3237_v23 = vmul.f32 0.03125, %v3229_v21  ;;  %v3268_v31 = vmul.f32 %v3953_v5, %v3254_v17  ;;  %v5122_v33 = vadd.f32 %v3954_v25, %v3269_v18 }
 0x84c   :  { %4460 = vrsqrt.f32 %v3244_v14  ;;  %v3964_v14 = vld [vmem:[%s5318_s10] ss:$0 sm:$0xff] }
 0x84d   :  { %v3245_v3 = vadd.f32 1e-05, %v3237_v23  ;;  %v5120_v32 = vadd.f32 %v3954_v25, %v3268_v31 }
 0x84f   :  { %4462 = vrsqrt.f32 %v3245_v3  ;;  %4326 = vmatprep.mubr.msk.f32.mxu1 %vm97_vm0, %v5120_v32 }
 0x850   :  { %v4453_v7 = vpop.eup %4452  ;;  %4327 = vmatmul.mubr.msk.f32.vlgmr.msra.gmra.mxu1 %vm97_vm0, %v5122_v33 }
 0x851   :  { %v3256_v34 = vmul.f32 %v4453_v7, %v5057_v15 }
 0x853   :  { %v3270_v35 = vmul.f32 %v3953_v5, %v3256_v34 }
 0x854   :  { %v4455_v29 = vpop.eup %4454 }
 0x855   :  { %v4457_v36 = vpop.eup %4456  ;;  %v5129_v38 = vadd.f32 %v3954_v25, %v3270_v35  ;;  %v3257_v39 = vmul.f32 %v4455_v29, %v5061_v27 }
 0x856   :  { %v3258_v40 = vmul.f32 %v4457_v36, %v5063_v30 }
 0x857   :  { %4329 = vmatprep.mubr.msk.f32.mxu1 %vm97_vm0, %v5129_v38  ;;  %v3271_v41 = vmul.f32 %v3953_v5, %v3257_v39 }
 0x858   :  { %v4459_v42 = vpop.eup %4458  ;;  %v3272_v43 = vmul.f32 %v3953_v5, %v3258_v40 }
 0x859   :  { %v4461_v20 = vpop.eup %4460  ;;  %v5135_v22 = vadd.f32 %v3954_v25, %v3271_v41  ;;  %v3259_v15 = vmul.f32 %v4459_v42, %v5070_v28 }
 0x85a   :  { %v5138_v44 = vadd.f32 %v3954_v25, %v3272_v43  ;;  %v3260_v45 = vmul.f32 %v4461_v20, %v5072_v37 }
 0x85b   :  { %4330 = vmatmul.mubr.msk.f32.gmra.mxu1 %vm97_vm0, %v5135_v22  ;;  %v3273_v27 = vmul.f32 %v3953_v5, %v3259_v15 }
 0x85c   :  { %v4463_v30 = vpop.eup %4462  ;;  %4332 = vmatprep.mubr.msk.f32.mxu1 %vm97_vm0, %v5138_v44  ;;  %v3274_v19 = vmul.f32 %v3953_v5, %v3260_v45 }
 0x85d   :  { %v5145_v46 = vadd.f32 %v3954_v25, %v3273_v27  ;;  %v3261_v26 = vmul.f32 %v4463_v30, %v5080_v16  ;;  %v78_v16 = vld [vmem:[%s5314_s9 + $0x18] sm:$0xff] }
 0x85e   :  { %v5148_v47 = vadd.f32 %v3954_v25, %v3274_v19  ;;  %4346 = vmatprep.subr.mxu0 %v78_v16 }
 0x85f   :  { %4333 = vmatmul.mubr.msk.f32.gmra.mxu1 %vm97_vm0, %v5145_v46  ;;  %v3275_v28 = vmul.f32 %v3953_v5, %v3261_v26  ;;  %4347 = vmatpush3.msra.mxu0 %v78_v16 }
 0x860   :  { %4335 = vmatprep.mubr.msk.f32.mxu1 %vm97_vm0, %v5148_v47  ;;  %4348 = vmatprep.subr.mxu0 %v77_v49 }
 0x861   :  { %v5154_v37 = vadd.f32 %v3954_v25, %v3275_v28  ;;  %4349 = vmatpush3.msra.mxu0 %v77_v49 }
 0x862   :  { %4350 = vmatprep.subr.mxu0 %v76_v24 }
 0x863   :  { %4336 = vmatmul.mubr.msk.f32.gmra.mxu1 %vm97_vm0, %v5154_v37  ;;  %4351 = vmatpush3.msra.mxu0 %v76_v24 }
 0x864   :  { %4374 = vmatprep.mubr.msk.f32.mxu1 %vm4489_vm1, %v4488_v12  ;;  %4352 = vmatprep.subr.mxu0 %v75_v51 }
 0x865   :  { %4353 = vmatpush3.msra.mxu0 %v75_v51 }
 0x910   :  { %v4328_v55 = vpop.f32.mrf.mxu1 }
 0x911   :  { %v3392_v57 = vadd.f32 %v4328_v55, %v3955_v53 }
 0x912   :  { %v3386_v59 = vpop.f32.mrf.mxu1 }
 0x913   :  { %v3387_v60 = vadd.f32 %v3955_v53, %v3386_v59  ;;  %v3426_v50 = vmax.f32 %v3392_v57, 0.0 }
 0x915   :  { %v3425_v48 = vmax.f32 %v3387_v60, 0.0 }
 0x917   :  { %4354 = vmatprep.mubr.msk.f32.mxu0 %vm3439_vm4, %v3425_v48 }
 0x918   :  { %4355 = vmatmul.mubr.msk.f32.vlgmr.msra.gmra.mxu0 %vm3439_vm4, %v3426_v50 }
 0x91b   :  { %v4331_v52 = vpop.f32.mrf.mxu1 }
 0x91c   :  { %v3402_v54 = vadd.f32 %v4331_v52, %v3955_v53 }
 0x91d   :  { %v3396_v4 = vpop.f32.mrf.mxu1 }
 0x91e   :  { %v3397_v56 = vadd.f32 %v3955_v53, %v3396_v4  ;;  %v3428_v58 = vmax.f32 %v3402_v54, 0.0 }
 0x91f   :  { %v4334_v6 = vpop.f32.mrf.mxu1 }
 0x920   :  { %v3427_v61 = vmax.f32 %v3397_v56, 0.0  ;;  %v3412_v62 = vadd.f32 %v4334_v6, %v3955_v53 }
 0x921   :  { %v3406_v63 = vpop.f32.mrf.mxu1 }
 0x922   :  { %v3407_v0 = vadd.f32 %v3955_v53, %v3406_v63  ;;  %4357 = vmatprep.mubr.msk.f32.mxu0 %vm3439_vm4, %v3427_v61  ;;  %v3430_v5 = vmax.f32 %v3412_v62, 0.0 }
 0x923   :  { %v4337_v1 = vpop.f32.mrf.mxu1  ;;  %4358 = vmatmul.mubr.msk.f32.gmra.mxu0 %vm3439_vm4, %v3428_v58 }
 0x924   :  { %v3429_v2 = vmax.f32 %v3407_v0, 0.0  ;;  %v3422_v8 = vadd.f32 %v4337_v1, %v3955_v53 }
 0x925   :  { %v3416_v9 = vpop.f32.mrf.mxu1 }
 0x926   :  { %v3417_v10 = vadd.f32 %v3955_v53, %v3416_v9  ;;  %4360 = vmatprep.mubr.msk.f32.mxu0 %vm3439_vm4, %v3429_v2  ;;  %v3432_v13 = vmax.f32 %v3422_v8, 0.0 }
 0x927   :  { %4361 = vmatmul.mubr.msk.f32.gmra.mxu0 %vm3439_vm4, %v3430_v5 }
 0x928   :  { %v3431_v11 = vmax.f32 %v3417_v10, 0.0 }
 0x92a   :  { %4363 = vmatprep.mubr.msk.f32.mxu0 %vm3439_vm4, %v3431_v11 }
 0x92b   :  { %4364 = vmatmul.mubr.msk.f32.gmra.mxu0 %vm3439_vm4, %v3432_v13 }
 0x9d8   :  { %v4356_v17 = vpop.f32.mrf.mxu0 }
 0x9d9   :  { %v3536_v18 = vadd.f32 %v4356_v17, %v3964_v14 }
 0x9da   :  { %v3530_v21 = vpop.f32.mrf.mxu0 }
 0x9db   :  { %v3531_v23 = vadd.f32 %v3964_v14, %v3530_v21  ;;  %v3570_v25 = vadd.f32 %v3536_v18, %v5122_v33 }
 0x9dd   :  { %v3580_v31 = vsel %vm97_vm0, %v3570_v25, 0.0  ;;  %v3569_v3 = vadd.f32 %v3531_v23, %v5120_v32 }
 0x9de   :  { %3581 = vadd.xlane.f32.xlu0 %v3580_v31 }
 0x9df   :  { %v3577_v7 = vsel %vm97_vm0, %v3569_v3, 0.0 }
 0x9e0   :  { %3578 = vadd.xlane.f32.xlu1 %v3577_v7 }
 0x9e3   :  { %v4359_v34 = vpop.f32.mrf.mxu0 }
 0x9e4   :  { %v3546_v35 = vadd.f32 %v4359_v34, %v3964_v14 }
 0x9e5   :  { %v3540_v29 = vpop.f32.mrf.mxu0 }
 0x9e6   :  { %v3541_v36 = vadd.f32 %v3964_v14, %v3540_v29  ;;  %v3572_v39 = vadd.f32 %v3546_v35, %v5135_v22  ;;  %v89_v35 = vld [vmem:[%s5319_s13 + $0x18] sm:$0xff]  ;;  %v88_v29 = vld [vmem:[%s5319_s13 + $0x10] sm:$0xff] }
 0x9e7   :  { %v4362_v40 = vpop.f32.mrf.mxu0  ;;  %4367 = vmatpush3.msra.mxu1 %v89_v35 }
 0x9e8   :  { %v3556_v41 = vadd.f32 %v4362_v40, %v3964_v14  ;;  %v3586_v42 = vsel %vm97_vm0, %v3572_v39, 0.0  ;;  %v3571_v33 = vadd.f32 %v3541_v36, %v5129_v38  ;;  %4368 = vmatprep.subr.mxu1 %v4488_v12  ;;  %v87_v36 = vld [vmem:[%s5319_s13 + $0x8] sm:$0xff] }
 0x9e9   :  { %3587 = vadd.xlane.f32.xlu0 %v3586_v42  ;;  %v3550_v43 = vpop.f32.mrf.mxu0  ;;  %4369 = vmatpush3.msra.mxu1 %v88_v29 }
 0x9ea   :  { %v3551_v20 = vadd.f32 %v3964_v14, %v3550_v43  ;;  %v3583_v32 = vsel %vm97_vm0, %v3571_v33, 0.0  ;;  %v3574_v15 = vadd.f32 %v3556_v41, %v5145_v46  ;;  %4370 = vmatprep.subr.mxu1 %v4488_v12 }
 0x9eb   :  { %3584 = vadd.xlane.f32.xlu1 %v3583_v32  ;;  %v4365_v45 = vpop.f32.mrf.mxu0  ;;  %4371 = vmatpush3.msra.mxu1 %v87_v36 }
 0x9ec   :  { %v3566_v27 = vadd.f32 %v4365_v45, %v3964_v14  ;;  %v3592_v30 = vsel %vm97_vm0, %v3574_v15, 0.0  ;;  %v3573_v22 = vadd.f32 %v3551_v20, %v5138_v44  ;;  %4372 = vmatprep.subr.mxu1 %v4488_v12 }
 0x9ed   :  { %3593 = vadd.xlane.f32.xlu0 %v3592_v30  ;;  %v3560_v19 = vpop.f32.mrf.mxu0 }
 0x9ee   :  { %v3561_v26 = vadd.f32 %v3964_v14, %v3560_v19  ;;  %v3589_v28 = vsel %vm97_vm0, %v3573_v22, 0.0  ;;  %v3576_v38 = vadd.f32 %v3566_v27, %v5154_v37 }
 0x9ef   :  { %3590 = vadd.xlane.f32.xlu1 %v3589_v28 }
 0x9f0   :  { %v3598_v16 = vsel %vm97_vm0, %v3576_v38, 0.0  ;;  %v3575_v49 = vadd.f32 %v3561_v26, %v5148_v47 }
 0x9f1   :  { %3599 = vadd.xlane.f32.xlu0 %v3598_v16 }
 0x9f2   :  { %v3595_v46 = vsel %vm97_vm0, %v3575_v49, 0.0 }
 0x9f3   :  { %3596 = vadd.xlane.f32.xlu1 %v3595_v46 }
 0xa67   :  { %v3582_v24 = vpop.xlane.xlu0 %3581 }
 0xa68   :  { %v3602_v51 = vmul.f32 0.03125, %v3582_v24 }
 0xa69   :  { %v3579_v53 = vpop.xlane.xlu1 %3578 }
 0xa6a   :  { %v5202_v44 = vsub.f32 %v3570_v25, %v3602_v51  ;;  %v3601_v55 = vmul.f32 0.03125, %v3579_v53  ;;  %v5266_v53 = vld [vmem:[%s5321_s12] ss:$0 sm:$0xff] }
 0xa6c   :  { %v5204_v57 = vsub.f32 %v3569_v3, %v3601_v55  ;;  %v3618_v37 = vmul.f32 %v5202_v44, %v5202_v44 }
 0xa6e   :  { %v3628_v59 = vsel %vm97_vm0, %v3618_v37, 0.0  ;;  %v3617_v47 = vmul.f32 %v5204_v57, %v5204_v57 }
 0xa6f   :  { %3629 = vadd.xlane.f32.xlu0 %v3628_v59 }
 0xa70   :  { %v3625_v60 = vsel %vm97_vm0, %v3617_v47, 0.0 }
 0xa71   :  { %3626 = vadd.xlane.f32.xlu1 %v3625_v60 }
 0xa72   :  { %v3588_v48 = vpop.xlane.xlu0 %3587 }
 0xa73   :  { %v3604_v50 = vmul.f32 0.03125, %v3588_v48 }
 0xa74   :  { %v3585_v52 = vpop.xlane.xlu1 %3584 }
 0xa75   :  { %v5212_v54 = vsub.f32 %v3572_v39, %v3604_v50  ;;  %v3603_v4 = vmul.f32 0.03125, %v3585_v52  ;;  %v86_v39 = vld [vmem:[%s5319_s13] sm:$0xff] }
 0xa76   :  { %v3594_v56 = vpop.xlane.xlu0 %3593  ;;  %4373 = vmatpush3.msra.mxu1 %v86_v39 }
 0xa77   :  { %v5214_v6 = vsub.f32 %v3571_v33, %v3603_v4  ;;  %v3606_v61 = vmul.f32 0.03125, %v3594_v56  ;;  %v3620_v58 = vmul.f32 %v5212_v54, %v5212_v54 }
 0xa78   :  { %v3591_v62 = vpop.xlane.xlu1 %3590 }
 0xa79   :  { %v5218_v63 = vsub.f32 %v3574_v15, %v3606_v61  ;;  %v3605_v0 = vmul.f32 0.03125, %v3591_v62  ;;  %v3634_v1 = vsel %vm97_vm0, %v3620_v58, 0.0  ;;  %v3619_v2 = vmul.f32 %v5214_v6, %v5214_v6 }
 0xa7a   :  { %3635 = vadd.xlane.f32.xlu0 %v3634_v1  ;;  %v3600_v5 = vpop.xlane.xlu0 %3599 }
 0xa7b   :  { %v5223_v8 = vsub.f32 %v3573_v22, %v3605_v0  ;;  %v3608_v9 = vmul.f32 0.03125, %v3600_v5  ;;  %v3631_v10 = vsel %vm97_vm0, %v3619_v2, 0.0  ;;  %v3622_v11 = vmul.f32 %v5218_v63, %v5218_v63 }
 0xa7c   :  { %3632 = vadd.xlane.f32.xlu1 %v3631_v10  ;;  %v3597_v13 = vpop.xlane.xlu1 %3596 }
 0xa7d   :  { %v5228_v14 = vsub.f32 %v3576_v38, %v3608_v9  ;;  %v3607_v17 = vmul.f32 0.03125, %v3597_v13  ;;  %v3640_v18 = vsel %vm97_vm0, %v3622_v11, 0.0  ;;  %v3621_v21 = vmul.f32 %v5223_v8, %v5223_v8  ;;  %v5260_v38 = vld [vmem:[%s5320_s11] ss:$0 sm:$0xff] }
 0xa7e   :  { %3641 = vadd.xlane.f32.xlu0 %v3640_v18 }
 0xa7f   :  { %v5233_v23 = vsub.f32 %v3575_v49, %v3607_v17  ;;  %v3637_v25 = vsel %vm97_vm0, %v3621_v21, 0.0  ;;  %v3624_v31 = vmul.f32 %v5228_v14, %v5228_v14 }
 0xa80   :  { %3638 = vadd.xlane.f32.xlu1 %v3637_v25 }
 0xa81   :  { %v3646_v3 = vsel %vm97_vm0, %v3624_v31, 0.0  ;;  %v3623_v7 = vmul.f32 %v5233_v23, %v5233_v23 }
 0xa82   :  { %3647 = vadd.xlane.f32.xlu0 %v3646_v3 }
 0xa83   :  { %v3643_v34 = vsel %vm97_vm0, %v3623_v7, 0.0 }
 0xa84   :  { %3644 = vadd.xlane.f32.xlu1 %v3643_v34 }
 0xaf8   :  { %v3630_v40 = vpop.xlane.xlu0 %3629 }
 0xaf9   :  { %v3650_v41 = vmul.f32 0.03125, %v3630_v40 }
 0xafa   :  { %v3627_v42 = vpop.xlane.xlu1 %3626 }
 0xafb   :  { %v3658_v33 = vadd.f32 1e-05, %v3650_v41  ;;  %v3649_v43 = vmul.f32 0.03125, %v3627_v42 }
 0xafd   :  { %4464 = vrsqrt.f32 %v3658_v33  ;;  %v3657_v20 = vadd.f32 1e-05, %v3649_v43 }
 0xaff   :  { %4466 = vrsqrt.f32 %v3657_v20 }
 0xb03   :  { %v3636_v32 = vpop.xlane.xlu0 %3635 }
 0xb04   :  { %v3652_v15 = vmul.f32 0.03125, %v3636_v32 }
 0xb05   :  { %v3633_v45 = vpop.xlane.xlu1 %3632 }
 0xb06   :  { %v3660_v27 = vadd.f32 1e-05, %v3652_v15  ;;  %v3651_v30 = vmul.f32 0.03125, %v3633_v45 }
 0xb07   :  { %v3642_v22 = vpop.xlane.xlu0 %3641 }
 0xb08   :  { %4468 = vrsqrt.f32 %v3660_v27  ;;  %v3659_v19 = vadd.f32 1e-05, %v3651_v30  ;;  %v3654_v26 = vmul.f32 0.03125, %v3642_v22 }
 0xb09   :  { %v3639_v28 = vpop.xlane.xlu1 %3638 }
 0xb0a   :  { %v4465_v12 = vpop.eup %4464  ;;  %4470 = vrsqrt.f32 %v3659_v19  ;;  %v3662_v16 = vadd.f32 1e-05, %v3654_v26  ;;  %v3653_v49 = vmul.f32 0.03125, %v3639_v28 }
 0xb0b   :  { %v3674_v46 = vmul.f32 %v4465_v12, %v5202_v44  ;;  %v3648_v24 = vpop.xlane.xlu0 %3647 }
 0xb0c   :  { %v4467_v51 = vpop.eup %4466  ;;  %4472 = vrsqrt.f32 %v3662_v16  ;;  %v3661_v55 = vadd.f32 1e-05, %v3653_v49  ;;  %v3656_v37 = vmul.f32 0.03125, %v3648_v24 }
 0xb0d   :  { %v3688_v59 = vmul.f32 %v5260_v38, %v3674_v46  ;;  %v3673_v47 = vmul.f32 %v4467_v51, %v5204_v57  ;;  %v3645_v60 = vpop.xlane.xlu1 %3644 }
 0xb0e   :  { %4474 = vrsqrt.f32 %v3661_v55  ;;  %v3664_v48 = vadd.f32 1e-05, %v3656_v37  ;;  %v3655_v50 = vmul.f32 0.03125, %v3645_v60 }
 0xb0f   :  { %v3702_v44 = vadd.f32 %v5266_v53, %v3688_v59  ;;  %v3687_v52 = vmul.f32 %v5260_v38, %v3673_v47 }
 0xb10   :  { %4476 = vrsqrt.f32 %v3664_v48  ;;  %v3663_v4 = vadd.f32 1e-05, %v3655_v50 }
 0xb11   :  { %v3716_v56 = vsel %vm97_vm0, %v3702_v44, 0.0  ;;  %v3701_v61 = vadd.f32 %v5266_v53, %v3687_v52 }
 0xb12   :  { %v3717_v58 = vrot.slane %v3716_v56, 4  ;;  %4478 = vrsqrt.f32 %v3663_v4 }
 0xb13   :  { %v3709_v62 = vsel %vm97_vm0, %v3701_v61, 0.0 }
 0xb14   :  { %v3710_v0 = vrot.slane %v3709_v62, 4  ;;  %v3718_v1 = vadd.f32 %v3717_v58, %v3716_v56 }
 0xb15   :  { %v4469_v57 = vpop.eup %4468 }
 0xb16   :  { %v3711_v2 = vadd.f32 %v3710_v0, %v3709_v62  ;;  %v3676_v5 = vmul.f32 %v4469_v57, %v5212_v54  ;;  %v3719_v18 = vrot.slane %v3718_v1, 2 }
 0xb17   :  { %v4471_v9 = vpop.eup %4470 }
 0xb18   :  { %v3712_v10 = vrot.slane %v3711_v2, 2  ;;  %v3690_v11 = vmul.f32 %v5260_v38, %v3676_v5  ;;  %v3675_v13 = vmul.f32 %v4471_v9, %v5214_v6  ;;  %v3720_v39 = vadd.f32 %v3719_v18, %v3718_v1 }
 0xb19   :  { %v4473_v17 = vpop.eup %4472 }
 0xb1a   :  { %v3704_v21 = vadd.f32 %v5266_v53, %v3690_v11  ;;  %v3689_v25 = vmul.f32 %v5260_v38, %v3675_v13  ;;  %v3678_v3 = vmul.f32 %v4473_v17, %v5218_v63  ;;  %v3713_v7 = vadd.f32 %v3712_v10, %v3711_v2 }
 0xb1b   :  { %v4475_v31 = vpop.eup %4474  ;;  %v3721_v19 = vrot.slane %v3720_v39, 1 }
 0xb1c   :  { %v3730_v34 = vsel %vm97_vm0, %v3704_v21, 0.0  ;;  %v3703_v54 = vadd.f32 %v5266_v53, %v3689_v25  ;;  %v3692_v36 = vmul.f32 %v5260_v38, %v3678_v3  ;;  %v3677_v6 = vmul.f32 %v4475_v31, %v5223_v8 }
 0xb1d   :  { %v4477_v35 = vpop.eup %4476  ;;  %v3731_v29 = vrot.slane %v3730_v34, 4  ;;  %v3714_v32 = vrot.slane %v3713_v7, 1  ;;  %v3722_v47 = vadd.f32 %v3721_v19, %v3720_v39 }
 0xb1e   :  { %v3723_v40 = vsel %vm97_vm0, %v3703_v54, 0.0  ;;  %v3680_v41 = vmul.f32 %v4477_v35, %v5228_v14  ;;  %v3706_v63 = vadd.f32 %v5266_v53, %v3692_v36  ;;  %v3691_v20 = vmul.f32 %v5260_v38, %v3677_v6 }
 0xb1f   :  { %v4479_v42 = vpop.eup %4478  ;;  %v3732_v33 = vadd.f32 %v3731_v29, %v3730_v34  ;;  %v3724_v43 = vrot.slane %v3723_v40, 4  ;;  %v3715_v55 = vadd.f32 %v3714_v32, %v3713_v7  ;;  %v3767_v2 = vmul.f32 0.125, %v3722_v47 }
 0xb20   :  { %v3694_v15 = vmul.f32 %v5260_v38, %v3680_v41  ;;  %v3679_v45 = vmul.f32 %v4479_v42, %v5233_v23  ;;  %v3744_v8 = vsel %vm97_vm0, %v3706_v63, 0.0  ;;  %v3705_v22 = vadd.f32 %v5266_v53, %v3691_v20  ;;  %v3975_v63 = vld [vmem:[%s5322_s14] ss:$0 sm:$0xff] }
 0xb21   :  { %v3733_v27 = vrot.slane %v3732_v33, 2  ;;  %v3725_v30 = vadd.f32 %v3724_v43, %v3723_v40  ;;  %v3745_v14 = vrot.slane %v3744_v8, 4  ;;  %v3766_v0 = vmul.f32 0.125, %v3715_v55 }
 0xb22   :  { %v3708_v26 = vadd.f32 %v5266_v53, %v3694_v15  ;;  %v3693_v28 = vmul.f32 %v5260_v38, %v3679_v45  ;;  %v3737_v16 = vsel %vm97_vm0, %v3705_v22, 0.0 }
 0xb23   :  { %v3726_v12 = vrot.slane %v3725_v30, 2  ;;  %v3734_v49 = vadd.f32 %v3733_v27, %v3732_v33  ;;  %v3738_v46 = vrot.slane %v3737_v16, 4  ;;  %v3746_v23 = vadd.f32 %v3745_v14, %v3744_v8 }
 0xb24   :  { %v3707_v24 = vadd.f32 %v5266_v53, %v3693_v28  ;;  %v3758_v51 = vsel %vm97_vm0, %v3708_v26, 0.0  ;;  %v3789_v21 = vsel %vm3788_vm5, %v3767_v2, %v3766_v0 }
 0xb25   :  { %v3727_v37 = vadd.f32 %v3726_v12, %v3725_v30  ;;  %v3759_v59 = vrot.slane %v3758_v51, 4  ;;  %v3739_v60 = vadd.f32 %v3738_v46, %v3737_v16  ;;  %v3747_v48 = vrot.slane %v3746_v23, 2 }
 0xb26   :  { %v3751_v50 = vsel %vm97_vm0, %v3707_v24, 0.0  ;;  %v3735_v38 = vrot.slane %v3734_v49, 1 }
 0xb27   :  { %v3728_v44 = vrot.slane %v3727_v37, 1  ;;  %v3752_v52 = vrot.slane %v3751_v50, 4  ;;  %v3760_v4 = vadd.f32 %v3759_v59, %v3758_v51  ;;  %v3740_v56 = vrot.slane %v3739_v60, 2 }
 0xb28   :  { %v3748_v61 = vadd.f32 %v3747_v48, %v3746_v23  ;;  %v3736_v5 = vadd.f32 %v3735_v38, %v3734_v49 }
 0xb29   :  { %v3729_v58 = vadd.f32 %v3728_v44, %v3727_v37  ;;  %v3753_v53 = vadd.f32 %v3752_v52, %v3751_v50  ;;  %v3761_v62 = vrot.slane %v3760_v4, 2  ;;  %v3741_v57 = vadd.f32 %v3740_v56, %v3739_v60 }
 0xb2a   :  { %v3749_v1 = vrot.slane %v3748_v61, 1  ;;  %v3769_v34 = vmul.f32 0.125, %v3736_v5 }
 0xb2b   :  { %v3754_v9 = vrot.slane %v3753_v53, 2  ;;  %v3762_v10 = vadd.f32 %v3761_v62, %v3760_v4  ;;  %v3768_v11 = vmul.f32 0.125, %v3729_v58  ;;  %v3742_v13 = vrot.slane %v3741_v57, 1 }
 0xb2c   :  { %v3750_v31 = vadd.f32 %v3749_v1, %v3748_v61 }
 0xb2d   :  { %v3755_v17 = vadd.f32 %v3754_v9, %v3753_v53  ;;  %v3763_v18 = vrot.slane %v3762_v10, 1  ;;  %v3743_v25 = vadd.f32 %v3742_v13, %v3741_v57  ;;  %v3791_v3 = vsel %vm3790_vm6, %v3768_v11, %v3789_v21 }
 0xb2e   :  { %v3793_v36 = vsel %vm3792_vm7, %v3769_v34, %v3791_v3  ;;  %v3771_v6 = vmul.f32 0.125, %v3750_v31 }
 0xb2f   :  { %v3756_v7 = vrot.slane %v3755_v17, 1  ;;  %v3764_v54 = vadd.f32 %v3763_v18, %v3762_v10  ;;  %v3770_v35 = vmul.f32 0.125, %v3743_v25 }
 0xb31   :  { %v3757_v29 = vadd.f32 %v3756_v7, %v3755_v17  ;;  %v3795_v39 = vsel %vm3794_vm8, %v3770_v35, %v3793_v36  ;;  %v3773_v41 = vmul.f32 0.125, %v3764_v54 }
 0xb32   :  { %v3797_v42 = vsel %vm3796_vm9, %v3771_v6, %v3795_v39 }
 0xb33   :  { %v3772_v40 = vmul.f32 0.125, %v3757_v29 }
 0xb35   :  { %v3799_v33 = vsel %vm3798_vm10, %v3772_v40, %v3797_v42 }
 0xb36   :  { %v3801_v43 = vsel %vm3800_vm11, %v3773_v41, %v3799_v33 }
 0xb37   :  { %4375 = vmatmul.mubr.msk.f32.vlgmr.msra.gmra.mxu1 %vm97_vm0, %v3801_v43 }
 0xbf7   :  { %v3870_v20 = vpop.f32.mrf.mxu1 }
 0xbf8   :  { %v3871_v32 = vadd.f32 %v3975_v63, %v3870_v20 }
 0xbf9   :  { %v4376_v15 = vpop.f32.mrf.mxu1 }
 0xbfa   :  { %3874 = vst.msk [vmem:[%s5323_s15] sm:$0xff] %vm97_vm0, %v3871_v32 }

// kernel: protomaml_episode.3
= control target key start
LH: loop header
LB: loop body
LE: loop exit
PB: predicated region body
PF: predicated region fallthrough
CT: control target
= control target key end

     0   :  { %vm103_vm0 = vcmask 261120   ;;  %v4597_v12 = vmov 0.0   ;;  %vm4598_vm1 = vmmov 0   ;;  %s4599_s23 = smov 96   ;;  %vm236_vm2 = vcmask 130048   ;;  %s4601_s24 = smov 80   ;;  %s5448_s1 = inlined_call_operand.vmem [shape: f32[32,96], index: 1, kind: input, shape index: {}]   ;;  %s5449_s0 = inlined_call_operand.vmem [shape: f32[8,8,32], index: 0, kind: input, shape index: {}]   ;;  %s5450_s2 = inlined_call_operand.vmem [shape: f32[1,96], index: 2, kind: input, shape index: {}]   ;;  %s5451_s3 = inlined_call_operand.vmem [shape: f32[32,32], index: 3, kind: input, shape index: {}]   ;;  %s5452_s4 = inlined_call_operand.vmem [shape: f32[1,32], index: 4, kind: input, shape index: {}]   ;;  %s5453_s7 = inlined_call_operand.vmem [shape: f32[32,64], index: 7, kind: input, shape index: {}]   ;;  %s5454_s9 = inlined_call_operand.vmem [shape: f32[64,32], index: 9, kind: input, shape index: {}]   ;;  %s5455_s5 = inlined_call_operand.vmem [shape: f32[1,32], index: 5, kind: input, shape index: {}]   ;;  %s5456_s6 = inlined_call_operand.vmem [shape: f32[1,32], index: 6, kind: input, shape index: {}]   ;;  %s5457_s8 = inlined_call_operand.vmem [shape: f32[1,64], index: 8, kind: input, shape index: {}]   ;;  %s5458_s10 = inlined_call_operand.vmem [shape: f32[1,32], index: 10, kind: input, shape index: {}]   ;;  %s5459_s13 = inlined_call_operand.vmem [shape: f32[32,32], index: 13, kind: input, shape index: {}]   ;;  %s5460_s15 = inlined_call_operand.vmem [shape: f32[32,2], index: 15, kind: input, shape index: {}]   ;;  %s5461_s11 = inlined_call_operand.vmem [shape: f32[1,32], index: 11, kind: input, shape index: {}]   ;;  %s5462_s12 = inlined_call_operand.vmem [shape: f32[1,32], index: 12, kind: input, shape index: {}]   ;;  %s5463_s14 = inlined_call_operand.vmem [shape: f32[1,32], index: 14, kind: input, shape index: {}]   ;;  %s5464_s16 = inlined_call_operand.vmem [shape: f32[1,2], index: 16, kind: input, shape index: {}]   ;;  %s5465_s17 = inlined_call_operand.vmem [shape: f32[8,2], index: 17, kind: output, shape index: {}]  }
   0x1   :  { %5468 = sst [smem:[#allocation2_spill]] %s5448_s1  ;;  %4224 = vmatprep.subr.mxu1 %v4597_v12  ;;  %4226 = vmatprep.mubr.msk.f32.mxu1 %vm4598_vm1, %v4597_v12  ;;  %v3970_v14 = vld [vmem:[%s5450_s2] ss:$0 sm:$0xff]  ;;  %vm858_vm3 = vcmask 64512   ;;  %s4600_s2 = smov 64   ;;  %vm3445_vm4 = vcmask 523264  }
   0x2   :  { %5469 = sst [smem:[#allocation3_spill]] %s5449_s0  ;;  %s4602_s25 = smov 112   ;;  %vm3794_vm5 = vcmask 1041409   ;;  %vm3796_vm6 = vcmask 1042434   ;;  %vm3798_vm7 = vcmask 1043459   ;;  %vm3800_vm8 = vcmask 1044484  }
   0x3   :  { %s5470_s26 = sld [smem:[#allocation2_spill]]  ;;  %s4603_s27 = smov 48   ;;  %vm3802_vm9 = vcmask 1045509   ;;  %vm3804_vm10 = vcmask 1046534   ;;  %vm3806_vm11 = vcmask 1047559   ;;  %vm3964_vm12 = vcmask 15360  }
   0x4   :  { %s5471_s30 = sld [smem:[#allocation3_spill]] }
   0x9   :  { %v67_v0 = vld [vmem:[%s5470_s26 + $0x18] sm:$0xff]  ;;  %v66_v1 = vld [vmem:[%s5470_s26 + $0x10] sm:$0xff]  ;;  %v65_v3 = vld [vmem:[%s5470_s26 + $0x8] sm:$0xff] }
   0xa   :  { %4204 = vmatprep.subr.mxu0 %v67_v0  ;;  %v56_v2 = vld [vmem:[%s5471_s30] sm:$0xff]  ;;  %v57_v5 = vld [vmem:[%s5471_s30 + $0x8] sm:$0xff]  ;;  %v58_v6 = vld [vmem:[%s5471_s30 + $0x10] sm:$0xff] }
   0xb   :  { %4205 = vmatpush3.msra.mxu0 %v67_v0  ;;  %4212 = vmatprep.mubr.msk.f32.mxu0 %vm103_vm0, %v56_v2  ;;  %v64_v4 = vld [vmem:[%s5470_s26] sm:$0xff]  ;;  %v59_v7 = vld [vmem:[%s5471_s30 + $0x18] sm:$0xff]  ;;  %v61_v9 = vld [vmem:[%s5471_s30 + $0x28] sm:$0xff] }
   0xc   :  { %4206 = vmatprep.subr.mxu0 %v66_v1  ;;  %v60_v8 = vld [vmem:[%s5471_s30 + $0x20] sm:$0xff]  ;;  %v62_v10 = vld [vmem:[%s5471_s30 + $0x30] sm:$0xff]  ;;  %v63_v11 = vld [vmem:[%s5471_s30 + $0x38] sm:$0xff] }
   0xd   :  { %4207 = vmatpush3.msra.mxu0 %v66_v1 }
   0xe   :  { %4208 = vmatprep.subr.mxu0 %v65_v3 }
   0xf   :  { %4209 = vmatpush3.msra.mxu0 %v65_v3 }
  0x10   :  { %4210 = vmatprep.subr.mxu0 %v64_v4 }
  0x11   :  { %4211 = vmatpush3.msra.mxu0 %v64_v4 }
  0x12   :  { %4213 = vmatmul.mubr.msk.f32.vlgmr.msra.gmra.mxu0 %vm103_vm0, %v57_v5  ;;  %4249 = vmatprep.subr.mxu0 %v4597_v12 }
  0x13   :  { %4215 = vmatprep.mubr.msk.f32.mxu0 %vm103_vm0, %v58_v6 }
  0x16   :  { %4216 = vmatmul.mubr.msk.f32.gmra.mxu0 %vm103_vm0, %v59_v7 }
  0x17   :  { %4218 = vmatprep.mubr.msk.f32.mxu0 %vm103_vm0, %v60_v8 }
  0x1a   :  { %4219 = vmatmul.mubr.msk.f32.gmra.mxu0 %vm103_vm0, %v61_v9 }
  0x1b   :  { %4221 = vmatprep.mubr.msk.f32.mxu0 %vm103_vm0, %v62_v10 }
  0x1e   :  { %4222 = vmatmul.mubr.msk.f32.gmra.mxu0 %vm103_vm0, %v63_v11 }
  0x1f   :  { %4251 = vmatprep.mubr.msk.f32.mxu0 %vm4598_vm1, %v4597_v12 }
  0xd2   :  { %v4214_v13 = vpop.f32.mrf.mxu0 }
  0xd3   :  { %v4750_v19 = vadd.f32 %v4214_v13, %v3970_v14 }
  0xd4   :  { %v194_v15 = vpop.f32.mrf.mxu0 }
  0xd5   :  { %v4747_v16 = vadd.f32 %v3970_v14, %v194_v15 }
  0xd6   :  { %v4217_v17 = vpop.f32.mrf.mxu0 }
  0xd7   :  { %234 = vrot.lane.b32.xlu0 %v4747_v16, %s4599_s23  ;;  %v4754_v22 = vadd.f32 %v4217_v17, %v3970_v14 }
  0xd8   :  { %v204_v18 = vpop.f32.mrf.mxu0 }
  0xd9   :  { %v4752_v20 = vadd.f32 %v3970_v14, %v204_v18 }
  0xda   :  { %v4220_v21 = vpop.f32.mrf.mxu0 }
  0xdb   :  { %389 = vrot.lane.b32.xlu1 %v4752_v20, %s4599_s23  ;;  %312 = vrot.lane.b32.xlu0 %v4750_v19, %s4599_s23  ;;  %v4761_v26 = vadd.f32 %v4220_v21, %v3970_v14 }
  0xdc   :  { %v214_v23 = vpop.f32.mrf.mxu0 }
  0xdd   :  { %v4758_v24 = vadd.f32 %v3970_v14, %v214_v23 }
  0xde   :  { %v4223_v25 = vpop.f32.mrf.mxu0 }
  0xdf   :  { %466 = vrot.lane.b32.xlu1 %v4754_v22, %s4599_s23  ;;  %543 = vrot.lane.b32.xlu0 %v4758_v24, %s4599_s23  ;;  %v4767_v29 = vadd.f32 %v4223_v25, %v3970_v14 }
  0xe0   :  { %v224_v27 = vpop.f32.mrf.mxu0 }
  0xe1   :  { %v4764_v28 = vadd.f32 %v3970_v14, %v224_v27 }
  0xe3   :  { %620 = vrot.lane.b32.xlu1 %v4761_v26, %s4599_s23  ;;  %697 = vrot.lane.b32.xlu0 %v4764_v28, %s4599_s23 }
  0xe7   :  { %774 = vrot.lane.b32.xlu1 %v4767_v29, %s4599_s23 }
 0x149   :  { %v235_v30 = vpop.permute.xlu0 %234 }
 0x14a   :  { %4225 = vmatpush3.xpose.msk.msra.mxu1 %vm236_vm2, %v235_v30 }
 0x14b   :  { %4229 = vmatprep.subr.mxu1 %v4597_v12 }
 0x14d   :  { %v390_v31 = vpop.permute.xlu1 %389  ;;  %4227 = vmatmul.mubr.msk.f32.vlgmr.msra.gmra.mxu1 %vm236_vm2, %v4747_v16  ;;  %v313_v32 = vpop.permute.xlu0 %312 }
 0x14e   :  { %4230 = vmatpush3.xpose.msk.msra.mxu1 %vm236_vm2, %v313_v32  ;;  %4231 = vmatprep.mubr.msk.f32.mxu1 %vm4598_vm1, %v4597_v12 }
 0x14f   :  { %4234 = vmatprep.subr.mxu1 %v4597_v12 }
 0x151   :  { %v467_v33 = vpop.permute.xlu1 %466  ;;  %4232 = vmatmul.mubr.msk.f32.vlgmr.msra.gmra.mxu1 %vm236_vm2, %v4750_v19  ;;  %v544_v35 = vpop.permute.xlu0 %543 }
 0x152   :  { %4235 = vmatpush3.xpose.msk.msra.mxu1 %vm236_vm2, %v390_v31  ;;  %4236 = vmatprep.mubr.msk.f32.mxu1 %vm4598_vm1, %v4597_v12 }
 0x153   :  { %4239 = vmatprep.subr.mxu1 %v4597_v12 }
 0x155   :  { %v621_v34 = vpop.permute.xlu1 %620  ;;  %4237 = vmatmul.mubr.msk.f32.vlgmr.msra.gmra.mxu1 %vm236_vm2, %v4752_v20  ;;  %v698_v37 = vpop.permute.xlu0 %697 }
 0x156   :  { %4240 = vmatpush3.xpose.msk.msra.mxu1 %vm236_vm2, %v467_v33  ;;  %4250 = vmatpush3.xpose.msk.msra.mxu0 %vm236_vm2, %v621_v34 }
 0x157   :  { %4241 = vmatprep.mubr.msk.f32.mxu1 %vm4598_vm1, %v4597_v12  ;;  %4259 = vmatprep.subr.mxu0 %v4597_v12 }
 0x158   :  { %4244 = vmatprep.subr.mxu1 %v4597_v12 }
 0x159   :  { %4252 = vmatmul.mubr.msk.f32.vlgmr.msra.gmra.mxu0 %vm236_vm2, %v4761_v26  ;;  %v775_v36 = vpop.permute.xlu1 %774  ;;  %4242 = vmatmul.mubr.msk.f32.vlgmr.msra.gmra.mxu1 %vm236_vm2, %v4754_v22 }
 0x15a   :  { %4245 = vmatpush3.xpose.msk.msra.mxu1 %vm236_vm2, %v544_v35  ;;  %4260 = vmatpush3.xpose.msk.msra.mxu0 %vm236_vm2, %v775_v36 }
 0x15b   :  { %4246 = vmatprep.mubr.msk.f32.mxu1 %vm4598_vm1, %v4597_v12  ;;  %4261 = vmatprep.mubr.msk.f32.mxu0 %vm4598_vm1, %v4597_v12 }
 0x15c   :  { %4254 = vmatprep.subr.mxu1 %v4597_v12  ;;  %4269 = vmatprep.subr.mxu0 %v4597_v12 }
 0x15d   :  { %4247 = vmatmul.mubr.msk.f32.vlgmr.msra.gmra.mxu1 %vm236_vm2, %v4758_v24  ;;  %4262 = vmatmul.mubr.msk.f32.vlgmr.msra.gmra.mxu0 %vm236_vm2, %v4767_v29 }
 0x15e   :  { %4255 = vmatpush3.xpose.msk.msra.mxu1 %vm236_vm2, %v698_v37  ;;  %4256 = vmatprep.mubr.msk.f32.mxu1 %vm4598_vm1, %v4597_v12 }
 0x15f   :  { %4264 = vmatprep.subr.mxu1 %v4597_v12  ;;  %4271 = vmatprep.mubr.msk.f32.mxu0 %vm4598_vm1, %v4597_v12 }
 0x161   :  { %4257 = vmatmul.mubr.msk.f32.vlgmr.msra.gmra.mxu1 %vm236_vm2, %v4764_v28 }
 0x162   :  { %4266 = vmatprep.mubr.msk.f32.mxu1 %vm4598_vm1, %v4597_v12 }
 0x20d   :  { %v307_v38 = vpop.f32.mrf.mxu1 }
 0x20e   :  { %v850_v39 = vmul.f32 0.25, %v307_v38 }
 0x20f   :  { %v4228_v40 = vpop.f32.mrf.mxu1 }
 0x210   :  { %v859_v41 = vsel %vm858_vm3, %v850_v39, -inf }
 0x211   :  { %860 = vmax.xlane.f32.xlu0 %v859_v41  ;;  %v384_v42 = vpop.f32.mrf.mxu1 }
 0x212   :  { %v851_v43 = vmul.f32 0.25, %v384_v42 }
 0x213   :  { %v4233_v44 = vpop.f32.mrf.mxu1 }
 0x214   :  { %v862_v45 = vsel %vm858_vm3, %v851_v43, -inf }
 0x215   :  { %863 = vmax.xlane.f32.xlu1 %v862_v45  ;;  %v461_v46 = vpop.f32.mrf.mxu1 }
 0x216   :  { %v852_v47 = vmul.f32 0.25, %v461_v46 }
 0x217   :  { %v4238_v48 = vpop.f32.mrf.mxu1 }
 0x218   :  { %v865_v49 = vsel %vm858_vm3, %v852_v47, -inf }
 0x219   :  { %v692_v50 = vpop.f32.mrf.mxu0  ;;  %866 = vmax.xlane.f32.xlu0 %v865_v49  ;;  %v538_v51 = vpop.f32.mrf.mxu1 }
 0x21a   :  { %v4822_v52 = vmul.f32 0.25, %v538_v51  ;;  %v855_v55 = vmul.f32 0.25, %v692_v50 }
 0x21b   :  { %v4243_v53 = vpop.f32.mrf.mxu1  ;;  %v4253_v54 = vpop.f32.mrf.mxu0 }
 0x21c   :  { %v868_v56 = vsel %vm858_vm3, %v4822_v52, -inf  ;;  %v874_v62 = vsel %vm858_vm3, %v855_v55, -inf }
 0x21d   :  { %v846_v57 = vpop.f32.mrf.mxu0  ;;  %869 = vmax.xlane.f32.xlu0 %v868_v56  ;;  %v615_v58 = vpop.f32.mrf.mxu1 }
 0x21e   :  { %v857_v61 = vmul.f32 0.25, %v846_v57  ;;  %v4842_v2 = vmul.f32 0.25, %v615_v58 }
 0x21f   :  { %v4248_v59 = vpop.f32.mrf.mxu1  ;;  %v4263_v60 = vpop.f32.mrf.mxu0 }
 0x220   :  { %v880_v1 = vsel %vm858_vm3, %v857_v61, -inf  ;;  %v871_v4 = vsel %vm858_vm3, %v4842_v2, -inf }
 0x221   :  { %875 = vmax.xlane.f32.xlu0 %v874_v62  ;;  %v769_v63 = vpop.f32.mrf.mxu1 }
 0x222   :  { %v4844_v3 = vmul.f32 0.25, %v769_v63 }
 0x223   :  { %v4258_v0 = vpop.f32.mrf.mxu1 }
 0x224   :  { %v877_v5 = vsel %vm858_vm3, %v4844_v3, -inf }
 0x225   :  { %881 = vmax.xlane.f32.xlu0 %v880_v1 }
 0x226   :  { %947 = vrot.lane.b32.xlu1 %v4747_v16, %s4600_s2 }
 0x22a   :  { %1099 = vrot.lane.b32.xlu1 %v4752_v20, %s4600_s2 }
 0x22e   :  { %1175 = vrot.lane.b32.xlu1 %v4754_v22, %s4600_s2 }
 0x232   :  { %1327 = vrot.lane.b32.xlu1 %v4761_v26, %s4600_s2 }
 0x236   :  { %1479 = vrot.lane.b32.xlu1 %v4767_v29, %s4600_s2 }
 0x23a   :  { %1635 = vrot.lane.b32.xlu1 %v4750_v19, %s4601_s24 }
 0x23b   :  { %1023 = vrot.lane.b32.xlu0 %v4750_v19, %s4600_s2 }
 0x23f   :  { %1251 = vrot.lane.b32.xlu0 %v4758_v24, %s4600_s2 }
 0x243   :  { %1403 = vrot.lane.b32.xlu0 %v4764_v28, %s4600_s2 }
 0x247   :  { %1557 = vrot.lane.b32.xlu0 %v4747_v16, %s4601_s24 }
 0x24b   :  { %1555 = vrot.lane.b32.xlu0 %v4747_v16, %s4602_s25 }
 0x25e   :  { %872 = vmax.xlane.f32.xlu1 %v871_v4 }
 0x262   :  { %878 = vmax.xlane.f32.xlu1 %v877_v5 }
 0x273   :  { %1633 = vrot.lane.b32.xlu1 %v4750_v19, %s4602_s25 }
 0x29a   :  { %v861_v6 = vpop.xlane.xlu0 %860 }
 0x29b   :  { %v883_v7 = vsub.f32 %v850_v39, %v861_v6 }
 0x29d   :  { %v891_v8 = vmul.f32 1.442695, %v883_v7 }
 0x29e   :  { %v864_v9 = vpop.xlane.xlu1 %863 }
 0x29f   :  { %4493 = vpow2.f32 %v891_v8  ;;  %v884_v10 = vsub.f32 %v851_v43, %v864_v9 }
 0x2a1   :  { %v893_v11 = vmul.f32 1.442695, %v884_v10 }
 0x2a2   :  { %v948_v13 = vpop.permute.xlu1 %947  ;;  %v867_v14 = vpop.xlane.xlu0 %866 }
 0x2a3   :  { %4495 = vpow2.f32 %v893_v11  ;;  %v885_v15 = vsub.f32 %v852_v47, %v867_v14  ;;  %4265 = vmatpush3.msra.mxu1 %v948_v13 }
 0x2a4   :  { %4274 = vmatprep.subr.mxu1 %v4597_v12 }
 0x2a5   :  { %v895_v17 = vmul.f32 1.442695, %v885_v15 }
 0x2a6   :  { %v870_v18 = vpop.xlane.xlu0 %869  ;;  %v1100_v47 = vpop.permute.xlu1 %1099 }
 0x2a7   :  { %4497 = vpow2.f32 %v895_v17  ;;  %v886_v27 = vsub.f32 %v4822_v52, %v870_v18 }
 0x2a9   :  { %v897_v35 = vmul.f32 1.442695, %v886_v27 }
 0x2aa   :  { %v876_v21 = vpop.xlane.xlu0 %875  ;;  %v1176_v48 = vpop.permute.xlu1 %1175 }
 0x2ab   :  { %v888_v23 = vsub.f32 %v855_v55, %v876_v21 }
 0x2ac   :  { %v4853_v25 = vpop.eup %4493 }
 0x2ad   :  { %v901_v30 = vmul.f32 1.442695, %v888_v23  ;;  %v907_v31 = vsel %vm858_vm3, %v4853_v25, 0.0 }
 0x2ae   :  { %908 = vadd.xlane.f32.xlu1 %v907_v31  ;;  %v882_v32 = vpop.xlane.xlu0 %881  ;;  %v4883_v49 = vpop.permute.xlu1 %1327 }
 0x2af   :  { %4499 = vpow2.f32 %v901_v30  ;;  %v890_v33 = vsub.f32 %v857_v61, %v882_v32 }
 0x2b0   :  { %v4858_v34 = vpop.eup %4495 }
 0x2b1   :  { %v905_v36 = vmul.f32 1.442695, %v890_v33  ;;  %v910_v37 = vsel %vm858_vm3, %v4858_v34, 0.0 }
 0x2b2   :  { %911 = vadd.xlane.f32.xlu0 %v910_v37  ;;  %v1024_v38 = vpop.permute.xlu0 %1023  ;;  %v4887_v50 = vpop.permute.xlu1 %1479 }
 0x2b3   :  { %4501 = vpow2.f32 %v905_v36  ;;  %4270 = vmatpush3.msra.mxu0 %v1024_v38 }
 0x2b4   :  { %v4862_v39 = vpop.eup %4497  ;;  %4279 = vmatprep.subr.mxu0 %v4597_v12  ;;  %4503 = vpow2.f32 %v897_v35 }
 0x2b5   :  { %v913_v40 = vsel %vm858_vm3, %v4862_v39, 0.0 }
 0x2b6   :  { %914 = vadd.xlane.f32.xlu1 %v913_v40  ;;  %v4891_v51 = vpop.permute.xlu1 %1635  ;;  %v1252_v62 = vpop.permute.xlu0 %1251 }
 0x2ba   :  { %v4919_v63 = vpop.permute.xlu0 %1403 }
 0x2bc   :  { %v4867_v41 = vpop.eup %4499 }
 0x2bd   :  { %v922_v42 = vsel %vm858_vm3, %v4867_v41, 0.0 }
 0x2be   :  { %923 = vadd.xlane.f32.xlu0 %v922_v42  ;;  %v4921_v0 = vpop.permute.xlu0 %1557 }
 0x2c0   :  { %v4871_v43 = vpop.eup %4501 }
 0x2c1   :  { %v928_v44 = vsel %vm858_vm3, %v4871_v43, 0.0  ;;  %v4875_v45 = vpop.eup %4503 }
 0x2c2   :  { %929 = vadd.xlane.f32.xlu0 %v928_v44  ;;  %v916_v46 = vsel %vm858_vm3, %v4875_v45, 0.0 }
 0x2c6   :  { %917 = vadd.xlane.f32.xlu0 %v916_v46 }
 0x2c7   :  { %1791 = vrot.lane.b32.xlu1 %v4754_v22, %s4601_s24 }
 0x2cb   :  { %1789 = vrot.lane.b32.xlu1 %v4754_v22, %s4602_s25 }
 0x2dc   :  { %1713 = vrot.lane.b32.xlu0 %v4752_v20, %s4601_s24 }
 0x2e0   :  { %1711 = vrot.lane.b32.xlu0 %v4752_v20, %s4602_s25 }
 0x2e4   :  { %1869 = vrot.lane.b32.xlu0 %v4758_v24, %s4601_s24 }
 0x2e7   :  { %v873_v52 = vpop.xlane.xlu1 %872 }
 0x2e8   :  { %v887_v53 = vsub.f32 %v4842_v2, %v873_v52  ;;  %1867 = vrot.lane.b32.xlu0 %v4758_v24, %s4602_s25  ;;  %v4923_v2 = vpop.permute.xlu0 %1555 }
 0x2ea   :  { %v899_v54 = vmul.f32 1.442695, %v887_v53 }
 0x2eb   :  { %v879_v55 = vpop.xlane.xlu1 %878 }
 0x2ec   :  { %4505 = vpow2.f32 %v899_v54  ;;  %v889_v56 = vsub.f32 %v4844_v3, %v879_v55  ;;  %2025 = vrot.lane.b32.xlu0 %v4764_v28, %s4601_s24 }
 0x2ee   :  { %v903_v57 = vmul.f32 1.442695, %v889_v56 }
 0x2ef   :  { %v1634_v1 = vpop.permute.xlu1 %1633 }
 0x2f0   :  { %4507 = vpow2.f32 %v903_v57  ;;  %2023 = vrot.lane.b32.xlu0 %v4764_v28, %s4602_s25 }
 0x2f9   :  { %v4903_v58 = vpop.eup %4505 }
 0x2fa   :  { %v919_v59 = vsel %vm858_vm3, %v4903_v58, 0.0 }
 0x2fb   :  { %920 = vadd.xlane.f32.xlu1 %v919_v59 }
 0x2fd   :  { %v4907_v60 = vpop.eup %4507 }
 0x2fe   :  { %v925_v61 = vsel %vm858_vm3, %v4907_v60, 0.0 }
 0x2ff   :  { %926 = vadd.xlane.f32.xlu1 %v925_v61 }
 0x310   :  { %1947 = vrot.lane.b32.xlu1 %v4761_v26, %s4601_s24 }
 0x314   :  { %1945 = vrot.lane.b32.xlu1 %v4761_v26, %s4602_s25 }
 0x318   :  { %2103 = vrot.lane.b32.xlu1 %v4767_v29, %s4601_s24 }
 0x31c   :  { %2101 = vrot.lane.b32.xlu1 %v4767_v29, %s4602_s25 }
 0x337   :  { %v909_v3 = vpop.xlane.xlu1 %908 }
 0x338   :  { %4509 = vrcp.f32 %v909_v3 }
 0x33b   :  { %v912_v4 = vpop.xlane.xlu0 %911 }
 0x33c   :  { %4511 = vrcp.f32 %v912_v4 }
 0x33f   :  { %v915_v5 = vpop.xlane.xlu1 %914 }
 0x340   :  { %4513 = vrcp.f32 %v915_v5 }
 0x343   :  { %v1792_v30 = vpop.permute.xlu1 %1791 }
 0x345   :  { %v4510_v6 = vpop.eup %4509 }
 0x346   :  { %v939_v7 = vmul.f32 %v4510_v6, %v4853_v25 }
 0x347   :  { %v924_v8 = vpop.xlane.xlu0 %923  ;;  %v1790_v31 = vpop.permute.xlu1 %1789 }
 0x348   :  { %4267 = vmatmul.mubr.msk.f32.vlgmr.msra.gmra.mxu1 %vm858_vm3, %v939_v7 }
 0x349   :  { %v4512_v9 = vpop.eup %4511  ;;  %4275 = vmatpush3.msra.mxu1 %v1100_v47  ;;  %4276 = vmatprep.mubr.msk.f32.mxu1 %vm4598_vm1, %v4597_v12 }
 0x34a   :  { %v940_v10 = vmul.f32 %v4512_v9, %v4858_v34  ;;  %4284 = vmatprep.subr.mxu1 %v4597_v12 }
 0x34b   :  { %v930_v11 = vpop.xlane.xlu0 %929 }
 0x34c   :  { %4272 = vmatmul.mubr.msk.f32.vlgmr.msra.gmra.mxu0 %vm858_vm3, %v940_v10 }
 0x34d   :  { %v4514_v13 = vpop.eup %4513  ;;  %4280 = vmatpush3.msra.mxu0 %v1176_v48  ;;  %4281 = vmatprep.mubr.msk.f32.mxu0 %vm4598_vm1, %v4597_v12 }
 0x34e   :  { %v941_v14 = vmul.f32 %v4514_v13, %v4862_v39  ;;  %4289 = vmatprep.subr.mxu0 %v4597_v12 }
 0x34f   :  { %v918_v15 = vpop.xlane.xlu0 %917 }
 0x350   :  { %4515 = vrcp.f32 %v918_v15  ;;  %4277 = vmatmul.mubr.msk.f32.vlgmr.msra.gmra.mxu1 %vm858_vm3, %v941_v14 }
 0x351   :  { %4285 = vmatpush3.msra.mxu1 %v1252_v62  ;;  %4286 = vmatprep.mubr.msk.f32.mxu1 %vm4598_vm1, %v4597_v12  ;;  %4517 = vrcp.f32 %v924_v8 }
 0x352   :  { %4294 = vmatprep.subr.mxu1 %v4597_v12  ;;  %4519 = vrcp.f32 %v930_v11 }
 0x353   :  { %v1714_v34 = vpop.permute.xlu0 %1713 }
 0x357   :  { %v1712_v36 = vpop.permute.xlu0 %1711 }
 0x35b   :  { %v1870_v42 = vpop.permute.xlu0 %1869 }
 0x35d   :  { %v4516_v17 = vpop.eup %4515 }
 0x35e   :  { %v942_v18 = vmul.f32 %v4516_v17, %v4875_v45  ;;  %v4518_v21 = vpop.eup %4517 }
 0x35f   :  { %v944_v23 = vmul.f32 %v4518_v21, %v4867_v41  ;;  %v4520_v25 = vpop.eup %4519  ;;  %v1868_v45 = vpop.permute.xlu0 %1867 }
 0x360   :  { %4282 = vmatmul.mubr.msk.f32.vlgmr.msra.gmra.mxu0 %vm858_vm3, %v942_v18  ;;  %v946_v27 = vmul.f32 %v4520_v25, %v4871_v43 }
 0x361   :  { %4290 = vmatpush3.msra.mxu0 %v4883_v49  ;;  %4291 = vmatprep.mubr.msk.f32.mxu0 %vm4598_vm1, %v4597_v12 }
 0x362   :  { %4299 = vmatprep.subr.mxu0 %v4597_v12 }
 0x363   :  { %v2026_v46 = vpop.permute.xlu0 %2025 }
 0x364   :  { %4292 = vmatmul.mubr.msk.f32.vlgmr.msra.gmra.mxu0 %vm858_vm3, %v944_v23 }
 0x365   :  { %4300 = vmatpush3.msra.mxu0 %v4887_v50  ;;  %4301 = vmatprep.mubr.msk.f32.mxu0 %vm4598_vm1, %v4597_v12 }
 0x366   :  { %4309 = vmatprep.subr.mxu0 %v4597_v12 }
 0x367   :  { %v2024_v47 = vpop.permute.xlu0 %2023 }
 0x368   :  { %4302 = vmatmul.mubr.msk.f32.vlgmr.msra.gmra.mxu0 %vm858_vm3, %v946_v27 }
 0x369   :  { %4310 = vmatpush3.xpose.msk.msra.mxu0 %vm236_vm2, %v4891_v51  ;;  %4311 = vmatprep.mubr.msk.f32.mxu0 %vm4598_vm1, %v4597_v12 }
 0x36a   :  { %4319 = vmatprep.subr.mxu0 %v4597_v12 }
 0x36c   :  { %4312 = vmatmul.mubr.msk.f32.vlgmr.msra.gmra.mxu0 %vm236_vm2, %v1634_v1 }
 0x36d   :  { %4320 = vmatpush3.xpose.msk.msra.mxu0 %vm236_vm2, %v1792_v30  ;;  %4321 = vmatprep.mubr.msk.f32.mxu0 %vm4598_vm1, %v4597_v12 }
 0x36e   :  { %4329 = vmatprep.subr.mxu0 %v4597_v12 }
 0x370   :  { %4322 = vmatmul.mubr.msk.f32.vlgmr.msra.gmra.mxu0 %vm236_vm2, %v1790_v31 }
 0x371   :  { %4331 = vmatprep.mubr.msk.f32.mxu0 %vm4598_vm1, %v4597_v12 }
 0x384   :  { %v921_v32 = vpop.xlane.xlu1 %920 }
 0x385   :  { %4521 = vrcp.f32 %v921_v32 }
 0x388   :  { %v927_v33 = vpop.xlane.xlu1 %926 }
 0x389   :  { %4523 = vrcp.f32 %v927_v33 }
 0x38c   :  { %v1948_v35 = vpop.permute.xlu1 %1947 }
 0x38d   :  { %4330 = vmatpush3.xpose.msk.msra.mxu0 %vm236_vm2, %v1948_v35 }
 0x38e   :  { %4339 = vmatprep.subr.mxu0 %v4597_v12 }
 0x390   :  { %v1946_v37 = vpop.permute.xlu1 %1945 }
 0x391   :  { %4332 = vmatmul.mubr.msk.f32.vlgmr.msra.gmra.mxu0 %vm236_vm2, %v1946_v37 }
 0x392   :  { %v4522_v38 = vpop.eup %4521  ;;  %4341 = vmatprep.mubr.msk.f32.mxu0 %vm4598_vm1, %v4597_v12 }
 0x393   :  { %v943_v39 = vmul.f32 %v4522_v38, %v4903_v58 }
 0x394   :  { %v2104_v40 = vpop.permute.xlu1 %2103 }
 0x395   :  { %4287 = vmatmul.mubr.msk.f32.vlgmr.msra.gmra.mxu1 %vm858_vm3, %v943_v39  ;;  %4340 = vmatpush3.xpose.msk.msra.mxu0 %vm236_vm2, %v2104_v40 }
 0x396   :  { %v4524_v41 = vpop.eup %4523  ;;  %4295 = vmatpush3.msra.mxu1 %v4919_v63  ;;  %4296 = vmatprep.mubr.msk.f32.mxu1 %vm4598_vm1, %v4597_v12 }
 0x397   :  { %4304 = vmatprep.subr.mxu1 %v4597_v12  ;;  %v945_v43 = vmul.f32 %v4524_v41, %v4907_v60  ;;  %4349 = vmatprep.subr.mxu0 %v4597_v12 }
 0x398   :  { %v2102_v44 = vpop.permute.xlu1 %2101 }
 0x399   :  { %4297 = vmatmul.mubr.msk.f32.vlgmr.msra.gmra.mxu1 %vm858_vm3, %v945_v43  ;;  %4342 = vmatmul.mubr.msk.f32.vlgmr.msra.gmra.mxu0 %vm236_vm2, %v2102_v44 }
 0x39a   :  { %4305 = vmatpush3.xpose.msk.msra.mxu1 %vm236_vm2, %v4921_v0  ;;  %4306 = vmatprep.mubr.msk.f32.mxu1 %vm4598_vm1, %v4597_v12 }
 0x39b   :  { %4314 = vmatprep.subr.mxu1 %v4597_v12  ;;  %4351 = vmatprep.mubr.msk.f32.mxu0 %vm4598_vm1, %v4597_v12 }
 0x39d   :  { %4307 = vmatmul.mubr.msk.f32.vlgmr.msra.gmra.mxu1 %vm236_vm2, %v4923_v2 }
 0x39e   :  { %4315 = vmatpush3.xpose.msk.msra.mxu1 %vm236_vm2, %v1714_v34  ;;  %4316 = vmatprep.mubr.msk.f32.mxu1 %vm4598_vm1, %v4597_v12 }
 0x39f   :  { %4324 = vmatprep.subr.mxu1 %v4597_v12 }
 0x3a1   :  { %4317 = vmatmul.mubr.msk.f32.vlgmr.msra.gmra.mxu1 %vm236_vm2, %v1712_v36 }
 0x3a2   :  { %4325 = vmatpush3.xpose.msk.msra.mxu1 %vm236_vm2, %v1870_v42  ;;  %4326 = vmatprep.mubr.msk.f32.mxu1 %vm4598_vm1, %v4597_v12 }
 0x3a3   :  { %4334 = vmatprep.subr.mxu1 %v4597_v12 }
 0x3a5   :  { %4327 = vmatmul.mubr.msk.f32.vlgmr.msra.gmra.mxu1 %vm236_vm2, %v1868_v45 }
 0x3a6   :  { %4335 = vmatpush3.xpose.msk.msra.mxu1 %vm236_vm2, %v2026_v46  ;;  %4336 = vmatprep.mubr.msk.f32.mxu1 %vm4598_vm1, %v4597_v12 }
 0x3a7   :  { %4344 = vmatprep.subr.mxu1 %v4597_v12 }
 0x3a9   :  { %4337 = vmatmul.mubr.msk.f32.vlgmr.msra.gmra.mxu1 %vm236_vm2, %v2024_v47 }
 0x3aa   :  { %4346 = vmatprep.mubr.msk.f32.mxu1 %vm4598_vm1, %v4597_v12 }
 0x408   :  { %v5009_v48 = vpop.f32.mrf.mxu1 }
 0x40a   :  { %v4268_v49 = vpop.f32.mrf.mxu1 }
 0x40c   :  { %v5011_v50 = vpop.f32.mrf.mxu0 }
 0x40e   :  { %v4273_v51 = vpop.f32.mrf.mxu0 }
 0x410   :  { %v5013_v52 = vpop.f32.mrf.mxu1 }
 0x412   :  { %v4278_v53 = vpop.f32.mrf.mxu1 }
 0x420   :  { %v5015_v54 = vpop.f32.mrf.mxu0 }
 0x422   :  { %v4283_v55 = vpop.f32.mrf.mxu0 }
 0x424   :  { %v5017_v56 = vpop.f32.mrf.mxu0 }
 0x426   :  { %v4293_v57 = vpop.f32.mrf.mxu0 }
 0x428   :  { %v5019_v58 = vpop.f32.mrf.mxu0 }
 0x42a   :  { %v4303_v59 = vpop.f32.mrf.mxu0 }
 0x42c   :  { %v1707_v60 = vpop.f32.mrf.mxu0 }
 0x42d   :  { %v2180_v61 = vmul.f32 0.25, %v1707_v60 }
 0x42e   :  { %v4313_v62 = vpop.f32.mrf.mxu0 }
 0x42f   :  { %v2190_v63 = vsel %vm858_vm3, %v2180_v61, -inf }
 0x430   :  { %2191 = vmax.xlane.f32.xlu1 %v2190_v63  ;;  %v1863_v0 = vpop.f32.mrf.mxu0 }
 0x431   :  { %v2182_v21 = vmul.f32 0.25, %v1863_v0 }
 0x432   :  { %v4323_v1 = vpop.f32.mrf.mxu0 }
 0x433   :  { %v2196_v32 = vsel %vm858_vm3, %v2182_v21, -inf }
 0x451   :  { %v2019_v2 = vpop.f32.mrf.mxu0 }
 0x452   :  { %v2184_v31 = vmul.f32 0.25, %v2019_v2 }
 0x453   :  { %v4333_v3 = vpop.f32.mrf.mxu0 }
 0x454   :  { %v2202_v38 = vsel %vm858_vm3, %v2184_v31, -inf }
 0x455   :  { %v5022_v4 = vpop.f32.mrf.mxu1 }
 0x457   :  { %v4288_v5 = vpop.f32.mrf.mxu1 }
 0x459   :  { %v5024_v6 = vpop.f32.mrf.mxu1  ;;  %v2175_v7 = vpop.f32.mrf.mxu0 }
 0x45a   :  { %v2186_v37 = vmul.f32 0.25, %v2175_v7 }
 0x45b   :  { %v4298_v8 = vpop.f32.mrf.mxu1  ;;  %v4343_v9 = vpop.f32.mrf.mxu0 }
 0x45c   :  { %v2208_v40 = vsel %vm858_vm3, %v2186_v37, -inf }
 0x45d   :  { %v1629_v10 = vpop.f32.mrf.mxu1 }
 0x45e   :  { %v2179_v11 = vmul.f32 0.25, %v1629_v10 }
 0x45f   :  { %v4308_v13 = vpop.f32.mrf.mxu1 }
 0x460   :  { %v2187_v14 = vsel %vm858_vm3, %v2179_v11, -inf }
 0x461   :  { %2188 = vmax.xlane.f32.xlu0 %v2187_v14  ;;  %v1785_v15 = vpop.f32.mrf.mxu1 }
 0x462   :  { %v2181_v17 = vmul.f32 0.25, %v1785_v15 }
 0x463   :  { %v4318_v18 = vpop.f32.mrf.mxu1 }
 0x464   :  { %v2193_v23 = vsel %vm858_vm3, %v2181_v17, -inf }
 0x465   :  { %2194 = vmax.xlane.f32.xlu0 %v2193_v23  ;;  %v1941_v25 = vpop.f32.mrf.mxu1 }
 0x466   :  { %v2183_v27 = vmul.f32 0.25, %v1941_v25 }
 0x467   :  { %v4328_v30 = vpop.f32.mrf.mxu1 }
 0x468   :  { %v2199_v33 = vsel %vm858_vm3, %v2183_v27, -inf }
 0x469   :  { %2197 = vmax.xlane.f32.xlu0 %v2196_v32  ;;  %2200 = vmax.xlane.f32.xlu1 %v2199_v33  ;;  %v2097_v34 = vpop.f32.mrf.mxu1 }
 0x46a   :  { %v2185_v35 = vmul.f32 0.25, %v2097_v34 }
 0x46b   :  { %v4338_v36 = vpop.f32.mrf.mxu1 }
 0x46c   :  { %v2205_v39 = vsel %vm858_vm3, %v2185_v35, -inf }
 0x46d   :  { %2203 = vmax.xlane.f32.xlu0 %v2202_v38  ;;  %2206 = vmax.xlane.f32.xlu1 %v2205_v39 }
 0x471   :  { %2209 = vmax.xlane.f32.xlu0 %v2208_v40 }
 0x47e   :  { %2275 = vrot.lane.b32.xlu1 %v4747_v16, %s4603_s27 }
 0x482   :  { %2427 = vrot.lane.b32.xlu1 %v4752_v20, %s4603_s27 }
 0x486   :  { %2503 = vrot.lane.b32.xlu1 %v4754_v22, %s4603_s27 }
 0x487   :  { %2351 = vrot.lane.b32.xlu0 %v4750_v19, %s4603_s27 }
 0x48a   :  { %2655 = vrot.lane.b32.xlu1 %v4761_v26, %s4603_s27 }
 0x48b   :  { %2579 = vrot.lane.b32.xlu0 %v4758_v24, %s4603_s27 }
 0x4b9   :  { %v2192_v41 = vpop.xlane.xlu1 %2191 }
 0x4ba   :  { %v2212_v42 = vsub.f32 %v2180_v61, %v2192_v41 }
 0x4bc   :  { %v2221_v43 = vmul.f32 1.442695, %v2212_v42 }
 0x4be   :  { %4525 = vpow2.f32 %v2221_v43 }
 0x4cb   :  { %v5045_v16 = vpop.eup %4525 }
 0x4cc   :  { %v2238_v20 = vsel %vm858_vm3, %v5045_v16, 0.0 }
 0x4cd   :  { %2239 = vadd.xlane.f32.xlu0 %v2238_v20 }
 0x4ea   :  { %v2189_v22 = vpop.xlane.xlu0 %2188 }
 0x4eb   :  { %v2211_v44 = vsub.f32 %v2179_v11, %v2189_v22 }
 0x4ed   :  { %v2219_v45 = vmul.f32 1.442695, %v2211_v44 }
 0x4ee   :  { %v2195_v19 = vpop.xlane.xlu0 %2194 }
 0x4ef   :  { %4527 = vpow2.f32 %v2219_v45  ;;  %v2213_v46 = vsub.f32 %v2181_v17, %v2195_v19 }
 0x4f1   :  { %v2223_v26 = vmul.f32 1.442695, %v2213_v46 }
 0x4f2   :  { %v2201_v47 = vpop.xlane.xlu1 %2200  ;;  %v2198_v49 = vpop.xlane.xlu0 %2197 }
 0x4f3   :  { %4529 = vpow2.f32 %v2223_v26  ;;  %v2215_v24 = vsub.f32 %v2183_v27, %v2201_v47  ;;  %v2214_v51 = vsub.f32 %v2182_v21, %v2198_v49 }
 0x4f5   :  { %v2227_v53 = vmul.f32 1.442695, %v2215_v24  ;;  %v2225_v55 = vmul.f32 1.442695, %v2214_v51  ;;  %v70_v51 = vld [vmem:[%s5451_s3 + $0x8] sm:$0xff] }
 0x4f6   :  { %v2207_v57 = vpop.xlane.xlu1 %2206  ;;  %v2204_v59 = vpop.xlane.xlu0 %2203 }
 0x4f7   :  { %4531 = vpow2.f32 %v2227_v53  ;;  %v2217_v60 = vsub.f32 %v2185_v35, %v2207_v57  ;;  %v2216_v61 = vsub.f32 %v2184_v31, %v2204_v59  ;;  %v69_v59 = vld [vmem:[%s5451_s3] sm:$0xff] }
 0x4f8   :  { %4533 = vpow2.f32 %v2225_v55 }
 0x4f9   :  { %v2231_v62 = vmul.f32 1.442695, %v2217_v60  ;;  %v2229_v63 = vmul.f32 1.442695, %v2216_v61  ;;  %v72_v60 = vld [vmem:[%s5451_s3 + $0x18] sm:$0xff] }
 0x4fa   :  { %v2276_v0 = vpop.permute.xlu1 %2275  ;;  %v2210_v1 = vpop.xlane.xlu0 %2209 }
 0x4fb   :  { %4535 = vpow2.f32 %v2231_v62  ;;  %v2218_v2 = vsub.f32 %v2186_v37, %v2210_v1  ;;  %4345 = vmatpush3.msra.mxu1 %v2276_v0 }
 0x4fc   :  { %v4528_v3 = vpop.eup %4527  ;;  %4537 = vpow2.f32 %v2229_v63  ;;  %4354 = vmatprep.subr.mxu1 %v4597_v12 }
 0x4fd   :  { %v2233_v5 = vmul.f32 1.442695, %v2218_v2  ;;  %v2235_v7 = vsel %vm858_vm3, %v4528_v3, 0.0 }
 0x4fe   :  { %2236 = vadd.xlane.f32.xlu1 %v2235_v7  ;;  %v2352_v8 = vpop.permute.xlu0 %2351  ;;  %v2428_v32 = vpop.permute.xlu1 %2427 }
 0x4ff   :  { %4539 = vpow2.f32 %v2233_v5  ;;  %4350 = vmatpush3.msra.mxu0 %v2352_v8 }
 0x500   :  { %v4530_v9 = vpop.eup %4529  ;;  %4359 = vmatprep.subr.mxu0 %v4597_v12 }
 0x501   :  { %v2241_v10 = vsel %vm858_vm3, %v4530_v9, 0.0 }
 0x502   :  { %2242 = vadd.xlane.f32.xlu1 %v2241_v10  ;;  %v2580_v30 = vpop.permute.xlu0 %2579  ;;  %v2504_v35 = vpop.permute.xlu1 %2503 }
 0x504   :  { %v4532_v11 = vpop.eup %4531 }
 0x505   :  { %v4534_v13 = vpop.eup %4533  ;;  %v2247_v14 = vsel %vm858_vm3, %v4532_v11, 0.0 }
 0x506   :  { %2248 = vadd.xlane.f32.xlu1 %v2247_v14  ;;  %v2244_v15 = vsel %vm858_vm3, %v4534_v13, 0.0 }
 0x507   :  { %2245 = vadd.xlane.f32.xlu0 %v2244_v15 }
 0x508   :  { %v4536_v17 = vpop.eup %4535 }
 0x509   :  { %v5055_v18 = vpop.eup %4537  ;;  %v2253_v21 = vsel %vm858_vm3, %v4536_v17, 0.0 }
 0x50a   :  { %2254 = vadd.xlane.f32.xlu1 %v2253_v21  ;;  %v2250_v23 = vsel %vm858_vm3, %v5055_v18, 0.0 }
 0x50b   :  { %2251 = vadd.xlane.f32.xlu0 %v2250_v23 }
 0x50c   :  { %v5060_v25 = vpop.eup %4539 }
 0x50d   :  { %v2256_v27 = vsel %vm858_vm3, %v5060_v25, 0.0 }
 0x50f   :  { %2257 = vadd.xlane.f32.xlu0 %v2256_v27 }
 0x51b   :  { %2807 = vrot.lane.b32.xlu1 %v4767_v29, %s4603_s27  ;;  %v2656_v29 = vpop.permute.xlu1 %2655 }
 0x525   :  { %2731 = vrot.lane.b32.xlu0 %v4764_v28, %s4603_s27 }
 0x556   :  { %v2240_v31 = vpop.xlane.xlu0 %2239 }
 0x557   :  { %4541 = vrcp.f32 %v2240_v31 }
 0x564   :  { %v4542_v33 = vpop.eup %4541 }
 0x565   :  { %v2268_v34 = vmul.f32 %v4542_v33, %v5045_v16 }
 0x567   :  { %4352 = vmatmul.mubr.msk.f32.vlgmr.msra.gmra.mxu0 %vm858_vm3, %v2268_v34 }
 0x568   :  { %4360 = vmatpush3.msra.mxu0 %v2504_v35  ;;  %4361 = vmatprep.mubr.msk.f32.mxu0 %vm4598_vm1, %v4597_v12 }
 0x569   :  { %4369 = vmatprep.subr.mxu0 %v4597_v12 }
 0x587   :  { %v2237_v36 = vpop.xlane.xlu1 %2236 }
 0x588   :  { %4543 = vrcp.f32 %v2237_v36 }
 0x58b   :  { %v2243_v28 = vpop.xlane.xlu1 %2242 }
 0x58c   :  { %4545 = vrcp.f32 %v2243_v28 }
 0x58f   :  { %v2249_v37 = vpop.xlane.xlu1 %2248 }
 0x590   :  { %4547 = vrcp.f32 %v2249_v37  ;;  %v2246_v38 = vpop.xlane.xlu0 %2245 }
 0x591   :  { %4549 = vrcp.f32 %v2246_v38 }
 0x593   :  { %v2255_v39 = vpop.xlane.xlu1 %2254 }
 0x594   :  { %4551 = vrcp.f32 %v2255_v39  ;;  %v2252_v40 = vpop.xlane.xlu0 %2251 }
 0x595   :  { %v4544_v41 = vpop.eup %4543  ;;  %4553 = vrcp.f32 %v2252_v40 }
 0x596   :  { %v2267_v42 = vmul.f32 %v4544_v41, %v4528_v3 }
 0x597   :  { %v2808_v53 = vpop.permute.xlu1 %2807 }
 0x598   :  { %v2258_v43 = vpop.xlane.xlu0 %2257  ;;  %4347 = vmatmul.mubr.msk.f32.vlgmr.msra.gmra.mxu1 %vm858_vm3, %v2267_v42 }
 0x599   :  { %v4546_v16 = vpop.eup %4545  ;;  %4555 = vrcp.f32 %v2258_v43  ;;  %4355 = vmatpush3.msra.mxu1 %v2428_v32  ;;  %4356 = vmatprep.mubr.msk.f32.mxu1 %vm4598_vm1, %v4597_v12  ;;  %v4590_v32 = vld [vmem:[%s5471_s30] sm:$0xff] }
 0x59a   :  { %4364 = vmatprep.subr.mxu1 %v4597_v12  ;;  %v2269_v20 = vmul.f32 %v4546_v16, %v4530_v9 }
 0x59c   :  { %4357 = vmatmul.mubr.msk.f32.vlgmr.msra.gmra.mxu1 %vm858_vm3, %v2269_v20  ;;  %v2732_v46 = vpop.permute.xlu0 %2731  ;;  %v4591_v20 = vld [vmem:[%s5471_s30 + $0x10] sm:$0xff] }
 0x59d   :  { %v4548_v22 = vpop.eup %4547  ;;  %4365 = vmatpush3.msra.mxu1 %v2580_v30  ;;  %4366 = vmatprep.mubr.msk.f32.mxu1 %vm4598_vm1, %v4597_v12 }
 0x59e   :  { %v4550_v44 = vpop.eup %4549  ;;  %4374 = vmatprep.subr.mxu1 %v4597_v12  ;;  %v2271_v45 = vmul.f32 %v4548_v22, %v4532_v11  ;;  %v4043_v11 = vld [vmem:[%s5452_s4] ss:$0 sm:$0xff] }
 0x59f   :  { %v2270_v19 = vmul.f32 %v4550_v44, %v4534_v13 }
 0x5a0   :  { %4367 = vmatmul.mubr.msk.f32.vlgmr.msra.gmra.mxu1 %vm858_vm3, %v2271_v45  ;;  %v4592_v45 = vld [vmem:[%s5471_s30 + $0x18] sm:$0xff] }
 0x5a1   :  { %v4552_v26 = vpop.eup %4551  ;;  %4362 = vmatmul.mubr.msk.f32.vlgmr.msra.gmra.mxu0 %vm858_vm3, %v2270_v19  ;;  %4375 = vmatpush3.msra.mxu1 %v2732_v46 }
 0x5a2   :  { %v4554_v47 = vpop.eup %4553  ;;  %4370 = vmatpush3.msra.mxu0 %v2656_v29  ;;  %4371 = vmatprep.mubr.msk.f32.mxu0 %vm4598_vm1, %v4597_v12  ;;  %v2273_v49 = vmul.f32 %v4552_v26, %v4536_v17 }
 0x5a3   :  { %4376 = vmatprep.mubr.msk.f32.mxu1 %vm4598_vm1, %v4597_v12  ;;  %4379 = vmatprep.subr.mxu0 %v4597_v12  ;;  %v2272_v24 = vmul.f32 %v4554_v47, %v5055_v18 }
 0x5a4   :  { %4377 = vmatmul.mubr.msk.f32.vlgmr.msra.gmra.mxu1 %vm858_vm3, %v2273_v49  ;;  %4384 = vmatprep.subr.mxu1 %v72_v60 }
 0x5a5   :  { %4372 = vmatmul.mubr.msk.f32.vlgmr.msra.gmra.mxu0 %vm858_vm3, %v2272_v24  ;;  %4385 = vmatpush3.msra.mxu1 %v72_v60 }
 0x5a6   :  { %v4556_v55 = vpop.eup %4555  ;;  %4380 = vmatpush3.msra.mxu0 %v2808_v53  ;;  %4381 = vmatprep.mubr.msk.f32.mxu0 %vm4598_vm1, %v4597_v12 }
 0x5a7   :  { %v2274_v57 = vmul.f32 %v4556_v55, %v5060_v25  ;;  %4400 = vmatprep.subr.mxu0 %v70_v51  ;;  %v4589_v25 = vld [vmem:[%s5471_s30 + $0x8] sm:$0xff]  ;;  %v4593_v55 = vld [vmem:[%s5471_s30 + $0x20] sm:$0xff] }
 0x5a9   :  { %4382 = vmatmul.mubr.msk.f32.vlgmr.msra.gmra.mxu0 %vm858_vm3, %v2274_v57 }
 0x5aa   :  { %4401 = vmatpush3.msra.mxu0 %v70_v51  ;;  %4404 = vmatprep.mubr.msk.f32.mxu0 %vm236_vm2, %v5009_v48  ;;  %v71_v48 = vld [vmem:[%s5451_s3 + $0x10] sm:$0xff] }
 0x5ab   :  { %4402 = vmatprep.subr.mxu0 %v69_v59  ;;  %4386 = vmatprep.subr.mxu1 %v71_v48 }
 0x5ac   :  { %4403 = vmatpush3.msra.mxu0 %v69_v59  ;;  %4387 = vmatpush3.msra.mxu1 %v71_v48 }
 0x5ad   :  { %4405 = vmatmul.mubr.msk.f32.vlgmr.msra.gmra.mxu0 %vm236_vm2, %v5011_v50 }
 0x5ae   :  { %4407 = vmatprep.mubr.msk.f32.mxu0 %vm236_vm2, %v5013_v52 }
 0x5b1   :  { %4408 = vmatmul.mubr.msk.f32.gmra.mxu0 %vm236_vm2, %v5015_v54 }
 0x5b2   :  { %4410 = vmatprep.mubr.msk.f32.mxu0 %vm236_vm2, %v5022_v4 }
 0x5b5   :  { %4411 = vmatmul.mubr.msk.f32.gmra.mxu0 %vm236_vm2, %v5017_v56 }
 0x5b6   :  { %4413 = vmatprep.mubr.msk.f32.mxu0 %vm236_vm2, %v5024_v6 }
 0x5b9   :  { %4414 = vmatmul.mubr.msk.f32.gmra.mxu0 %vm236_vm2, %v5019_v58 }
 0x627   :  { %v2423_v50 = vpop.f32.mrf.mxu0 }
 0x629   :  { %v4353_v52 = vpop.f32.mrf.mxu0 }
 0x62a   :  { %v4594_v52 = vld [vmem:[%s5471_s30 + $0x28] sm:$0xff] }
 0x658   :  { %v2347_v54 = vpop.f32.mrf.mxu1 }
 0x659   :  { %4388 = vmatprep.mubr.msk.f32.mxu1 %vm236_vm2, %v2347_v54 }
 0x65a   :  { %v4348_v4 = vpop.f32.mrf.mxu1  ;;  %4389 = vmatmul.mubr.msk.f32.vlgmr.msra.gmra.mxu1 %vm236_vm2, %v2423_v50 }
 0x65b   :  { %v4595_v4 = vld [vmem:[%s5471_s30 + $0x30] sm:$0xff] }
 0x65c   :  { %v2499_v56 = vpop.f32.mrf.mxu1 }
 0x65d   :  { %4391 = vmatprep.mubr.msk.f32.mxu1 %vm236_vm2, %v2499_v56 }
 0x65e   :  { %v4358_v6 = vpop.f32.mrf.mxu1 }
 0x660   :  { %v2651_v61 = vpop.f32.mrf.mxu1 }
 0x661   :  { %v2575_v58 = vpop.f32.mrf.mxu0 }
 0x662   :  { %4392 = vmatmul.mubr.msk.f32.gmra.mxu1 %vm236_vm2, %v2575_v58  ;;  %v4368_v62 = vpop.f32.mrf.mxu1  ;;  %v4596_v58 = vld [vmem:[%s5471_s30 + $0x38] sm:$0xff] }
 0x663   :  { %v4363_v63 = vpop.f32.mrf.mxu0  ;;  %4394 = vmatprep.mubr.msk.f32.mxu1 %vm236_vm2, %v2651_v61 }
 0x664   :  { %v2803_v0 = vpop.f32.mrf.mxu1 }
 0x665   :  { %v2727_v1 = vpop.f32.mrf.mxu0 }
 0x666   :  { %4395 = vmatmul.mubr.msk.f32.gmra.mxu1 %vm236_vm2, %v2727_v1  ;;  %v4378_v2 = vpop.f32.mrf.mxu1 }
 0x667   :  { %v4373_v3 = vpop.f32.mrf.mxu0  ;;  %4397 = vmatprep.mubr.msk.f32.mxu1 %vm236_vm2, %v2803_v0 }
 0x669   :  { %v2879_v5 = vpop.f32.mrf.mxu0 }
 0x66a   :  { %4398 = vmatmul.mubr.msk.f32.gmra.mxu1 %vm236_vm2, %v2879_v5 }
 0x66b   :  { %v4383_v7 = vpop.f32.mrf.mxu0 }
 0x66d   :  { %v4406_v8 = vpop.f32.mrf.mxu0 }
 0x66f   :  { %v3102_v9 = vpop.f32.mrf.mxu0 }
 0x671   :  { %v4409_v10 = vpop.f32.mrf.mxu0 }
 0x673   :  { %v3112_v15 = vpop.f32.mrf.mxu0 }
 0x675   :  { %v4412_v30 = vpop.f32.mrf.mxu0 }
 0x677   :  { %v3122_v36 = vpop.f32.mrf.mxu0 }
 0x679   :  { %v4415_v42 = vpop.f32.mrf.mxu0 }
 0x67b   :  { %v3132_v24 = vpop.f32.mrf.mxu0 }
 0x71a   :  { %v4390_v13 = vpop.f32.mrf.mxu1 }
 0x71b   :  { %v3108_v14 = vadd.f32 %v4406_v8, %v4390_v13 }
 0x71c   :  { %v2973_v17 = vpop.f32.mrf.mxu1 }
 0x71d   :  { %v3148_v18 = vadd.f32 %v4043_v11, %v3108_v14  ;;  %v3103_v21 = vadd.f32 %v3102_v9, %v2973_v17 }
 0x71f   :  { %v3147_v23 = vadd.f32 %v4043_v11, %v3103_v21  ;;  %v3156_v27 = vadd.f32 %v4589_v25, %v3148_v18 }
 0x721   :  { %v3166_v31 = vsel %vm103_vm0, %v3156_v27, 0.0  ;;  %v3155_v33 = vadd.f32 %v4590_v32, %v3147_v23 }
 0x722   :  { %v4393_v34 = vpop.f32.mrf.mxu1  ;;  %3167 = vadd.xlane.f32.xlu1 %v3166_v31 }
 0x723   :  { %v3118_v35 = vadd.f32 %v4409_v10, %v4393_v34  ;;  %v3163_v29 = vsel %vm103_vm0, %v3155_v33, 0.0 }
 0x724   :  { %v2983_v28 = vpop.f32.mrf.mxu1  ;;  %3164 = vadd.xlane.f32.xlu0 %v3163_v29 }
 0x725   :  { %v3113_v37 = vadd.f32 %v3112_v15, %v2983_v28  ;;  %v3150_v38 = vadd.f32 %v4043_v11, %v3118_v35 }
 0x726   :  { %v4396_v39 = vpop.f32.mrf.mxu1 }
 0x727   :  { %v3149_v40 = vadd.f32 %v4043_v11, %v3113_v37  ;;  %v3128_v41 = vadd.f32 %v4412_v30, %v4396_v39  ;;  %v3158_v19 = vadd.f32 %v4592_v45, %v3150_v38 }
 0x728   :  { %v2993_v43 = vpop.f32.mrf.mxu1 }
 0x729   :  { %v3123_v16 = vadd.f32 %v3122_v36, %v2993_v43  ;;  %v3157_v22 = vadd.f32 %v4591_v20, %v3149_v40  ;;  %v3152_v46 = vadd.f32 %v4043_v11, %v3128_v41  ;;  %v3172_v59 = vsel %vm103_vm0, %v3158_v19, 0.0 }
 0x72a   :  { %v4399_v44 = vpop.f32.mrf.mxu1 }
 0x72b   :  { %v3151_v26 = vadd.f32 %v4043_v11, %v3123_v16  ;;  %v3138_v47 = vadd.f32 %v4415_v42, %v4399_v44  ;;  %v3169_v49 = vsel %vm103_vm0, %v3157_v22, 0.0  ;;  %v3160_v54 = vadd.f32 %v4594_v52, %v3152_v46  ;;  %v78_v46 = vld [vmem:[%s5453_s7 + $0x10] sm:$0xff] }
 0x72c   :  { %3170 = vadd.xlane.f32.xlu0 %v3169_v49  ;;  %v3003_v51 = vpop.f32.mrf.mxu1  ;;  %v88_v49 = vld [vmem:[%s5454_s9 + $0x38] sm:$0xff] }
 0x72d   :  { %v3133_v53 = vadd.f32 %v3132_v24, %v3003_v51  ;;  %v3159_v57 = vadd.f32 %v4593_v55, %v3151_v26  ;;  %v3154_v60 = vadd.f32 %v4043_v11, %v3138_v47  ;;  %v3178_v6 = vsel %vm103_vm0, %v3160_v54, 0.0  ;;  %v77_v26 = vld [vmem:[%s5453_s7 + $0x8] sm:$0xff]  ;;  %v76_v47 = vld [vmem:[%s5453_s7] sm:$0xff]  ;;  %v87_v24 = vld [vmem:[%s5454_s9 + $0x30] sm:$0xff]  ;;  %4436 = vmatprep.subr.mxu0 %v88_v49 }
 0x72e   :  { %4437 = vmatpush3.msra.mxu0 %v88_v49  ;;  %v86_v51 = vld [vmem:[%s5454_s9 + $0x28] sm:$0xff]  ;;  %v83_v49 = vld [vmem:[%s5454_s9 + $0x10] sm:$0xff] }
 0x72f   :  { %v3153_v48 = vadd.f32 %v4043_v11, %v3133_v53  ;;  %v3175_v50 = vsel %vm103_vm0, %v3159_v57, 0.0  ;;  %v3162_v62 = vadd.f32 %v4596_v58, %v3154_v60  ;;  %4438 = vmatprep.subr.mxu0 %v87_v24  ;;  %v85_v53 = vld [vmem:[%s5454_s9 + $0x20] sm:$0xff] }
 0x730   :  { %3173 = vadd.xlane.f32.xlu0 %v3172_v59  ;;  %3176 = vadd.xlane.f32.xlu1 %v3175_v50 }
 0x731   :  { %v3161_v56 = vadd.f32 %v4595_v4, %v3153_v48  ;;  %v3184_v63 = vsel %vm103_vm0, %v3162_v62, 0.0  ;;  %4439 = vmatpush3.msra.mxu0 %v87_v24  ;;  %v82_v24 = vld [vmem:[%s5454_s9 + $0x8] sm:$0xff] }
 0x732   :  { %4440 = vmatprep.subr.mxu0 %v86_v51 }
 0x733   :  { %v3181_v61 = vsel %vm103_vm0, %v3161_v56, 0.0  ;;  %4441 = vmatpush3.msra.mxu0 %v86_v51  ;;  %v81_v51 = vld [vmem:[%s5454_s9] sm:$0xff] }
 0x734   :  { %3179 = vadd.xlane.f32.xlu0 %v3178_v6  ;;  %3182 = vadd.xlane.f32.xlu1 %v3181_v61 }
 0x735   :  { %4442 = vmatprep.subr.mxu0 %v85_v53 }
 0x736   :  { %4443 = vmatpush3.msra.mxu0 %v85_v53  ;;  %v4046_v53 = vld [vmem:[%s5457_s8] ss:$0 sm:$0xff] }
 0x738   :  { %3185 = vadd.xlane.f32.xlu0 %v3184_v63 }
 0x7ab   :  { %v3168_v0 = vpop.xlane.xlu1 %3167 }
 0x7ac   :  { %v3189_v1 = vmul.f32 0.03125, %v3168_v0 }
 0x7ad   :  { %v3165_v2 = vpop.xlane.xlu0 %3164 }
 0x7ae   :  { %v5166_v3 = vsub.f32 %v3156_v27, %v3189_v1  ;;  %v3188_v5 = vmul.f32 0.03125, %v3165_v2 }
 0x7b0   :  { %v5168_v7 = vsub.f32 %v3155_v33, %v3188_v5  ;;  %v3205_v8 = vmul.f32 %v5166_v3, %v5166_v3  ;;  %v4044_v5 = vld [vmem:[%s5455_s5] ss:$0 sm:$0xff] }
 0x7b2   :  { %v3215_v9 = vsel %vm103_vm0, %v3205_v8, 0.0  ;;  %v3204_v10 = vmul.f32 %v5168_v7, %v5168_v7 }
 0x7b3   :  { %3216 = vadd.xlane.f32.xlu0 %v3215_v9 }
 0x7b4   :  { %v3212_v11 = vsel %vm103_vm0, %v3204_v10, 0.0 }
 0x7b5   :  { %v3171_v13 = vpop.xlane.xlu0 %3170  ;;  %3213 = vadd.xlane.f32.xlu1 %v3212_v11 }
 0x7b6   :  { %v3190_v14 = vmul.f32 0.03125, %v3171_v13 }
 0x7b8   :  { %v5176_v15 = vsub.f32 %v3157_v22, %v3190_v14 }
 0x7b9   :  { %v3174_v17 = vpop.xlane.xlu0 %3173  ;;  %v3177_v18 = vpop.xlane.xlu1 %3176 }
 0x7ba   :  { %v3191_v21 = vmul.f32 0.03125, %v3174_v17  ;;  %v3192_v23 = vmul.f32 0.03125, %v3177_v18  ;;  %v3206_v25 = vmul.f32 %v5176_v15, %v5176_v15 }
 0x7bc   :  { %v5180_v27 = vsub.f32 %v3158_v19, %v3191_v21  ;;  %v5182_v30 = vsub.f32 %v3159_v57, %v3192_v23  ;;  %v3218_v31 = vsel %vm103_vm0, %v3206_v25, 0.0  ;;  %v79_v19 = vld [vmem:[%s5453_s7 + $0x18] sm:$0xff]  ;;  %v4045_v25 = vld [vmem:[%s5456_s6] ss:$0 sm:$0xff] }
 0x7bd   :  { %v3180_v32 = vpop.xlane.xlu0 %3179  ;;  %3219 = vadd.xlane.f32.xlu1 %v3218_v31  ;;  %v3183_v33 = vpop.xlane.xlu1 %3182  ;;  %4416 = vmatprep.subr.mxu1 %v79_v19 }
 0x7be   :  { %v3193_v34 = vmul.f32 0.03125, %v3180_v32  ;;  %v3194_v35 = vmul.f32 0.03125, %v3183_v33  ;;  %v3207_v29 = vmul.f32 %v5180_v27, %v5180_v27  ;;  %v3208_v36 = vmul.f32 %v5182_v30, %v5182_v30  ;;  %4417 = vmatpush3.msra.mxu1 %v79_v19 }
 0x7bf   :  { %4418 = vmatprep.subr.mxu1 %v78_v46 }
 0x7c0   :  { %v5189_v28 = vsub.f32 %v3160_v54, %v3193_v34  ;;  %v5191_v37 = vsub.f32 %v3161_v56, %v3194_v35  ;;  %v3221_v38 = vsel %vm103_vm0, %v3207_v29, 0.0  ;;  %v3224_v39 = vsel %vm103_vm0, %v3208_v36, 0.0  ;;  %4419 = vmatpush3.msra.mxu1 %v78_v46 }
 0x7c1   :  { %3222 = vadd.xlane.f32.xlu0 %v3221_v38  ;;  %v3186_v40 = vpop.xlane.xlu0 %3185  ;;  %3225 = vadd.xlane.f32.xlu1 %v3224_v39 }
 0x7c2   :  { %v3195_v41 = vmul.f32 0.03125, %v3186_v40  ;;  %v3209_v42 = vmul.f32 %v5189_v28, %v5189_v28  ;;  %v3210_v43 = vmul.f32 %v5191_v37, %v5191_v37  ;;  %4420 = vmatprep.subr.mxu1 %v77_v26 }
 0x7c3   :  { %4421 = vmatpush3.msra.mxu1 %v77_v26 }
 0x7c4   :  { %v5199_v16 = vsub.f32 %v3162_v62, %v3195_v41  ;;  %v3227_v20 = vsel %vm103_vm0, %v3209_v42, 0.0  ;;  %v3230_v22 = vsel %vm103_vm0, %v3210_v43, 0.0  ;;  %4422 = vmatprep.subr.mxu1 %v76_v47 }
 0x7c5   :  { %3228 = vadd.xlane.f32.xlu0 %v3227_v20  ;;  %3231 = vadd.xlane.f32.xlu1 %v3230_v22 }
 0x7c6   :  { %v3211_v44 = vmul.f32 %v5199_v16, %v5199_v16  ;;  %4423 = vmatpush3.msra.mxu1 %v76_v47 }
 0x7c7   :  { %4464 = vmatprep.subr.mxu1 %v4597_v12 }
 0x7c8   :  { %v3233_v45 = vsel %vm103_vm0, %v3211_v44, 0.0 }
 0x7c9   :  { %3234 = vadd.xlane.f32.xlu0 %v3233_v45 }
 0x83c   :  { %v3217_v55 = vpop.xlane.xlu0 %3216 }
 0x83d   :  { %v3237_v57 = vmul.f32 0.03125, %v3217_v55 }
 0x83e   :  { %v3214_v59 = vpop.xlane.xlu1 %3213 }
 0x83f   :  { %v3245_v60 = vadd.f32 1e-05, %v3237_v57  ;;  %v3236_v48 = vmul.f32 0.03125, %v3214_v59 }
 0x841   :  { %4557 = vrsqrt.f32 %v3245_v60  ;;  %v3244_v50 = vadd.f32 1e-05, %v3236_v48 }
 0x843   :  { %4559 = vrsqrt.f32 %v3244_v50 }
 0x846   :  { %v3220_v52 = vpop.xlane.xlu1 %3219 }
 0x847   :  { %v3238_v54 = vmul.f32 0.03125, %v3220_v52 }
 0x849   :  { %v3246_v4 = vadd.f32 1e-05, %v3238_v54 }
 0x84a   :  { %v3223_v56 = vpop.xlane.xlu0 %3222  ;;  %v3226_v6 = vpop.xlane.xlu1 %3225 }
 0x84b   :  { %4561 = vrsqrt.f32 %v3246_v4  ;;  %v3239_v61 = vmul.f32 0.03125, %v3223_v56  ;;  %v3240_v58 = vmul.f32 0.03125, %v3226_v6 }
 0x84d   :  { %v3247_v62 = vadd.f32 1e-05, %v3239_v61  ;;  %v3248_v63 = vadd.f32 1e-05, %v3240_v58 }
 0x84e   :  { %v4558_v0 = vpop.eup %4557  ;;  %v3229_v1 = vpop.xlane.xlu0 %3228 }
 0x84f   :  { %v3232_v2 = vpop.xlane.xlu1 %3231  ;;  %v3261_v8 = vmul.f32 %v4558_v0, %v5166_v3  ;;  %4563 = vrsqrt.f32 %v3247_v62  ;;  %v3241_v9 = vmul.f32 0.03125, %v3229_v1 }
 0x850   :  { %v3242_v10 = vmul.f32 0.03125, %v3232_v2  ;;  %v4560_v11 = vpop.eup %4559  ;;  %4565 = vrsqrt.f32 %v3248_v63 }
 0x851   :  { %v3249_v13 = vadd.f32 1e-05, %v3241_v9  ;;  %v3260_v17 = vmul.f32 %v4560_v11, %v5168_v7  ;;  %v3275_v18 = vmul.f32 %v4044_v5, %v3261_v8 }
 0x852   :  { %v3250_v14 = vadd.f32 1e-05, %v3242_v10  ;;  %v3235_v21 = vpop.xlane.xlu0 %3234 }
 0x853   :  { %4567 = vrsqrt.f32 %v3249_v13  ;;  %v3243_v23 = vmul.f32 0.03125, %v3235_v21  ;;  %v3274_v31 = vmul.f32 %v4044_v5, %v3260_v17  ;;  %v5241_v33 = vadd.f32 %v4045_v25, %v3275_v18 }
 0x854   :  { %4569 = vrsqrt.f32 %v3250_v14  ;;  %v4055_v14 = vld [vmem:[%s5458_s10] ss:$0 sm:$0xff] }
 0x855   :  { %v3251_v3 = vadd.f32 1e-05, %v3243_v23  ;;  %v5239_v32 = vadd.f32 %v4045_v25, %v3274_v31 }
 0x857   :  { %4571 = vrsqrt.f32 %v3251_v3  ;;  %4424 = vmatprep.mubr.msk.f32.mxu1 %vm103_vm0, %v5239_v32 }
 0x858   :  { %v4562_v7 = vpop.eup %4561  ;;  %4425 = vmatmul.mubr.msk.f32.vlgmr.msra.gmra.mxu1 %vm103_vm0, %v5241_v33 }
 0x859   :  { %v3262_v34 = vmul.f32 %v4562_v7, %v5176_v15 }
 0x85b   :  { %v3276_v35 = vmul.f32 %v4044_v5, %v3262_v34 }
 0x85c   :  { %v4564_v29 = vpop.eup %4563 }
 0x85d   :  { %v4566_v36 = vpop.eup %4565  ;;  %v5248_v38 = vadd.f32 %v4045_v25, %v3276_v35  ;;  %v3263_v39 = vmul.f32 %v4564_v29, %v5180_v27 }
 0x85e   :  { %v3264_v40 = vmul.f32 %v4566_v36, %v5182_v30 }
 0x85f   :  { %4427 = vmatprep.mubr.msk.f32.mxu1 %vm103_vm0, %v5248_v38  ;;  %v3277_v41 = vmul.f32 %v4044_v5, %v3263_v39 }
 0x860   :  { %v4568_v42 = vpop.eup %4567  ;;  %v3278_v43 = vmul.f32 %v4044_v5, %v3264_v40 }
 0x861   :  { %v4570_v20 = vpop.eup %4569  ;;  %v5254_v22 = vadd.f32 %v4045_v25, %v3277_v41  ;;  %v3265_v15 = vmul.f32 %v4568_v42, %v5189_v28 }
 0x862   :  { %v5257_v44 = vadd.f32 %v4045_v25, %v3278_v43  ;;  %v3266_v45 = vmul.f32 %v4570_v20, %v5191_v37 }
 0x863   :  { %4428 = vmatmul.mubr.msk.f32.gmra.mxu1 %vm103_vm0, %v5254_v22  ;;  %v3279_v27 = vmul.f32 %v4044_v5, %v3265_v15 }
 0x864   :  { %v4572_v30 = vpop.eup %4571  ;;  %4430 = vmatprep.mubr.msk.f32.mxu1 %vm103_vm0, %v5257_v44  ;;  %v3280_v19 = vmul.f32 %v4044_v5, %v3266_v45 }
 0x865   :  { %v5264_v46 = vadd.f32 %v4045_v25, %v3279_v27  ;;  %v3267_v26 = vmul.f32 %v4572_v30, %v5199_v16  ;;  %v84_v16 = vld [vmem:[%s5454_s9 + $0x18] sm:$0xff] }
 0x866   :  { %v5267_v47 = vadd.f32 %v4045_v25, %v3280_v19  ;;  %4444 = vmatprep.subr.mxu0 %v84_v16 }
 0x867   :  { %4431 = vmatmul.mubr.msk.f32.gmra.mxu1 %vm103_vm0, %v5264_v46  ;;  %v3281_v28 = vmul.f32 %v4044_v5, %v3267_v26  ;;  %4445 = vmatpush3.msra.mxu0 %v84_v16 }
 0x868   :  { %4433 = vmatprep.mubr.msk.f32.mxu1 %vm103_vm0, %v5267_v47  ;;  %4446 = vmatprep.subr.mxu0 %v83_v49 }
 0x869   :  { %v5273_v37 = vadd.f32 %v4045_v25, %v3281_v28  ;;  %4447 = vmatpush3.msra.mxu0 %v83_v49 }
 0x86a   :  { %4448 = vmatprep.subr.mxu0 %v82_v24 }
 0x86b   :  { %4434 = vmatmul.mubr.msk.f32.gmra.mxu1 %vm103_vm0, %v5273_v37  ;;  %4449 = vmatpush3.msra.mxu0 %v82_v24 }
 0x86c   :  { %4472 = vmatprep.mubr.msk.f32.mxu1 %vm4598_vm1, %v4597_v12  ;;  %4450 = vmatprep.subr.mxu0 %v81_v51 }
 0x86d   :  { %4451 = vmatpush3.msra.mxu0 %v81_v51 }
 0x86e   :  { %4475 = vmatprep.subr.mxu0 %v4597_v12 }
 0x918   :  { %v4426_v55 = vpop.f32.mrf.mxu1 }
 0x919   :  { %v3398_v57 = vadd.f32 %v4426_v55, %v4046_v53 }
 0x91a   :  { %v3392_v59 = vpop.f32.mrf.mxu1 }
 0x91b   :  { %v3393_v60 = vadd.f32 %v4046_v53, %v3392_v59  ;;  %v3432_v50 = vmax.f32 %v3398_v57, 0.0 }
 0x91d   :  { %v3431_v48 = vmax.f32 %v3393_v60, 0.0 }
 0x91f   :  { %4452 = vmatprep.mubr.msk.f32.mxu0 %vm3445_vm4, %v3431_v48 }
 0x920   :  { %4453 = vmatmul.mubr.msk.f32.vlgmr.msra.gmra.mxu0 %vm3445_vm4, %v3432_v50 }
 0x923   :  { %v4429_v52 = vpop.f32.mrf.mxu1 }
 0x924   :  { %v3408_v54 = vadd.f32 %v4429_v52, %v4046_v53 }
 0x925   :  { %v3402_v4 = vpop.f32.mrf.mxu1 }
 0x926   :  { %v3403_v56 = vadd.f32 %v4046_v53, %v3402_v4  ;;  %v3434_v58 = vmax.f32 %v3408_v54, 0.0 }
 0x927   :  { %v4432_v6 = vpop.f32.mrf.mxu1 }
 0x928   :  { %v3433_v61 = vmax.f32 %v3403_v56, 0.0  ;;  %v3418_v62 = vadd.f32 %v4432_v6, %v4046_v53 }
 0x929   :  { %v3412_v63 = vpop.f32.mrf.mxu1 }
 0x92a   :  { %v3413_v0 = vadd.f32 %v4046_v53, %v3412_v63  ;;  %4455 = vmatprep.mubr.msk.f32.mxu0 %vm3445_vm4, %v3433_v61  ;;  %v3436_v5 = vmax.f32 %v3418_v62, 0.0 }
 0x92b   :  { %v4435_v1 = vpop.f32.mrf.mxu1  ;;  %4456 = vmatmul.mubr.msk.f32.gmra.mxu0 %vm3445_vm4, %v3434_v58 }
 0x92c   :  { %v3435_v2 = vmax.f32 %v3413_v0, 0.0  ;;  %v3428_v8 = vadd.f32 %v4435_v1, %v4046_v53 }
 0x92d   :  { %v3422_v9 = vpop.f32.mrf.mxu1 }
 0x92e   :  { %v3423_v10 = vadd.f32 %v4046_v53, %v3422_v9  ;;  %4458 = vmatprep.mubr.msk.f32.mxu0 %vm3445_vm4, %v3435_v2  ;;  %v3438_v13 = vmax.f32 %v3428_v8, 0.0 }
 0x92f   :  { %4459 = vmatmul.mubr.msk.f32.gmra.mxu0 %vm3445_vm4, %v3436_v5 }
 0x930   :  { %v3437_v11 = vmax.f32 %v3423_v10, 0.0 }
 0x932   :  { %4461 = vmatprep.mubr.msk.f32.mxu0 %vm3445_vm4, %v3437_v11 }
 0x933   :  { %4462 = vmatmul.mubr.msk.f32.gmra.mxu0 %vm3445_vm4, %v3438_v13 }
 0x934   :  { %4483 = vmatprep.mubr.msk.f32.mxu0 %vm4598_vm1, %v4597_v12 }
 0x9e0   :  { %v4454_v17 = vpop.f32.mrf.mxu0 }
 0x9e1   :  { %v3542_v18 = vadd.f32 %v4454_v17, %v4055_v14 }
 0x9e2   :  { %v3536_v21 = vpop.f32.mrf.mxu0 }
 0x9e3   :  { %v3537_v23 = vadd.f32 %v4055_v14, %v3536_v21  ;;  %v3576_v25 = vadd.f32 %v3542_v18, %v5241_v33 }
 0x9e5   :  { %v3586_v31 = vsel %vm103_vm0, %v3576_v25, 0.0  ;;  %v3575_v3 = vadd.f32 %v3537_v23, %v5239_v32 }
 0x9e6   :  { %3587 = vadd.xlane.f32.xlu0 %v3586_v31 }
 0x9e7   :  { %v3583_v7 = vsel %vm103_vm0, %v3575_v3, 0.0 }
 0x9e8   :  { %3584 = vadd.xlane.f32.xlu1 %v3583_v7 }
 0x9eb   :  { %v4457_v34 = vpop.f32.mrf.mxu0 }
 0x9ec   :  { %v3552_v35 = vadd.f32 %v4457_v34, %v4055_v14 }
 0x9ed   :  { %v3546_v29 = vpop.f32.mrf.mxu0 }
 0x9ee   :  { %v3547_v36 = vadd.f32 %v4055_v14, %v3546_v29  ;;  %v3578_v39 = vadd.f32 %v3552_v35, %v5254_v22  ;;  %v95_v35 = vld [vmem:[%s5459_s13 + $0x18] sm:$0xff]  ;;  %v94_v29 = vld [vmem:[%s5459_s13 + $0x10] sm:$0xff] }
 0x9ef   :  { %v4460_v40 = vpop.f32.mrf.mxu0  ;;  %4465 = vmatpush3.msra.mxu1 %v95_v35 }
 0x9f0   :  { %v3562_v41 = vadd.f32 %v4460_v40, %v4055_v14  ;;  %v3592_v42 = vsel %vm103_vm0, %v3578_v39, 0.0  ;;  %v3577_v33 = vadd.f32 %v3547_v36, %v5248_v38  ;;  %4466 = vmatprep.subr.mxu1 %v4597_v12  ;;  %v93_v36 = vld [vmem:[%s5459_s13 + $0x8] sm:$0xff]  ;;  %v3883_v40 = vld [vmem:[%s5460_s15 + $0x18] sm:$0xff] }
 0x9f1   :  { %3593 = vadd.xlane.f32.xlu0 %v3592_v42  ;;  %v3556_v43 = vpop.f32.mrf.mxu0  ;;  %4467 = vmatpush3.msra.mxu1 %v94_v29  ;;  %v3881_v42 = vld [vmem:[%s5460_s15 + $0x8] sm:$0xff] }
 0x9f2   :  { %v3557_v20 = vadd.f32 %v4055_v14, %v3556_v43  ;;  %v3589_v32 = vsel %vm103_vm0, %v3577_v33, 0.0  ;;  %v3580_v15 = vadd.f32 %v3562_v41, %v5264_v46  ;;  %4468 = vmatprep.subr.mxu1 %v4597_v12  ;;  %v3882_v41 = vld [vmem:[%s5460_s15 + $0x10] sm:$0xff]  ;;  %4476 = vmatpush3.msra.mxu0 %v3883_v40 }
 0x9f3   :  { %3590 = vadd.xlane.f32.xlu1 %v3589_v32  ;;  %v4463_v45 = vpop.f32.mrf.mxu0  ;;  %4469 = vmatpush3.msra.mxu1 %v93_v36 }
 0x9f4   :  { %v3572_v27 = vadd.f32 %v4463_v45, %v4055_v14  ;;  %v3598_v30 = vsel %vm103_vm0, %v3580_v15, 0.0  ;;  %v3579_v22 = vadd.f32 %v3557_v20, %v5257_v44  ;;  %4470 = vmatprep.subr.mxu1 %v4597_v12  ;;  %4477 = vmatprep.subr.mxu0 %v4597_v12 }
 0x9f5   :  { %3599 = vadd.xlane.f32.xlu0 %v3598_v30  ;;  %v3566_v19 = vpop.f32.mrf.mxu0  ;;  %4478 = vmatpush3.msra.mxu0 %v3882_v41 }
 0x9f6   :  { %v3567_v26 = vadd.f32 %v4055_v14, %v3566_v19  ;;  %v3595_v28 = vsel %vm103_vm0, %v3579_v22, 0.0  ;;  %v3582_v38 = vadd.f32 %v3572_v27, %v5273_v37  ;;  %4479 = vmatprep.subr.mxu0 %v4597_v12 }
 0x9f7   :  { %3596 = vadd.xlane.f32.xlu1 %v3595_v28  ;;  %4480 = vmatpush3.msra.mxu0 %v3881_v42 }
 0x9f8   :  { %v3604_v16 = vsel %vm103_vm0, %v3582_v38, 0.0  ;;  %v3581_v49 = vadd.f32 %v3567_v26, %v5267_v47  ;;  %4481 = vmatprep.subr.mxu0 %v4597_v12  ;;  %v5394_v12 = vld [vmem:[%s5461_s11] ss:$0 sm:$0xff] }
 0x9f9   :  { %3605 = vadd.xlane.f32.xlu0 %v3604_v16 }
 0x9fa   :  { %v3601_v46 = vsel %vm103_vm0, %v3581_v49, 0.0 }
 0x9fb   :  { %3602 = vadd.xlane.f32.xlu1 %v3601_v46 }
 0xa6f   :  { %v3588_v24 = vpop.xlane.xlu0 %3587 }
 0xa70   :  { %v3608_v51 = vmul.f32 0.03125, %v3588_v24 }
 0xa71   :  { %v3585_v53 = vpop.xlane.xlu1 %3584 }
 0xa72   :  { %v5324_v44 = vsub.f32 %v3576_v25, %v3608_v51  ;;  %v3607_v55 = vmul.f32 0.03125, %v3585_v53 }
 0xa74   :  { %v5326_v57 = vsub.f32 %v3575_v3, %v3607_v55  ;;  %v3624_v37 = vmul.f32 %v5324_v44, %v5324_v44 }
 0xa76   :  { %v3634_v59 = vsel %vm103_vm0, %v3624_v37, 0.0  ;;  %v3623_v47 = vmul.f32 %v5326_v57, %v5326_v57 }
 0xa77   :  { %3635 = vadd.xlane.f32.xlu0 %v3634_v59  ;;  %v5400_v59 = vld [vmem:[%s5462_s12] ss:$0 sm:$0xff] }
 0xa78   :  { %v3631_v60 = vsel %vm103_vm0, %v3623_v47, 0.0 }
 0xa79   :  { %3632 = vadd.xlane.f32.xlu1 %v3631_v60 }
 0xa7a   :  { %v3594_v48 = vpop.xlane.xlu0 %3593 }
 0xa7b   :  { %v3610_v50 = vmul.f32 0.03125, %v3594_v48 }
 0xa7c   :  { %v3591_v52 = vpop.xlane.xlu1 %3590 }
 0xa7d   :  { %v5334_v54 = vsub.f32 %v3578_v39, %v3610_v50  ;;  %v3609_v4 = vmul.f32 0.03125, %v3591_v52  ;;  %v92_v39 = vld [vmem:[%s5459_s13] sm:$0xff] }
 0xa7e   :  { %v3600_v56 = vpop.xlane.xlu0 %3599  ;;  %4471 = vmatpush3.msra.mxu1 %v92_v39 }
 0xa7f   :  { %v5336_v6 = vsub.f32 %v3577_v33, %v3609_v4  ;;  %v3612_v61 = vmul.f32 0.03125, %v3600_v56  ;;  %v3626_v58 = vmul.f32 %v5334_v54, %v5334_v54 }
 0xa80   :  { %v3597_v62 = vpop.xlane.xlu1 %3596 }
 0xa81   :  { %v5340_v63 = vsub.f32 %v3580_v15, %v3612_v61  ;;  %v3611_v0 = vmul.f32 0.03125, %v3597_v62  ;;  %v3640_v1 = vsel %vm103_vm0, %v3626_v58, 0.0  ;;  %v3625_v2 = vmul.f32 %v5336_v6, %v5336_v6 }
 0xa82   :  { %3641 = vadd.xlane.f32.xlu0 %v3640_v1  ;;  %v3606_v5 = vpop.xlane.xlu0 %3605 }
 0xa83   :  { %v5345_v8 = vsub.f32 %v3579_v22, %v3611_v0  ;;  %v3614_v9 = vmul.f32 0.03125, %v3606_v5  ;;  %v3637_v10 = vsel %vm103_vm0, %v3625_v2, 0.0  ;;  %v3628_v11 = vmul.f32 %v5340_v63, %v5340_v63 }
 0xa84   :  { %3638 = vadd.xlane.f32.xlu1 %v3637_v10  ;;  %v3603_v13 = vpop.xlane.xlu1 %3602 }
 0xa85   :  { %v5350_v14 = vsub.f32 %v3582_v38, %v3614_v9  ;;  %v3613_v17 = vmul.f32 0.03125, %v3603_v13  ;;  %v3646_v18 = vsel %vm103_vm0, %v3628_v11, 0.0  ;;  %v3627_v21 = vmul.f32 %v5345_v8, %v5345_v8 }
 0xa86   :  { %3647 = vadd.xlane.f32.xlu0 %v3646_v18 }
 0xa87   :  { %v5355_v23 = vsub.f32 %v3581_v49, %v3613_v17  ;;  %v3643_v25 = vsel %vm103_vm0, %v3627_v21, 0.0  ;;  %v3630_v31 = vmul.f32 %v5350_v14, %v5350_v14 }
 0xa88   :  { %3644 = vadd.xlane.f32.xlu1 %v3643_v25 }
 0xa89   :  { %v3652_v3 = vsel %vm103_vm0, %v3630_v31, 0.0  ;;  %v3629_v7 = vmul.f32 %v5355_v23, %v5355_v23 }
 0xa8a   :  { %3653 = vadd.xlane.f32.xlu0 %v3652_v3 }
 0xa8b   :  { %v3649_v34 = vsel %vm103_vm0, %v3629_v7, 0.0 }
 0xa8c   :  { %3650 = vadd.xlane.f32.xlu1 %v3649_v34 }
 0xb00   :  { %v3636_v33 = vpop.xlane.xlu0 %3635 }
 0xb01   :  { %v3656_v43 = vmul.f32 0.03125, %v3636_v33 }
 0xb02   :  { %v3633_v20 = vpop.xlane.xlu1 %3632 }
 0xb03   :  { %v3664_v32 = vadd.f32 1e-05, %v3656_v43  ;;  %v3655_v15 = vmul.f32 0.03125, %v3633_v20 }
 0xb05   :  { %4573 = vrsqrt.f32 %v3664_v32  ;;  %v3663_v45 = vadd.f32 1e-05, %v3655_v15 }
 0xb07   :  { %4575 = vrsqrt.f32 %v3663_v45 }
 0xb0b   :  { %v3642_v27 = vpop.xlane.xlu0 %3641 }
 0xb0c   :  { %v3658_v30 = vmul.f32 0.03125, %v3642_v27 }
 0xb0d   :  { %v3639_v22 = vpop.xlane.xlu1 %3638 }
 0xb0e   :  { %v3666_v19 = vadd.f32 1e-05, %v3658_v30  ;;  %v3657_v26 = vmul.f32 0.03125, %v3639_v22 }
 0xb0f   :  { %v3648_v28 = vpop.xlane.xlu0 %3647 }
 0xb10   :  { %4577 = vrsqrt.f32 %v3666_v19  ;;  %v3665_v38 = vadd.f32 1e-05, %v3657_v26  ;;  %v3660_v16 = vmul.f32 0.03125, %v3648_v28 }
 0xb11   :  { %v3645_v49 = vpop.xlane.xlu1 %3644 }
 0xb12   :  { %v4574_v46 = vpop.eup %4573  ;;  %4579 = vrsqrt.f32 %v3665_v38  ;;  %v3668_v24 = vadd.f32 1e-05, %v3660_v16  ;;  %v3659_v51 = vmul.f32 0.03125, %v3645_v49 }
 0xb13   :  { %v3680_v53 = vmul.f32 %v4574_v46, %v5324_v44  ;;  %v3654_v55 = vpop.xlane.xlu0 %3653 }
 0xb14   :  { %v4576_v37 = vpop.eup %4575  ;;  %4581 = vrsqrt.f32 %v3668_v24  ;;  %v3667_v47 = vadd.f32 1e-05, %v3659_v51  ;;  %v3662_v60 = vmul.f32 0.03125, %v3654_v55 }
 0xb15   :  { %v3694_v48 = vmul.f32 %v5394_v12, %v3680_v53  ;;  %v3679_v50 = vmul.f32 %v4576_v37, %v5326_v57  ;;  %v3651_v52 = vpop.xlane.xlu1 %3650 }
 0xb16   :  { %4583 = vrsqrt.f32 %v3667_v47  ;;  %v3670_v4 = vadd.f32 1e-05, %v3662_v60  ;;  %v3661_v56 = vmul.f32 0.03125, %v3651_v52 }
 0xb17   :  { %v3708_v44 = vadd.f32 %v5400_v59, %v3694_v48  ;;  %v3693_v61 = vmul.f32 %v5394_v12, %v3679_v50 }
 0xb18   :  { %4585 = vrsqrt.f32 %v3670_v4  ;;  %v3669_v58 = vadd.f32 1e-05, %v3661_v56 }
 0xb19   :  { %v3722_v62 = vsel %vm103_vm0, %v3708_v44, 0.0  ;;  %v3707_v0 = vadd.f32 %v5400_v59, %v3693_v61 }
 0xb1a   :  { %v3723_v1 = vrot.slane %v3722_v62, 4  ;;  %4587 = vrsqrt.f32 %v3669_v58 }
 0xb1b   :  { %v3715_v2 = vsel %vm103_vm0, %v3707_v0, 0.0 }
 0xb1c   :  { %v3716_v5 = vrot.slane %v3715_v2, 4  ;;  %v3724_v9 = vadd.f32 %v3723_v1, %v3722_v62 }
 0xb1d   :  { %v4578_v57 = vpop.eup %4577 }
 0xb1e   :  { %v3717_v10 = vadd.f32 %v3716_v5, %v3715_v2  ;;  %v3682_v11 = vmul.f32 %v4578_v57, %v5334_v54  ;;  %v3725_v31 = vrot.slane %v3724_v9, 2 }
 0xb1f   :  { %v4580_v13 = vpop.eup %4579 }
 0xb20   :  { %v3718_v17 = vrot.slane %v3717_v10, 2  ;;  %v3696_v18 = vmul.f32 %v5394_v12, %v3682_v11  ;;  %v3681_v21 = vmul.f32 %v4580_v13, %v5336_v6  ;;  %v3726_v42 = vadd.f32 %v3725_v31, %v3724_v9 }
 0xb21   :  { %v4582_v25 = vpop.eup %4581 }
 0xb22   :  { %v3710_v3 = vadd.f32 %v5400_v59, %v3696_v18  ;;  %v3695_v7 = vmul.f32 %v5394_v12, %v3681_v21  ;;  %v3684_v35 = vmul.f32 %v4582_v25, %v5340_v63  ;;  %v3719_v29 = vadd.f32 %v3718_v17, %v3717_v10 }
 0xb23   :  { %v4584_v34 = vpop.eup %4583  ;;  %v3727_v38 = vrot.slane %v3726_v42, 1 }
 0xb24   :  { %v3736_v36 = vsel %vm103_vm0, %v3710_v3, 0.0  ;;  %v3709_v54 = vadd.f32 %v5400_v59, %v3695_v7  ;;  %v3698_v41 = vmul.f32 %v5394_v12, %v3684_v35  ;;  %v3683_v6 = vmul.f32 %v4584_v34, %v5345_v8 }
 0xb25   :  { %v4586_v39 = vpop.eup %4585  ;;  %v3737_v40 = vrot.slane %v3736_v36, 4  ;;  %v3720_v27 = vrot.slane %v3719_v29, 1  ;;  %v3728_v50 = vadd.f32 %v3727_v38, %v3726_v42 }
 0xb26   :  { %v3729_v33 = vsel %vm103_vm0, %v3709_v54, 0.0  ;;  %v3686_v43 = vmul.f32 %v4586_v39, %v5350_v14  ;;  %v3712_v63 = vadd.f32 %v5400_v59, %v3698_v41  ;;  %v3697_v45 = vmul.f32 %v5394_v12, %v3683_v6 }
 0xb27   :  { %v4588_v20 = vpop.eup %4587  ;;  %v3738_v32 = vadd.f32 %v3737_v40, %v3736_v36  ;;  %v3730_v15 = vrot.slane %v3729_v33, 4  ;;  %v3721_v47 = vadd.f32 %v3720_v27, %v3719_v29  ;;  %v3773_v10 = vmul.f32 0.125, %v3728_v50 }
 0xb28   :  { %v3700_v30 = vmul.f32 %v5394_v12, %v3686_v43  ;;  %v3685_v22 = vmul.f32 %v4588_v20, %v5355_v23  ;;  %v3750_v8 = vsel %vm103_vm0, %v3712_v63, 0.0  ;;  %v3711_v28 = vadd.f32 %v5400_v59, %v3697_v45  ;;  %v3880_v63 = vld [vmem:[%s5460_s15] sm:$0xff] }
 0xb29   :  { %v3739_v19 = vrot.slane %v3738_v32, 2  ;;  %v3731_v26 = vadd.f32 %v3730_v15, %v3729_v33  ;;  %v3751_v14 = vrot.slane %v3750_v8, 4  ;;  %v3772_v5 = vmul.f32 0.125, %v3721_v47  ;;  %4482 = vmatpush3.msra.mxu0 %v3880_v63  ;;  %v4066_v45 = vld [vmem:[%s5463_s14] ss:$0 sm:$0xff] }
 0xb2a   :  { %v3714_v16 = vadd.f32 %v5400_v59, %v3700_v30  ;;  %v3699_v49 = vmul.f32 %v5394_v12, %v3685_v22  ;;  %v3743_v24 = vsel %vm103_vm0, %v3711_v28, 0.0 }
 0xb2b   :  { %v3732_v46 = vrot.slane %v3731_v26, 2  ;;  %v3740_v51 = vadd.f32 %v3739_v19, %v3738_v32  ;;  %v3744_v53 = vrot.slane %v3743_v24, 4  ;;  %v3752_v23 = vadd.f32 %v3751_v14, %v3750_v8  ;;  %v4068_v19 = vld [vmem:[%s5464_s16] ss:$0 sm:$0xff] }
 0xb2c   :  { %v3713_v55 = vadd.f32 %v5400_v59, %v3699_v49  ;;  %v3764_v37 = vsel %vm103_vm0, %v3714_v16, 0.0  ;;  %v3795_v3 = vsel %vm3794_vm5, %v3773_v10, %v3772_v5 }
 0xb2d   :  { %v3733_v60 = vadd.f32 %v3732_v46, %v3731_v26  ;;  %v3765_v48 = vrot.slane %v3764_v37, 4  ;;  %v3745_v52 = vadd.f32 %v3744_v53, %v3743_v24  ;;  %v3753_v4 = vrot.slane %v3752_v23, 2 }
 0xb2e   :  { %v3757_v56 = vsel %vm103_vm0, %v3713_v55, 0.0  ;;  %v3741_v12 = vrot.slane %v3740_v51, 1 }
 0xb2f   :  { %v3734_v44 = vrot.slane %v3733_v60, 1  ;;  %v3758_v61 = vrot.slane %v3757_v56, 4  ;;  %v3766_v58 = vadd.f32 %v3765_v48, %v3764_v37  ;;  %v3746_v62 = vrot.slane %v3745_v52, 2 }
 0xb30   :  { %v3754_v0 = vadd.f32 %v3753_v4, %v3752_v23  ;;  %v3742_v11 = vadd.f32 %v3741_v12, %v3740_v51 }
 0xb31   :  { %v3735_v1 = vadd.f32 %v3734_v44, %v3733_v60  ;;  %v3759_v59 = vadd.f32 %v3758_v61, %v3757_v56  ;;  %v3767_v2 = vrot.slane %v3766_v58, 2  ;;  %v3747_v57 = vadd.f32 %v3746_v62, %v3745_v52 }
 0xb32   :  { %v3755_v9 = vrot.slane %v3754_v0, 1  ;;  %v3775_v36 = vmul.f32 0.125, %v3742_v11 }
 0xb33   :  { %v3760_v13 = vrot.slane %v3759_v59, 2  ;;  %v3768_v17 = vadd.f32 %v3767_v2, %v3766_v58  ;;  %v3774_v18 = vmul.f32 0.125, %v3735_v1  ;;  %v3748_v21 = vrot.slane %v3747_v57, 1 }
 0xb34   :  { %v3756_v34 = vadd.f32 %v3755_v9, %v3754_v0 }
 0xb35   :  { %v3761_v25 = vadd.f32 %v3760_v13, %v3759_v59  ;;  %v3769_v31 = vrot.slane %v3768_v17, 1  ;;  %v3749_v7 = vadd.f32 %v3748_v21, %v3747_v57  ;;  %v3797_v35 = vsel %vm3796_vm6, %v3774_v18, %v3795_v3 }
 0xb36   :  { %v3799_v41 = vsel %vm3798_vm7, %v3775_v36, %v3797_v35  ;;  %v3777_v6 = vmul.f32 0.125, %v3756_v34 }
 0xb37   :  { %v3762_v29 = vrot.slane %v3761_v25, 1  ;;  %v3770_v54 = vadd.f32 %v3769_v31, %v3768_v17  ;;  %v3776_v39 = vmul.f32 0.125, %v3749_v7 }
 0xb39   :  { %v3763_v40 = vadd.f32 %v3762_v29, %v3761_v25  ;;  %v3801_v42 = vsel %vm3800_vm8, %v3776_v39, %v3799_v41  ;;  %v3779_v43 = vmul.f32 0.125, %v3770_v54 }
 0xb3a   :  { %v3803_v20 = vsel %vm3802_vm9, %v3777_v6, %v3801_v42 }
 0xb3b   :  { %v3778_v33 = vmul.f32 0.125, %v3763_v40 }
 0xb3d   :  { %v3805_v32 = vsel %vm3804_vm10, %v3778_v33, %v3803_v20 }
 0xb3e   :  { %v3807_v15 = vsel %vm3806_vm11, %v3779_v43, %v3805_v32 }
 0xb3f   :  { %4473 = vmatmul.mubr.msk.f32.vlgmr.msra.gmra.mxu1 %vm103_vm0, %v3807_v15 }
 0xbff   :  { %v3876_v27 = vpop.f32.mrf.mxu1 }
 0xc00   :  { %v3877_v30 = vadd.f32 %v4066_v45, %v3876_v27 }
 0xc01   :  { %v4474_v22 = vpop.f32.mrf.mxu1 }
 0xc02   :  { %4484 = vmatmul.mubr.msk.f32.vlgmr.msra.gmra.mxu0 %vm103_vm0, %v3877_v30 }
 0xcc2   :  { %v3960_v26 = vpop.f32.mrf.mxu0 }
 0xcc3   :  { %v3961_v8 = vadd.f32 %v4068_v19, %v3960_v26 }
 0xcc4   :  { %v4485_v28 = vpop.f32.mrf.mxu0 }
 0xcc5   :  { %3965 = vst.msk [vmem:[%s5465_s17] sm:$0xff] %vm3964_vm12, %v3961_v8 }

</bundles_post_ra>
